<compile_context>
chip_gen: v7x
topology: tpu7x:2x2x1
jax: 0.10.0
libtpu: 0.0.40
codegen_flags: <defaults>
</compile_context>

<pallas_src>
import numpy as np
import jax
import jax.numpy as jnp
from jax import lax
from jax.experimental import pallas as pl
from jax.experimental.pallas import tpu as pltpu


NUM_FEATURES = 3                       # filters[0]
CONFIG = dict(
    n_layers=2,
    num_conv_filters=[16, 16, 16],     # -> filters = [3, 16, 16, 16]
    polygon_order=[3, 3, 3],           # K
    num_classes=4,
    num_style=8,                       # z
    num_hidden=32,
    dropout=0.2,                       # eval-mode -> identity
)
NUM_NODES = [64, 32, 16]               # mesh levels 0 (fine) .. 2 (coarse)
BATCH = 2
PAD_B = 8                              # batch rows padded to one sublane group

BF16 = jnp.bfloat16
F32 = jnp.float32

# ---- static layout constants (row offsets inside the packed input slabs) ----
_N0, _N1, _N2 = NUM_NODES
ROWS0, ROWS1, ROWS2 = BATCH * _N0, BATCH * _N1, BATCH * _N2      # 128, 64, 32
F2 = CONFIG["num_conv_filters"][-1]                               # 16
NH, NC, NZ = CONFIG["num_hidden"], CONFIG["num_classes"], CONFIG["num_style"]
FLAT = _N2 * F2                                                   # 256

# graph-operator slab (lane width 128)
R_A0, R_ALAST = 0, ROWS0                                          # 0, 128
R_D0 = R_ALAST + ROWS0                                            # 256
R_U0 = R_D0 + ROWS1                                               # 320
R_A1 = R_U0 + ROWS0                                               # 448
R_D1 = R_A1 + ROWS1                                               # 512
R_U1 = R_D1 + ROWS2                                               # 544
OPS_ROWS = R_U1 + ROWS1                                           # 608

# flatten-constant slab (lane width 256)
R_ECOL, R_MASK, R_RSEL = 0, F2, F2 + ROWS2                        # 0, 16, 48
FC_ROWS = R_RSEL + PAD_B                                          # 56
# transpose-constant slab (lane width 16)
R_RSELT, R_ECOLT = 0, ROWS2                                       # 0, 32
TC_ROWS = R_ECOLT + FLAT                                          # 288

# head lane layout (z_mean | z_log_var | class logits)
H_ZM, H_ZV, H_CLS = 0, NZ, 2 * NZ                                 # 0, 8, 16


# -----------------------------------------------------------------------------
# Fused forward kernel
# -----------------------------------------------------------------------------
def _bdot(a, b):
    """bf16 x bf16 MXU matmul with f32 accumulation."""
    return jnp.dot(a.astype(BF16), b.astype(BF16), preferred_element_type=F32)


def _cheb(x, a, w_ref, bias=None, relu=True):
    """Chebyshev graph conv on block-diag batched nodes.

    x: (N, Fin) f32 value, a: (N, N) bf16 value, w_ref: (K, Fin, Fout) bf16 ref.
      Tx_0 = x ; Tx_1 = A_hat x ; Tx_k = 2 A_hat Tx_{k-1} - Tx_{k-2}
      out  = sum_k Tx_k @ W_k (+ bias) (+ ReLU)
    """
    K = w_ref.shape[0]
    tx_prev = x
    out = _bdot(x, w_ref[0])
    if K > 1:
        tx = _bdot(a, x)
        out = out + _bdot(tx, w_ref[1])
        for k in range(2, K):
            tx_next = 2.0 * _bdot(a, tx) - tx_prev
            out = out + _bdot(tx_next, w_ref[k])
            tx_prev, tx = tx, tx_next
    if bias is not None:
        out = out + bias
    if relu:
        out = jnp.maximum(out, 0.0)
    return out


def _vae_fwd_kernel(
    x_ref, y_ref, ops_ref,
    cwe0_ref, cwe1_ref, cwd0_ref, cwd1_ref, cwd2_ref,
    encw_ref, wy_ref, wh_ref, dlwy_ref, dlwz_ref, dl2w_ref,
    bias_ref, fc_ref, tc_ref,
    out_ref,
):
    x = x_ref[...]                                         # (128, 3) f32
    y = y_ref[...]                                         # (8, 4)   f32 (rows 2:8 zero)

    # ---- packed graph operators (bf16) ----
    a0    = ops_ref[pl.ds(R_A0, ROWS0), :]
    alast = ops_ref[pl.ds(R_ALAST, ROWS0), :]
    d0    = ops_ref[pl.ds(R_D0, ROWS1), :]
    u0    = ops_ref[pl.ds(R_U0, ROWS0), pl.ds(0, ROWS1)]
    a1    = ops_ref[pl.ds(R_A1, ROWS1), pl.ds(0, ROWS1)]
    d1    = ops_ref[pl.ds(R_D1, ROWS2), pl.ds(0, ROWS1)]
    u1    = ops_ref[pl.ds(R_U1, ROWS1), pl.ds(0, ROWS2)]

    # ---- packed flatten / unflatten constants ----
    ecol  = fc_ref[pl.ds(R_ECOL, F2), :]                   # (16, 256) bf16
    mask  = fc_ref[pl.ds(R_MASK, ROWS2), :].astype(F32)    # (32, 256) f32 (0/1)
    rsel  = fc_ref[pl.ds(R_RSEL, PAD_B), pl.ds(0, ROWS2)]  # (8, 32)   bf16
    rselT = tc_ref[pl.ds(R_RSELT, ROWS2), pl.ds(0, PAD_B)] # (32, 8)   bf16
    ecolT = tc_ref[pl.ds(R_ECOLT, FLAT), :]                # (256, 16) bf16

    # ---- packed biases (f32) ----
    cbe0  = bias_ref[pl.ds(0, 1),  pl.ds(0, F2)]
    cbe1  = bias_ref[pl.ds(8, 1),  pl.ds(0, F2)]
    cbd0  = bias_ref[pl.ds(16, 1), pl.ds(0, F2)]
    cbd1  = bias_ref[pl.ds(24, 1), pl.ds(0, F2)]
    encb  = bias_ref[pl.ds(32, 1), pl.ds(0, NH)]
    dlb   = bias_ref[pl.ds(40, 1), pl.ds(0, NH)]
    headb = bias_ref[pl.ds(48, 1), pl.ds(0, 128)]
    dl2b  = bias_ref[pl.ds(56, 1), :]                      # (1, 256)

    # ---------------- encoder: Cheb conv -> pool, twice ----------------
    h = _cheb(x, a0, cwe0_ref, cbe0)                       # (128, 16)
    h = _bdot(d0, h)                                       # (64, 16)  even-row pool
    h = _cheb(h, a1, cwe1_ref, cbe1)                       # (64, 16)
    h = _bdot(d1, h)                                       # (32, 16)

    # flatten (B*N2, F2) -> (PAD_B, N2*F2), row-major per graph
    g  = _bdot(h, ecol) * mask                             # (32, 256)
    xf = _bdot(rsel, g)                                    # (8, 256)
    he = jnp.maximum(_bdot(xf, encw_ref[...]) + encb, 0.0) # (8, 32)

    # ----- head: [z_mean | z_log_var | logits] lane-packed into (8, 128) -----
    head = _bdot(y, wy_ref[...]) + _bdot(he, wh_ref[...]) + headb

    col = lax.broadcasted_iota(jnp.int32, head.shape, 1)
    is_cls = (col >= H_CLS) & (col < H_CLS + NC)
    masked_logits = jnp.where(is_cls, head, -1e30)
    lmax = jnp.max(masked_logits, axis=-1, keepdims=True)
    e = jnp.exp(masked_logits - lmax)                      # 0 outside the class lanes
    yhat = e * pl.reciprocal(jnp.sum(e, axis=-1, keepdims=True), approx=False)
    head_out = jnp.where(is_cls, yhat, head)               # zm | zv | softmax | 0

    # ----- decoder dense (m_type='test': z_ = z_mean; dropout = identity) -----
    # dlwz is padded to 128 rows with zeros outside the z_mean lanes, so the
    # lane-packed head feeds it directly (no in-kernel slice / concat).
    d = jnp.maximum(_bdot(y, dlwy_ref[...]) + _bdot(head, dlwz_ref[...]) + dlb, 0.0)
    d = jnp.maximum(_bdot(d, dl2w_ref[...]) + dl2b, 0.0)   # (8, 256)

    # unflatten (PAD_B, N2*F2) -> (B*N2, F2)
    t = _bdot(rselT, d) * mask                             # (32, 256)
    t = _bdot(t, ecolT)                                    # (32, 16)

    # ----- decoder: upsample -> Cheb conv, twice; final Cheb conv (no bias/relu) -----
    t = _bdot(u1, t)                                       # (64, 16)
    t = _cheb(t, a1, cwd0_ref, cbd0)                       # (64, 16)
    t = _bdot(u0, t)                                       # (128, 16)
    t = _cheb(t, a0, cwd1_ref, cbd1)                       # (128, 16)
    # final conv weights zero-padded to 128 output lanes -> lane-dense recon slab
    recon = _cheb(t, alast, cwd2_ref, bias=None, relu=False)   # (128, 128)

    out_ref[pl.ds(0, ROWS0), :] = recon
    out_ref[pl.ds(ROWS0, PAD_B), :] = head_out


def vae_forward_fused(params, x_flat, y_pad):
    """Single pallas_call (no grid, no pipelining) for the whole forward."""
    args = (
        x_flat, y_pad,
        params["ops"],
        params["cwe0"], params["cwe1"], params["cwd0"], params["cwd1"], params["cwd2"],
        params["encw"], params["wy"], params["wh"],
        params["dlwy"], params["dlwz"], params["dl2w"],
        params["bias"], params["fconst"], params["tconst"],
    )
    return pl.pallas_call(
        _vae_fwd_kernel,
        out_shape=jax.ShapeDtypeStruct((ROWS0 + PAD_B, 128), jnp.float32),
        cost_estimate=pl.CostEstimate(
            flops=7_000_000, transcendentals=1_024, bytes_accessed=450_000),
    )(*args)


# -----------------------------------------------------------------------------
# Loss helpers (scalar glue, plain JAX)
# TODO(synk): logpdf.{KLD, softclip, gaussian_nll} come from an external module not
# shown; standard sigma-VAE definitions are used here.
# -----------------------------------------------------------------------------
def kld_fn(mu, logvar):
    return -0.5 * jnp.sum(1.0 + logvar - mu * mu - jnp.exp(logvar), axis=-1)


def softclip(t, mn):
    return mn + jax.nn.softplus(t - mn)


def gaussian_nll(mu, log_sigma, x):
    return (0.5 * jnp.square((x - mu) / jnp.exp(log_sigma))
            + log_sigma + 0.5 * jnp.log(2.0 * jnp.pi))


# -----------------------------------------------------------------------------
# Model setup (deterministic synthetic parameters / graph operators)
# -----------------------------------------------------------------------------
def _cheb_operator(n):
    """PyG ChebConv norm (sym, lambda_max=2): T_hat = -D^{-1/2} A D^{-1/2}."""
    A = np.zeros((n, n), np.float32)
    for i in range(n):
        for j in ((i + 1) % n, (i + 3) % n):
            if j != i:
                A[i, j] = 1.0
                A[j, i] = 1.0
    deg = A.sum(1)
    dinv = 1.0 / np.sqrt(np.maximum(deg, 1e-12))
    return (-(dinv[:, None] * A * dinv[None, :])).astype(np.float32)


def _down_matrix(n_out, n_in):
    D = np.zeros((n_out, n_in), np.float32)
    for m in range(n_out):
        D[m, (2 * m) % n_in] = 1.0
    return D


def _up_matrix(n_out, n_in):
    U = np.zeros((n_out, n_in), np.float32)
    for m in range(n_in):
        U[(2 * m) % n_out, m] = 1.0
        U[(2 * m + 1) % n_out, m] = 0.5
        U[(2 * m + 1) % n_out, (m + 1) % n_in] = 0.5
    return U


def _block_diag(m, b):
    return np.kron(np.eye(b, dtype=np.float32), m.astype(np.float32))


def build_params(key, batch=BATCH):
    filters = [NUM_FEATURES] + list(CONFIG["num_conv_filters"])   # [3,16,16,16]
    K = CONFIG["polygon_order"][0]
    n0, n1, n2 = NUM_NODES
    f2 = filters[-1]

    keys = iter(jax.random.split(key, 32))
    nrm = lambda shape, std=0.1: std * jax.random.normal(next(keys), shape, jnp.float32)

    p = {}
    # ---- Chebyshev conv weights (bf16; final decoder conv padded to 128 lanes) ----
    p["cwe0"] = nrm((K, filters[0], filters[1])).astype(BF16)      # 3 -> 16
    p["cwe1"] = nrm((K, filters[1], filters[2])).astype(BF16)      # 16 -> 16
    p["cwd0"] = nrm((K, filters[3], filters[2])).astype(BF16)      # 16 -> 16
    p["cwd1"] = nrm((K, filters[2], filters[1])).astype(BF16)      # 16 -> 16
    cwd2 = np.asarray(nrm((K, filters[1], filters[0])))            # 16 -> 3
    cwd2_pad = np.zeros((K, filters[1], 128), np.float32)
    cwd2_pad[:, :, :filters[0]] = cwd2
    p["cwd2"] = jnp.asarray(cwd2_pad, BF16)

    # ---- biases packed into one (64, 256) f32 slab (rows 0,8,...,56) ----
    bias = np.zeros((64, 256), np.float32)
    bias[0, :f2] = np.asarray(nrm((f2,)))                          # cbe0
    bias[8, :f2] = np.asarray(nrm((f2,)))                          # cbe1
    bias[16, :f2] = np.asarray(nrm((f2,)))                         # cbd0
    bias[24, :f2] = np.asarray(nrm((f2,)))                         # cbd1
    bias[32, :NH] = np.asarray(nrm((NH,)))                         # enc_lin bias
    bias[40, :NH] = np.asarray(nrm((NH,)))                         # dec_lin bias
    bias[48, H_ZM:H_ZM + NZ] = np.asarray(nrm((NZ,)))              # z_mean bias
    bias[48, H_ZV:H_ZV + NZ] = np.asarray(nrm((NZ,)))              # z_log_var bias
    bias[48, H_CLS:H_CLS + NC] = np.asarray(nrm((NC,)))            # classifier bias
    bias[56, :FLAT] = np.asarray(nrm((FLAT,)))                     # dec_lin_2 bias
    p["bias"] = jnp.asarray(bias)

    # ---- dense weights (pre-transposed (Din, Dout); head weights lane-packed) ----
    p["encw"] = nrm((FLAT, NH)).astype(BF16)
    wy_comb = np.zeros((NC, 128), np.float32)
    wy_comb[:, H_ZM:H_ZM + NZ] = np.asarray(nrm((NC, NZ)))         # z_mean, y part
    wy_comb[:, H_ZV:H_ZV + NZ] = np.asarray(nrm((NC, NZ)))         # z_log_var, y part
    wh_comb = np.zeros((NH, 128), np.float32)
    wh_comb[:, H_ZM:H_ZM + NZ] = np.asarray(nrm((NH, NZ)))         # z_mean, h part
    wh_comb[:, H_ZV:H_ZV + NZ] = np.asarray(nrm((NH, NZ)))         # z_log_var, h part
    wh_comb[:, H_CLS:H_CLS + NC] = np.asarray(nrm((NH, NC)))       # classifier
    p["wy"] = jnp.asarray(wy_comb, BF16)
    p["wh"] = jnp.asarray(wh_comb, BF16)
    p["dlwy"] = nrm((NC, NH)).astype(BF16)                         # dec_lin, y part
    dlwz_pad = np.zeros((128, NH), np.float32)
    dlwz_pad[H_ZM:H_ZM + NZ, :] = np.asarray(nrm((NZ, NH)))        # dec_lin, z part
    p["dlwz"] = jnp.asarray(dlwz_pad, BF16)
    # dec_lin_1 exists in __init__ but is unused in forward -> omitted
    p["dl2w"] = nrm((NH, FLAT)).astype(BF16)

    # ---- graph operators, block-diagonal over the batch, packed into one slab ----
    ops_lvl = [_cheb_operator(n) for n in NUM_NODES]
    a_last = np.zeros((n0, n0), np.float32)
    a_last[:n2, :n2] = ops_lvl[2]
    ops = np.zeros((OPS_ROWS, 128), np.float32)
    ops[R_A0:R_A0 + ROWS0, :ROWS0] = _block_diag(ops_lvl[0], batch)
    ops[R_ALAST:R_ALAST + ROWS0, :ROWS0] = _block_diag(a_last, batch)
    ops[R_D0:R_D0 + ROWS1, :ROWS0] = _block_diag(_down_matrix(n1, n0), batch)
    ops[R_U0:R_U0 + ROWS0, :ROWS1] = _block_diag(_up_matrix(n0, n1), batch)
    ops[R_A1:R_A1 + ROWS1, :ROWS1] = _block_diag(ops_lvl[1], batch)
    ops[R_D1:R_D1 + ROWS2, :ROWS1] = _block_diag(_down_matrix(n2, n1), batch)
    ops[R_U1:R_U1 + ROWS1, :ROWS2] = _block_diag(_up_matrix(n1, n2), batch)
    p["ops"] = jnp.asarray(ops, BF16)

    # ---- flatten / unflatten constants (row-major (B*N2,F2) <-> (B,N2*F2)) ----
    rsel = np.zeros((PAD_B, ROWS2), np.float32)                    # batch-row select
    rsel[:batch] = np.kron(np.eye(batch, dtype=np.float32), np.ones((1, n2), np.float32))
    ecol = np.kron(np.ones((1, n2), np.float32), np.eye(f2, dtype=np.float32))   # (16,256)
    msk = np.tile(np.kron(np.eye(n2, dtype=np.float32), np.ones((1, f2), np.float32)),
                  (batch, 1))                                                     # (32,256)
    fc = np.zeros((FC_ROWS, FLAT), np.float32)
    fc[R_ECOL:R_ECOL + f2, :] = ecol
    fc[R_MASK:R_MASK + ROWS2, :] = msk
    fc[R_RSEL:R_RSEL + PAD_B, :ROWS2] = rsel
    p["fconst"] = jnp.asarray(fc, BF16)

    tc = np.zeros((TC_ROWS, f2), np.float32)
    tc[R_RSELT:R_RSELT + ROWS2, :PAD_B] = rsel.T                   # (32, 8)
    tc[R_ECOLT:R_ECOLT + FLAT, :] = ecol.T                         # (256, 16)
    p["tconst"] = jnp.asarray(tc, BF16)
    return p


# -----------------------------------------------------------------------------
# Forward pass (test mode: z_ = x_mean, dropout = identity)
# -----------------------------------------------------------------------------
def forward(params, x_flat, x_gt, y):
    B = y.shape[0]
    y_pad = jnp.zeros((PAD_B, y.shape[1]), jnp.float32).at[:B].set(y)

    out = vae_forward_fused(params, x_flat, y_pad)
    recon = out[:B * NUM_NODES[0], :NUM_FEATURES].reshape(B, NUM_NODES[0], NUM_FEATURES)
    head = out[ROWS0:ROWS0 + B]
    x_mean = head[:, H_ZM:H_ZM + NZ]
    x_var = head[:, H_ZV:H_ZV + NZ]
    y_hat = head[:, H_CLS:H_CLS + NC]
    z_ = x_mean                                                # m_type='test'

    # ---------------- loss (plain-JAX scalar glue) -------------------
    kld = kld_fn(x_mean, x_var)                                # (B,)
    log_sigma = softclip(jnp.array(1.0, jnp.float32), -6.0)
    rec_loss = gaussian_nll(recon, log_sigma, x_gt).sum(-1).sum(-1)   # (B,)
    correct = jnp.sum(jnp.argmax(y_hat, axis=1) == jnp.argmax(y, axis=1))
    logqy = jnp.log(jnp.sum(y_hat * y, axis=-1))
    loss = jnp.mean(kld + rec_loss - 2.0 * logqy)
    return loss, correct, recon, (kld, rec_loss, z_), y_hat


# -----------------------------------------------------------------------------
if __name__ == "__main__":
    key = jax.random.PRNGKey(0)
    kp, kx, kg = jax.random.split(key, 3)

    params = build_params(kp)

    # inputs: data.x is (B*N0, num_features) like PyG batched graphs
    x_flat = jax.random.normal(kx, (BATCH * NUM_NODES[0], NUM_FEATURES), jnp.float32)
    x_gt = jax.random.normal(kg, (BATCH, NUM_NODES[0], NUM_FEATURES), jnp.float32)
    labels = jnp.array([1, 3], dtype=jnp.int32)
    y = jax.nn.one_hot(labels, CONFIG["num_classes"], dtype=jnp.float32)

    fwd = jax.jit(forward)
    loss, correct, recon, (kld, rec_loss, z_), y_hat = fwd(params, x_flat, x_gt, y)
    jax.block_until_ready((loss, correct, recon, kld, rec_loss, z_, y_hat))

    assert recon.shape == (BATCH, NUM_NODES[0], NUM_FEATURES)
    assert y_hat.shape == (BATCH, CONFIG["num_classes"])
    assert jnp.isfinite(loss)
    print("KERNEL_OK")
</pallas_src>

<mosaic_0001>
module attributes {stable_mosaic.version = 11 : i64} {
  func.func @_vae_fwd_kernel(%arg0: memref<128x3xf32, #tpu.memory_space<vmem>>, %arg1: memref<8x4xf32, #tpu.memory_space<vmem>>, %arg2: memref<608x128xbf16, #tpu.memory_space<vmem>>, %arg3: memref<3x3x16xbf16, #tpu.memory_space<vmem>>, %arg4: memref<3x16x16xbf16, #tpu.memory_space<vmem>>, %arg5: memref<3x16x16xbf16, #tpu.memory_space<vmem>>, %arg6: memref<3x16x16xbf16, #tpu.memory_space<vmem>>, %arg7: memref<3x16x128xbf16, #tpu.memory_space<vmem>>, %arg8: memref<256x32xbf16, #tpu.memory_space<vmem>>, %arg9: memref<4x128xbf16, #tpu.memory_space<vmem>>, %arg10: memref<32x128xbf16, #tpu.memory_space<vmem>>, %arg11: memref<4x32xbf16, #tpu.memory_space<vmem>>, %arg12: memref<128x32xbf16, #tpu.memory_space<vmem>>, %arg13: memref<32x256xbf16, #tpu.memory_space<vmem>>, %arg14: memref<64x256xf32, #tpu.memory_space<vmem>>, %arg15: memref<56x256xbf16, #tpu.memory_space<vmem>>, %arg16: memref<288x16xbf16, #tpu.memory_space<vmem>>, %arg17: memref<136x128xf32, #tpu.memory_space<vmem>>) attributes {dimension_semantics = [], scalar_prefetch = 0 : i64, scratch_operands = 0 : i64, tpu.core_type = #tpu.core_type<tc>} {
    %c0 = arith.constant 0 : index
    %c0_0 = arith.constant 0 : index
    %0 = vector.load %arg0[%c0, %c0_0] : memref<128x3xf32, #tpu.memory_space<vmem>>, vector<128x3xf32>
    %c0_1 = arith.constant 0 : index
    %c0_2 = arith.constant 0 : index
    %1 = vector.load %arg1[%c0_1, %c0_2] : memref<8x4xf32, #tpu.memory_space<vmem>>, vector<8x4xf32>
    %c0_3 = arith.constant 0 : index
    %c0_4 = arith.constant 0 : index
    %2 = vector.load %arg2[%c0_3, %c0_4] : memref<608x128xbf16, #tpu.memory_space<vmem>>, vector<128x128xbf16>
    %c128 = arith.constant 128 : index
    %c0_5 = arith.constant 0 : index
    %3 = vector.load %arg2[%c128, %c0_5] : memref<608x128xbf16, #tpu.memory_space<vmem>>, vector<128x128xbf16>
    %c256 = arith.constant 256 : index
    %c0_6 = arith.constant 0 : index
    %4 = vector.load %arg2[%c256, %c0_6] : memref<608x128xbf16, #tpu.memory_space<vmem>>, vector<64x128xbf16>
    %c320 = arith.constant 320 : index
    %c0_7 = arith.constant 0 : index
    %5 = vector.load %arg2[%c320, %c0_7] : memref<608x128xbf16, #tpu.memory_space<vmem>>, vector<128x64xbf16>
    %c448 = arith.constant 448 : index
    %c0_8 = arith.constant 0 : index
    %6 = vector.load %arg2[%c448, %c0_8] : memref<608x128xbf16, #tpu.memory_space<vmem>>, vector<64x64xbf16>
    %c512 = arith.constant 512 : index
    %c0_9 = arith.constant 0 : index
    %7 = vector.load %arg2[%c512, %c0_9] : memref<608x128xbf16, #tpu.memory_space<vmem>>, vector<32x64xbf16>
    %c544 = arith.constant 544 : index
    %c0_10 = arith.constant 0 : index
    %8 = vector.load %arg2[%c544, %c0_10] : memref<608x128xbf16, #tpu.memory_space<vmem>>, vector<64x32xbf16>
    %c0_11 = arith.constant 0 : index
    %c0_12 = arith.constant 0 : index
    %9 = vector.load %arg15[%c0_11, %c0_12] : memref<56x256xbf16, #tpu.memory_space<vmem>>, vector<16x256xbf16>
    %c16 = arith.constant 16 : index
    %c0_13 = arith.constant 0 : index
    %10 = vector.load %arg15[%c16, %c0_13] : memref<56x256xbf16, #tpu.memory_space<vmem>>, vector<32x256xbf16>
    %11 = arith.extf %10 : vector<32x256xbf16> to vector<32x256xf32>
    %c48 = arith.constant 48 : index
    %c0_14 = arith.constant 0 : index
    %12 = vector.load %arg15[%c48, %c0_14] : memref<56x256xbf16, #tpu.memory_space<vmem>>, vector<8x32xbf16>
    %c0_15 = arith.constant 0 : index
    %c0_16 = arith.constant 0 : index
    %13 = vector.load %arg16[%c0_15, %c0_16] : memref<288x16xbf16, #tpu.memory_space<vmem>>, vector<32x8xbf16>
    %c32 = arith.constant 32 : index
    %c0_17 = arith.constant 0 : index
    %14 = vector.load %arg16[%c32, %c0_17] : memref<288x16xbf16, #tpu.memory_space<vmem>>, vector<256x16xbf16>
    %c0_18 = arith.constant 0 : index
    %c0_19 = arith.constant 0 : index
    %15 = vector.load %arg14[%c0_18, %c0_19] : memref<64x256xf32, #tpu.memory_space<vmem>>, vector<1x16xf32>
    %c8 = arith.constant 8 : index
    %c0_20 = arith.constant 0 : index
    %16 = vector.load %arg14[%c8, %c0_20] : memref<64x256xf32, #tpu.memory_space<vmem>>, vector<1x16xf32>
    %c16_21 = arith.constant 16 : index
    %c0_22 = arith.constant 0 : index
    %17 = vector.load %arg14[%c16_21, %c0_22] : memref<64x256xf32, #tpu.memory_space<vmem>>, vector<1x16xf32>
    %c24 = arith.constant 24 : index
    %c0_23 = arith.constant 0 : index
    %18 = vector.load %arg14[%c24, %c0_23] : memref<64x256xf32, #tpu.memory_space<vmem>>, vector<1x16xf32>
    %c32_24 = arith.constant 32 : index
    %c0_25 = arith.constant 0 : index
    %19 = vector.load %arg14[%c32_24, %c0_25] : memref<64x256xf32, #tpu.memory_space<vmem>>, vector<1x32xf32>
    %c40 = arith.constant 40 : index
    %c0_26 = arith.constant 0 : index
    %20 = vector.load %arg14[%c40, %c0_26] : memref<64x256xf32, #tpu.memory_space<vmem>>, vector<1x32xf32>
    %c48_27 = arith.constant 48 : index
    %c0_28 = arith.constant 0 : index
    %21 = vector.load %arg14[%c48_27, %c0_28] : memref<64x256xf32, #tpu.memory_space<vmem>>, vector<1x128xf32>
    %c56 = arith.constant 56 : index
    %c0_29 = arith.constant 0 : index
    %22 = vector.load %arg14[%c56, %c0_29] : memref<64x256xf32, #tpu.memory_space<vmem>>, vector<1x256xf32>
    %c0_30 = arith.constant 0 : index
    %c0_31 = arith.constant 0 : index
    %c0_32 = arith.constant 0 : index
    %23 = vector.load %arg3[%c0_30, %c0_31, %c0_32] : memref<3x3x16xbf16, #tpu.memory_space<vmem>>, vector<1x3x16xbf16>
    %24 = vector.shape_cast %23 : vector<1x3x16xbf16> to vector<3x16xbf16>
    %25 = arith.truncf %0 : vector<128x3xf32> to vector<128x3xbf16>
    %cst = arith.constant dense<0.000000e+00> : vector<128x16xf32>
    %26 = tpu.matmul %25, %24, %cst {dimension_numbers = #tpu.dot_dimension_numbers<[1], [0], [0], [1], [0, 0, 1, 1], [], []>} : vector<128x3xbf16>, vector<3x16xbf16>, vector<128x16xf32> -> vector<128x16xf32>
    %27 = arith.truncf %0 : vector<128x3xf32> to vector<128x3xbf16>
    %cst_33 = arith.constant dense<0.000000e+00> : vector<128x3xf32>
    %28 = tpu.matmul %2, %27, %cst_33 {dimension_numbers = #tpu.dot_dimension_numbers<[1], [0], [0], [1], [0, 0, 1, 1], [], []>} : vector<128x128xbf16>, vector<128x3xbf16>, vector<128x3xf32> -> vector<128x3xf32>
    %c1 = arith.constant 1 : index
    %c0_34 = arith.constant 0 : index
    %c0_35 = arith.constant 0 : index
    %29 = vector.load %arg3[%c1, %c0_34, %c0_35] : memref<3x3x16xbf16, #tpu.memory_space<vmem>>, vector<1x3x16xbf16>
    %30 = vector.shape_cast %29 : vector<1x3x16xbf16> to vector<3x16xbf16>
    %31 = arith.truncf %28 : vector<128x3xf32> to vector<128x3xbf16>
    %cst_36 = arith.constant dense<0.000000e+00> : vector<128x16xf32>
    %32 = tpu.matmul %31, %30, %cst_36 {dimension_numbers = #tpu.dot_dimension_numbers<[1], [0], [0], [1], [0, 0, 1, 1], [], []>} : vector<128x3xbf16>, vector<3x16xbf16>, vector<128x16xf32> -> vector<128x16xf32>
    %33 = arith.addf %26, %32 : vector<128x16xf32>
    %34 = arith.truncf %28 : vector<128x3xf32> to vector<128x3xbf16>
    %cst_37 = arith.constant dense<0.000000e+00> : vector<128x3xf32>
    %35 = tpu.matmul %2, %34, %cst_37 {dimension_numbers = #tpu.dot_dimension_numbers<[1], [0], [0], [1], [0, 0, 1, 1], [], []>} : vector<128x128xbf16>, vector<128x3xbf16>, vector<128x3xf32> -> vector<128x3xf32>
    %cst_38 = arith.constant 2.000000e+00 : f32
    %36 = vector.broadcast %cst_38 : f32 to vector<128x3xf32>
    %37 = arith.mulf %36, %35 : vector<128x3xf32>
    %38 = arith.subf %37, %0 : vector<128x3xf32>
    %c2 = arith.constant 2 : index
    %c0_39 = arith.constant 0 : index
    %c0_40 = arith.constant 0 : index
    %39 = vector.load %arg3[%c2, %c0_39, %c0_40] : memref<3x3x16xbf16, #tpu.memory_space<vmem>>, vector<1x3x16xbf16>
    %40 = vector.shape_cast %39 : vector<1x3x16xbf16> to vector<3x16xbf16>
    %41 = arith.truncf %38 : vector<128x3xf32> to vector<128x3xbf16>
    %cst_41 = arith.constant dense<0.000000e+00> : vector<128x16xf32>
    %42 = tpu.matmul %41, %40, %cst_41 {dimension_numbers = #tpu.dot_dimension_numbers<[1], [0], [0], [1], [0, 0, 1, 1], [], []>} : vector<128x3xbf16>, vector<3x16xbf16>, vector<128x16xf32> -> vector<128x16xf32>
    %43 = arith.addf %33, %42 : vector<128x16xf32>
    %44 = vector.broadcast %15 : vector<1x16xf32> to vector<128x16xf32>
    %45 = arith.addf %43, %44 : vector<128x16xf32>
    %cst_42 = arith.constant 0.000000e+00 : f32
    %46 = vector.broadcast %cst_42 : f32 to vector<128x16xf32>
    %47 = arith.maximumf %45, %46 : vector<128x16xf32>
    %48 = arith.truncf %47 : vector<128x16xf32> to vector<128x16xbf16>
    %cst_43 = arith.constant dense<0.000000e+00> : vector<64x16xf32>
    %49 = tpu.matmul %4, %48, %cst_43 {dimension_numbers = #tpu.dot_dimension_numbers<[1], [0], [0], [1], [0, 0, 1, 1], [], []>} : vector<64x128xbf16>, vector<128x16xbf16>, vector<64x16xf32> -> vector<64x16xf32>
    %c0_44 = arith.constant 0 : index
    %c0_45 = arith.constant 0 : index
    %c0_46 = arith.constant 0 : index
    %50 = vector.load %arg4[%c0_44, %c0_45, %c0_46] : memref<3x16x16xbf16, #tpu.memory_space<vmem>>, vector<1x16x16xbf16>
    %51 = vector.shape_cast %50 : vector<1x16x16xbf16> to vector<16x16xbf16>
    %52 = arith.truncf %49 : vector<64x16xf32> to vector<64x16xbf16>
    %cst_47 = arith.constant dense<0.000000e+00> : vector<64x16xf32>
    %53 = tpu.matmul %52, %51, %cst_47 {dimension_numbers = #tpu.dot_dimension_numbers<[1], [0], [0], [1], [0, 0, 1, 1], [], []>} : vector<64x16xbf16>, vector<16x16xbf16>, vector<64x16xf32> -> vector<64x16xf32>
    %54 = arith.truncf %49 : vector<64x16xf32> to vector<64x16xbf16>
    %cst_48 = arith.constant dense<0.000000e+00> : vector<64x16xf32>
    %55 = tpu.matmul %6, %54, %cst_48 {dimension_numbers = #tpu.dot_dimension_numbers<[1], [0], [0], [1], [0, 0, 1, 1], [], []>} : vector<64x64xbf16>, vector<64x16xbf16>, vector<64x16xf32> -> vector<64x16xf32>
    %c1_49 = arith.constant 1 : index
    %c0_50 = arith.constant 0 : index
    %c0_51 = arith.constant 0 : index
    %56 = vector.load %arg4[%c1_49, %c0_50, %c0_51] : memref<3x16x16xbf16, #tpu.memory_space<vmem>>, vector<1x16x16xbf16>
    %57 = vector.shape_cast %56 : vector<1x16x16xbf16> to vector<16x16xbf16>
    %58 = arith.truncf %55 : vector<64x16xf32> to vector<64x16xbf16>
    %cst_52 = arith.constant dense<0.000000e+00> : vector<64x16xf32>
    %59 = tpu.matmul %58, %57, %cst_52 {dimension_numbers = #tpu.dot_dimension_numbers<[1], [0], [0], [1], [0, 0, 1, 1], [], []>} : vector<64x16xbf16>, vector<16x16xbf16>, vector<64x16xf32> -> vector<64x16xf32>
    %60 = arith.addf %53, %59 : vector<64x16xf32>
    %61 = arith.truncf %55 : vector<64x16xf32> to vector<64x16xbf16>
    %cst_53 = arith.constant dense<0.000000e+00> : vector<64x16xf32>
    %62 = tpu.matmul %6, %61, %cst_53 {dimension_numbers = #tpu.dot_dimension_numbers<[1], [0], [0], [1], [0, 0, 1, 1], [], []>} : vector<64x64xbf16>, vector<64x16xbf16>, vector<64x16xf32> -> vector<64x16xf32>
    %cst_54 = arith.constant 2.000000e+00 : f32
    %63 = vector.broadcast %cst_54 : f32 to vector<64x16xf32>
    %64 = arith.mulf %63, %62 : vector<64x16xf32>
    %65 = arith.subf %64, %49 : vector<64x16xf32>
    %c2_55 = arith.constant 2 : index
    %c0_56 = arith.constant 0 : index
    %c0_57 = arith.constant 0 : index
    %66 = vector.load %arg4[%c2_55, %c0_56, %c0_57] : memref<3x16x16xbf16, #tpu.memory_space<vmem>>, vector<1x16x16xbf16>
    %67 = vector.shape_cast %66 : vector<1x16x16xbf16> to vector<16x16xbf16>
    %68 = arith.truncf %65 : vector<64x16xf32> to vector<64x16xbf16>
    %cst_58 = arith.constant dense<0.000000e+00> : vector<64x16xf32>
    %69 = tpu.matmul %68, %67, %cst_58 {dimension_numbers = #tpu.dot_dimension_numbers<[1], [0], [0], [1], [0, 0, 1, 1], [], []>} : vector<64x16xbf16>, vector<16x16xbf16>, vector<64x16xf32> -> vector<64x16xf32>
    %70 = arith.addf %60, %69 : vector<64x16xf32>
    %71 = vector.broadcast %16 : vector<1x16xf32> to vector<64x16xf32>
    %72 = arith.addf %70, %71 : vector<64x16xf32>
    %cst_59 = arith.constant 0.000000e+00 : f32
    %73 = vector.broadcast %cst_59 : f32 to vector<64x16xf32>
    %74 = arith.maximumf %72, %73 : vector<64x16xf32>
    %75 = arith.truncf %74 : vector<64x16xf32> to vector<64x16xbf16>
    %cst_60 = arith.constant dense<0.000000e+00> : vector<32x16xf32>
    %76 = tpu.matmul %7, %75, %cst_60 {dimension_numbers = #tpu.dot_dimension_numbers<[1], [0], [0], [1], [0, 0, 1, 1], [], []>} : vector<32x64xbf16>, vector<64x16xbf16>, vector<32x16xf32> -> vector<32x16xf32>
    %77 = arith.truncf %76 : vector<32x16xf32> to vector<32x16xbf16>
    %cst_61 = arith.constant dense<0.000000e+00> : vector<32x256xf32>
    %78 = tpu.matmul %77, %9, %cst_61 {dimension_numbers = #tpu.dot_dimension_numbers<[1], [0], [0], [1], [0, 0, 1, 1], [], []>} : vector<32x16xbf16>, vector<16x256xbf16>, vector<32x256xf32> -> vector<32x256xf32>
    %79 = arith.mulf %78, %11 : vector<32x256xf32>
    %80 = arith.truncf %79 : vector<32x256xf32> to vector<32x256xbf16>
    %cst_62 = arith.constant dense<0.000000e+00> : vector<8x256xf32>
    %81 = tpu.matmul %12, %80, %cst_62 {dimension_numbers = #tpu.dot_dimension_numbers<[1], [0], [0], [1], [0, 0, 1, 1], [], []>} : vector<8x32xbf16>, vector<32x256xbf16>, vector<8x256xf32> -> vector<8x256xf32>
    %c0_63 = arith.constant 0 : index
    %c0_64 = arith.constant 0 : index
    %82 = vector.load %arg8[%c0_63, %c0_64] : memref<256x32xbf16, #tpu.memory_space<vmem>>, vector<256x32xbf16>
    %83 = arith.truncf %81 : vector<8x256xf32> to vector<8x256xbf16>
    %cst_65 = arith.constant dense<0.000000e+00> : vector<8x32xf32>
    %84 = tpu.matmul %83, %82, %cst_65 {dimension_numbers = #tpu.dot_dimension_numbers<[1], [0], [0], [1], [0, 0, 1, 1], [], []>} : vector<8x256xbf16>, vector<256x32xbf16>, vector<8x32xf32> -> vector<8x32xf32>
    %85 = vector.broadcast %19 : vector<1x32xf32> to vector<8x32xf32>
    %86 = arith.addf %84, %85 : vector<8x32xf32>
    %cst_66 = arith.constant 0.000000e+00 : f32
    %87 = vector.broadcast %cst_66 : f32 to vector<8x32xf32>
    %88 = arith.maximumf %86, %87 : vector<8x32xf32>
    %c0_67 = arith.constant 0 : index
    %c0_68 = arith.constant 0 : index
    %89 = vector.load %arg9[%c0_67, %c0_68] : memref<4x128xbf16, #tpu.memory_space<vmem>>, vector<4x128xbf16>
    %90 = arith.truncf %1 : vector<8x4xf32> to vector<8x4xbf16>
    %cst_69 = arith.constant dense<0.000000e+00> : vector<8x128xf32>
    %91 = tpu.matmul %90, %89, %cst_69 {dimension_numbers = #tpu.dot_dimension_numbers<[1], [0], [0], [1], [0, 0, 1, 1], [], []>} : vector<8x4xbf16>, vector<4x128xbf16>, vector<8x128xf32> -> vector<8x128xf32>
    %c0_70 = arith.constant 0 : index
    %c0_71 = arith.constant 0 : index
    %92 = vector.load %arg10[%c0_70, %c0_71] : memref<32x128xbf16, #tpu.memory_space<vmem>>, vector<32x128xbf16>
    %93 = arith.truncf %88 : vector<8x32xf32> to vector<8x32xbf16>
    %cst_72 = arith.constant dense<0.000000e+00> : vector<8x128xf32>
    %94 = tpu.matmul %93, %92, %cst_72 {dimension_numbers = #tpu.dot_dimension_numbers<[1], [0], [0], [1], [0, 0, 1, 1], [], []>} : vector<8x32xbf16>, vector<32x128xbf16>, vector<8x128xf32> -> vector<8x128xf32>
    %95 = arith.addf %91, %94 : vector<8x128xf32>
    %96 = vector.broadcast %21 : vector<1x128xf32> to vector<8x128xf32>
    %97 = arith.addf %95, %96 : vector<8x128xf32>
    %98 = tpu.iota {dimensions = array<i32: 1>} : vector<8x128xi32>
    %c16_i32 = arith.constant 16 : i32
    %99 = vector.broadcast %c16_i32 : i32 to vector<8x128xi32>
    %100 = arith.cmpi sge, %98, %99 : vector<8x128xi32>
    %c20_i32 = arith.constant 20 : i32
    %101 = vector.broadcast %c20_i32 : i32 to vector<8x128xi32>
    %102 = arith.cmpi slt, %98, %101 : vector<8x128xi32>
    %103 = arith.andi %100, %102 : vector<8x128xi1>
    %cst_73 = arith.constant -1.000000e+30 : f32
    %104 = vector.broadcast %cst_73 : f32 to vector<8x128xf32>
    %105 = arith.select %103, %97, %104 : vector<8x128xi1>, vector<8x128xf32>
    %cst_74 = arith.constant dense<0xFF800000> : vector<8xf32>
    %106 = vector.multi_reduction <maximumf>, %105, %cst_74 [1] : vector<8x128xf32> to vector<8xf32>
    %107 = vector.shape_cast %106 : vector<8xf32> to vector<8x1xf32>
    %108 = vector.broadcast %107 : vector<8x1xf32> to vector<8x128xf32>
    %109 = arith.subf %105, %108 : vector<8x128xf32>
    %110 = math.exp %109 : vector<8x128xf32>
    %cst_75 = arith.constant dense<0.000000e+00> : vector<8xf32>
    %111 = vector.multi_reduction <add>, %110, %cst_75 [1] : vector<8x128xf32> to vector<8xf32>
    %112 = vector.shape_cast %111 : vector<8xf32> to vector<8x1xf32>
    %113 = tpu.reciprocal %112 : vector<8x1xf32> -> vector<8x1xf32>
    %114 = vector.broadcast %113 : vector<8x1xf32> to vector<8x128xf32>
    %115 = arith.mulf %110, %114 : vector<8x128xf32>
    %116 = arith.select %103, %115, %97 : vector<8x128xi1>, vector<8x128xf32>
    %c0_76 = arith.constant 0 : index
    %c0_77 = arith.constant 0 : index
    %117 = vector.load %arg11[%c0_76, %c0_77] : memref<4x32xbf16, #tpu.memory_space<vmem>>, vector<4x32xbf16>
    %118 = arith.truncf %1 : vector<8x4xf32> to vector<8x4xbf16>
    %cst_78 = arith.constant dense<0.000000e+00> : vector<8x32xf32>
    %119 = tpu.matmul %118, %117, %cst_78 {dimension_numbers = #tpu.dot_dimension_numbers<[1], [0], [0], [1], [0, 0, 1, 1], [], []>} : vector<8x4xbf16>, vector<4x32xbf16>, vector<8x32xf32> -> vector<8x32xf32>
    %c0_79 = arith.constant 0 : index
    %c0_80 = arith.constant 0 : index
    %120 = vector.load %arg12[%c0_79, %c0_80] : memref<128x32xbf16, #tpu.memory_space<vmem>>, vector<128x32xbf16>
    %121 = arith.truncf %97 : vector<8x128xf32> to vector<8x128xbf16>
    %cst_81 = arith.constant dense<0.000000e+00> : vector<8x32xf32>
    %122 = tpu.matmul %121, %120, %cst_81 {dimension_numbers = #tpu.dot_dimension_numbers<[1], [0], [0], [1], [0, 0, 1, 1], [], []>} : vector<8x128xbf16>, vector<128x32xbf16>, vector<8x32xf32> -> vector<8x32xf32>
    %123 = arith.addf %119, %122 : vector<8x32xf32>
    %124 = vector.broadcast %20 : vector<1x32xf32> to vector<8x32xf32>
    %125 = arith.addf %123, %124 : vector<8x32xf32>
    %cst_82 = arith.constant 0.000000e+00 : f32
    %126 = vector.broadcast %cst_82 : f32 to vector<8x32xf32>
    %127 = arith.maximumf %125, %126 : vector<8x32xf32>
    %c0_83 = arith.constant 0 : index
    %c0_84 = arith.constant 0 : index
    %128 = vector.load %arg13[%c0_83, %c0_84] : memref<32x256xbf16, #tpu.memory_space<vmem>>, vector<32x256xbf16>
    %129 = arith.truncf %127 : vector<8x32xf32> to vector<8x32xbf16>
    %cst_85 = arith.constant dense<0.000000e+00> : vector<8x256xf32>
    %130 = tpu.matmul %129, %128, %cst_85 {dimension_numbers = #tpu.dot_dimension_numbers<[1], [0], [0], [1], [0, 0, 1, 1], [], []>} : vector<8x32xbf16>, vector<32x256xbf16>, vector<8x256xf32> -> vector<8x256xf32>
    %131 = vector.broadcast %22 : vector<1x256xf32> to vector<8x256xf32>
    %132 = arith.addf %130, %131 : vector<8x256xf32>
    %cst_86 = arith.constant 0.000000e+00 : f32
    %133 = vector.broadcast %cst_86 : f32 to vector<8x256xf32>
    %134 = arith.maximumf %132, %133 : vector<8x256xf32>
    %135 = arith.truncf %134 : vector<8x256xf32> to vector<8x256xbf16>
    %cst_87 = arith.constant dense<0.000000e+00> : vector<32x256xf32>
    %136 = tpu.matmul %13, %135, %cst_87 {dimension_numbers = #tpu.dot_dimension_numbers<[1], [0], [0], [1], [0, 0, 1, 1], [], []>} : vector<32x8xbf16>, vector<8x256xbf16>, vector<32x256xf32> -> vector<32x256xf32>
    %137 = arith.mulf %136, %11 : vector<32x256xf32>
    %138 = arith.truncf %137 : vector<32x256xf32> to vector<32x256xbf16>
    %cst_88 = arith.constant dense<0.000000e+00> : vector<32x16xf32>
    %139 = tpu.matmul %138, %14, %cst_88 {dimension_numbers = #tpu.dot_dimension_numbers<[1], [0], [0], [1], [0, 0, 1, 1], [], []>} : vector<32x256xbf16>, vector<256x16xbf16>, vector<32x16xf32> -> vector<32x16xf32>
    %140 = arith.truncf %139 : vector<32x16xf32> to vector<32x16xbf16>
    %cst_89 = arith.constant dense<0.000000e+00> : vector<64x16xf32>
    %141 = tpu.matmul %8, %140, %cst_89 {dimension_numbers = #tpu.dot_dimension_numbers<[1], [0], [0], [1], [0, 0, 1, 1], [], []>} : vector<64x32xbf16>, vector<32x16xbf16>, vector<64x16xf32> -> vector<64x16xf32>
    %c0_90 = arith.constant 0 : index
    %c0_91 = arith.constant 0 : index
    %c0_92 = arith.constant 0 : index
    %142 = vector.load %arg5[%c0_90, %c0_91, %c0_92] : memref<3x16x16xbf16, #tpu.memory_space<vmem>>, vector<1x16x16xbf16>
    %143 = vector.shape_cast %142 : vector<1x16x16xbf16> to vector<16x16xbf16>
    %144 = arith.truncf %141 : vector<64x16xf32> to vector<64x16xbf16>
    %cst_93 = arith.constant dense<0.000000e+00> : vector<64x16xf32>
    %145 = tpu.matmul %144, %143, %cst_93 {dimension_numbers = #tpu.dot_dimension_numbers<[1], [0], [0], [1], [0, 0, 1, 1], [], []>} : vector<64x16xbf16>, vector<16x16xbf16>, vector<64x16xf32> -> vector<64x16xf32>
    %146 = arith.truncf %141 : vector<64x16xf32> to vector<64x16xbf16>
    %cst_94 = arith.constant dense<0.000000e+00> : vector<64x16xf32>
    %147 = tpu.matmul %6, %146, %cst_94 {dimension_numbers = #tpu.dot_dimension_numbers<[1], [0], [0], [1], [0, 0, 1, 1], [], []>} : vector<64x64xbf16>, vector<64x16xbf16>, vector<64x16xf32> -> vector<64x16xf32>
    %c1_95 = arith.constant 1 : index
    %c0_96 = arith.constant 0 : index
    %c0_97 = arith.constant 0 : index
    %148 = vector.load %arg5[%c1_95, %c0_96, %c0_97] : memref<3x16x16xbf16, #tpu.memory_space<vmem>>, vector<1x16x16xbf16>
    %149 = vector.shape_cast %148 : vector<1x16x16xbf16> to vector<16x16xbf16>
    %150 = arith.truncf %147 : vector<64x16xf32> to vector<64x16xbf16>
    %cst_98 = arith.constant dense<0.000000e+00> : vector<64x16xf32>
    %151 = tpu.matmul %150, %149, %cst_98 {dimension_numbers = #tpu.dot_dimension_numbers<[1], [0], [0], [1], [0, 0, 1, 1], [], []>} : vector<64x16xbf16>, vector<16x16xbf16>, vector<64x16xf32> -> vector<64x16xf32>
    %152 = arith.addf %145, %151 : vector<64x16xf32>
    %153 = arith.truncf %147 : vector<64x16xf32> to vector<64x16xbf16>
    %cst_99 = arith.constant dense<0.000000e+00> : vector<64x16xf32>
    %154 = tpu.matmul %6, %153, %cst_99 {dimension_numbers = #tpu.dot_dimension_numbers<[1], [0], [0], [1], [0, 0, 1, 1], [], []>} : vector<64x64xbf16>, vector<64x16xbf16>, vector<64x16xf32> -> vector<64x16xf32>
    %cst_100 = arith.constant 2.000000e+00 : f32
    %155 = vector.broadcast %cst_100 : f32 to vector<64x16xf32>
    %156 = arith.mulf %155, %154 : vector<64x16xf32>
    %157 = arith.subf %156, %141 : vector<64x16xf32>
    %c2_101 = arith.constant 2 : index
    %c0_102 = arith.constant 0 : index
    %c0_103 = arith.constant 0 : index
    %158 = vector.load %arg5[%c2_101, %c0_102, %c0_103] : memref<3x16x16xbf16, #tpu.memory_space<vmem>>, vector<1x16x16xbf16>
    %159 = vector.shape_cast %158 : vector<1x16x16xbf16> to vector<16x16xbf16>
    %160 = arith.truncf %157 : vector<64x16xf32> to vector<64x16xbf16>
    %cst_104 = arith.constant dense<0.000000e+00> : vector<64x16xf32>
    %161 = tpu.matmul %160, %159, %cst_104 {dimension_numbers = #tpu.dot_dimension_numbers<[1], [0], [0], [1], [0, 0, 1, 1], [], []>} : vector<64x16xbf16>, vector<16x16xbf16>, vector<64x16xf32> -> vector<64x16xf32>
    %162 = arith.addf %152, %161 : vector<64x16xf32>
    %163 = vector.broadcast %17 : vector<1x16xf32> to vector<64x16xf32>
    %164 = arith.addf %162, %163 : vector<64x16xf32>
    %cst_105 = arith.constant 0.000000e+00 : f32
    %165 = vector.broadcast %cst_105 : f32 to vector<64x16xf32>
    %166 = arith.maximumf %164, %165 : vector<64x16xf32>
    %167 = arith.truncf %166 : vector<64x16xf32> to vector<64x16xbf16>
    %cst_106 = arith.constant dense<0.000000e+00> : vector<128x16xf32>
    %168 = tpu.matmul %5, %167, %cst_106 {dimension_numbers = #tpu.dot_dimension_numbers<[1], [0], [0], [1], [0, 0, 1, 1], [], []>} : vector<128x64xbf16>, vector<64x16xbf16>, vector<128x16xf32> -> vector<128x16xf32>
    %c0_107 = arith.constant 0 : index
    %c0_108 = arith.constant 0 : index
    %c0_109 = arith.constant 0 : index
    %169 = vector.load %arg6[%c0_107, %c0_108, %c0_109] : memref<3x16x16xbf16, #tpu.memory_space<vmem>>, vector<1x16x16xbf16>
    %170 = vector.shape_cast %169 : vector<1x16x16xbf16> to vector<16x16xbf16>
    %171 = arith.truncf %168 : vector<128x16xf32> to vector<128x16xbf16>
    %cst_110 = arith.constant dense<0.000000e+00> : vector<128x16xf32>
    %172 = tpu.matmul %171, %170, %cst_110 {dimension_numbers = #tpu.dot_dimension_numbers<[1], [0], [0], [1], [0, 0, 1, 1], [], []>} : vector<128x16xbf16>, vector<16x16xbf16>, vector<128x16xf32> -> vector<128x16xf32>
    %173 = arith.truncf %168 : vector<128x16xf32> to vector<128x16xbf16>
    %cst_111 = arith.constant dense<0.000000e+00> : vector<128x16xf32>
    %174 = tpu.matmul %2, %173, %cst_111 {dimension_numbers = #tpu.dot_dimension_numbers<[1], [0], [0], [1], [0, 0, 1, 1], [], []>} : vector<128x128xbf16>, vector<128x16xbf16>, vector<128x16xf32> -> vector<128x16xf32>
    %c1_112 = arith.constant 1 : index
    %c0_113 = arith.constant 0 : index
    %c0_114 = arith.constant 0 : index
    %175 = vector.load %arg6[%c1_112, %c0_113, %c0_114] : memref<3x16x16xbf16, #tpu.memory_space<vmem>>, vector<1x16x16xbf16>
    %176 = vector.shape_cast %175 : vector<1x16x16xbf16> to vector<16x16xbf16>
    %177 = arith.truncf %174 : vector<128x16xf32> to vector<128x16xbf16>
    %cst_115 = arith.constant dense<0.000000e+00> : vector<128x16xf32>
    %178 = tpu.matmul %177, %176, %cst_115 {dimension_numbers = #tpu.dot_dimension_numbers<[1], [0], [0], [1], [0, 0, 1, 1], [], []>} : vector<128x16xbf16>, vector<16x16xbf16>, vector<128x16xf32> -> vector<128x16xf32>
    %179 = arith.addf %172, %178 : vector<128x16xf32>
    %180 = arith.truncf %174 : vector<128x16xf32> to vector<128x16xbf16>
    %cst_116 = arith.constant dense<0.000000e+00> : vector<128x16xf32>
    %181 = tpu.matmul %2, %180, %cst_116 {dimension_numbers = #tpu.dot_dimension_numbers<[1], [0], [0], [1], [0, 0, 1, 1], [], []>} : vector<128x128xbf16>, vector<128x16xbf16>, vector<128x16xf32> -> vector<128x16xf32>
    %cst_117 = arith.constant 2.000000e+00 : f32
    %182 = vector.broadcast %cst_117 : f32 to vector<128x16xf32>
    %183 = arith.mulf %182, %181 : vector<128x16xf32>
    %184 = arith.subf %183, %168 : vector<128x16xf32>
    %c2_118 = arith.constant 2 : index
    %c0_119 = arith.constant 0 : index
    %c0_120 = arith.constant 0 : index
    %185 = vector.load %arg6[%c2_118, %c0_119, %c0_120] : memref<3x16x16xbf16, #tpu.memory_space<vmem>>, vector<1x16x16xbf16>
    %186 = vector.shape_cast %185 : vector<1x16x16xbf16> to vector<16x16xbf16>
    %187 = arith.truncf %184 : vector<128x16xf32> to vector<128x16xbf16>
    %cst_121 = arith.constant dense<0.000000e+00> : vector<128x16xf32>
    %188 = tpu.matmul %187, %186, %cst_121 {dimension_numbers = #tpu.dot_dimension_numbers<[1], [0], [0], [1], [0, 0, 1, 1], [], []>} : vector<128x16xbf16>, vector<16x16xbf16>, vector<128x16xf32> -> vector<128x16xf32>
    %189 = arith.addf %179, %188 : vector<128x16xf32>
    %190 = vector.broadcast %18 : vector<1x16xf32> to vector<128x16xf32>
    %191 = arith.addf %189, %190 : vector<128x16xf32>
    %cst_122 = arith.constant 0.000000e+00 : f32
    %192 = vector.broadcast %cst_122 : f32 to vector<128x16xf32>
    %193 = arith.maximumf %191, %192 : vector<128x16xf32>
    %c0_123 = arith.constant 0 : index
    %c0_124 = arith.constant 0 : index
    %c0_125 = arith.constant 0 : index
    %194 = vector.load %arg7[%c0_123, %c0_124, %c0_125] : memref<3x16x128xbf16, #tpu.memory_space<vmem>>, vector<1x16x128xbf16>
    %195 = vector.shape_cast %194 : vector<1x16x128xbf16> to vector<16x128xbf16>
    %196 = arith.truncf %193 : vector<128x16xf32> to vector<128x16xbf16>
    %cst_126 = arith.constant dense<0.000000e+00> : vector<128x128xf32>
    %197 = tpu.matmul %196, %195, %cst_126 {dimension_numbers = #tpu.dot_dimension_numbers<[1], [0], [0], [1], [0, 0, 1, 1], [], []>} : vector<128x16xbf16>, vector<16x128xbf16>, vector<128x128xf32> -> vector<128x128xf32>
    %198 = arith.truncf %193 : vector<128x16xf32> to vector<128x16xbf16>
    %cst_127 = arith.constant dense<0.000000e+00> : vector<128x16xf32>
    %199 = tpu.matmul %3, %198, %cst_127 {dimension_numbers = #tpu.dot_dimension_numbers<[1], [0], [0], [1], [0, 0, 1, 1], [], []>} : vector<128x128xbf16>, vector<128x16xbf16>, vector<128x16xf32> -> vector<128x16xf32>
    %c1_128 = arith.constant 1 : index
    %c0_129 = arith.constant 0 : index
    %c0_130 = arith.constant 0 : index
    %200 = vector.load %arg7[%c1_128, %c0_129, %c0_130] : memref<3x16x128xbf16, #tpu.memory_space<vmem>>, vector<1x16x128xbf16>
    %201 = vector.shape_cast %200 : vector<1x16x128xbf16> to vector<16x128xbf16>
    %202 = arith.truncf %199 : vector<128x16xf32> to vector<128x16xbf16>
    %cst_131 = arith.constant dense<0.000000e+00> : vector<128x128xf32>
    %203 = tpu.matmul %202, %201, %cst_131 {dimension_numbers = #tpu.dot_dimension_numbers<[1], [0], [0], [1], [0, 0, 1, 1], [], []>} : vector<128x16xbf16>, vector<16x128xbf16>, vector<128x128xf32> -> vector<128x128xf32>
    %204 = arith.addf %197, %203 : vector<128x128xf32>
    %205 = arith.truncf %199 : vector<128x16xf32> to vector<128x16xbf16>
    %cst_132 = arith.constant dense<0.000000e+00> : vector<128x16xf32>
    %206 = tpu.matmul %3, %205, %cst_132 {dimension_numbers = #tpu.dot_dimension_numbers<[1], [0], [0], [1], [0, 0, 1, 1], [], []>} : vector<128x128xbf16>, vector<128x16xbf16>, vector<128x16xf32> -> vector<128x16xf32>
    %cst_133 = arith.constant 2.000000e+00 : f32
    %207 = vector.broadcast %cst_133 : f32 to vector<128x16xf32>
    %208 = arith.mulf %207, %206 : vector<128x16xf32>
    %209 = arith.subf %208, %193 : vector<128x16xf32>
    %c2_134 = arith.constant 2 : index
    %c0_135 = arith.constant 0 : index
    %c0_136 = arith.constant 0 : index
    %210 = vector.load %arg7[%c2_134, %c0_135, %c0_136] : memref<3x16x128xbf16, #tpu.memory_space<vmem>>, vector<1x16x128xbf16>
    %211 = vector.shape_cast %210 : vector<1x16x128xbf16> to vector<16x128xbf16>
    %212 = arith.truncf %209 : vector<128x16xf32> to vector<128x16xbf16>
    %cst_137 = arith.constant dense<0.000000e+00> : vector<128x128xf32>
    %213 = tpu.matmul %212, %211, %cst_137 {dimension_numbers = #tpu.dot_dimension_numbers<[1], [0], [0], [1], [0, 0, 1, 1], [], []>} : vector<128x16xbf16>, vector<16x128xbf16>, vector<128x128xf32> -> vector<128x128xf32>
    %214 = arith.addf %204, %213 : vector<128x128xf32>
    %c0_138 = arith.constant 0 : index
    %c0_139 = arith.constant 0 : index
    %215 = vector.load %arg17[%c0_138, %c0_139] : memref<136x128xf32, #tpu.memory_space<vmem>>, vector<128x128xf32>
    tpu.vector_store %arg17[%c0_138, %c0_139], %214 {strides = array<i32>} : memref<136x128xf32, #tpu.memory_space<vmem>>, vector<128x128xf32>,
    %c128_140 = arith.constant 128 : index
    %c0_141 = arith.constant 0 : index
    %216 = vector.load %arg17[%c128_140, %c0_141] : memref<136x128xf32, #tpu.memory_space<vmem>>, vector<8x128xf32>
    tpu.vector_store %arg17[%c128_140, %c0_141], %116 {strides = array<i32>} : memref<136x128xf32, #tpu.memory_space<vmem>>, vector<8x128xf32>,
    return
  }
}

</mosaic_0001>

<bundles_post_ra>
// kernel: forward.1
= control target key start
LH: loop header
LB: loop body
LE: loop exit
PB: predicated region body
PF: predicated region fallthrough
CT: control target
= control target key end

     0   :  { %s7698_s0 = inlined_call_operand.vmem [shape: f32[128,3], index: 0, kind: input, shape index: {}]   ;;  %s7699_s1 = inlined_call_operand.vmem [shape: f32[8,4], index: 1, kind: input, shape index: {}]   ;;  %s7700_s2 = inlined_call_operand.vmem [shape: bf16[608,128], index: 2, kind: input, shape index: {}]   ;;  %s7701_s3 = inlined_call_operand.hbm [shape: bf16[3,3,16], index: 3, kind: input, shape index: {}]   ;;  %s7702_s4 = inlined_call_operand.hbm [shape: bf16[3,16,16], index: 4, kind: input, shape index: {}]   ;;  %s7703_s5 = inlined_call_operand.vmem [shape: bf16[3,16,16], index: 5, kind: input, shape index: {}]   ;;  %s7704_s6 = inlined_call_operand.hbm [shape: bf16[3,16,16], index: 6, kind: input, shape index: {}]   ;;  %s7705_s7 = inlined_call_operand.hbm [shape: bf16[3,16,128], index: 7, kind: input, shape index: {}]   ;;  %s7706_s8 = inlined_call_operand.vmem [shape: bf16[256,32], index: 8, kind: input, shape index: {}]   ;;  %s7707_s9 = inlined_call_operand.hbm [shape: bf16[4,128], index: 9, kind: input, shape index: {}]   ;;  %s7708_s10 = inlined_call_operand.hbm [shape: bf16[32,128], index: 10, kind: input, shape index: {}]   ;;  %s7709_s11 = inlined_call_operand.hbm [shape: bf16[4,32], index: 11, kind: input, shape index: {}]   ;;  %s7710_s12 = inlined_call_operand.vmem [shape: bf16[128,32], index: 12, kind: input, shape index: {}]   ;;  %s7711_s13 = inlined_call_operand.vmem [shape: bf16[32,256], index: 13, kind: input, shape index: {}]   ;;  %s7712_s14 = inlined_call_operand.vmem [shape: f32[64,256], index: 14, kind: input, shape index: {}]   ;;  %s7713_s15 = inlined_call_operand.vmem [shape: bf16[56,256], index: 15, kind: input, shape index: {}]   ;;  %s7714_s16 = inlined_call_operand.vmem [shape: bf16[288,16], index: 16, kind: input, shape index: {}]   ;;  %s7715_s17 = inlined_call_operand.vmem [shape: f32[136,128], index: 17, kind: output, shape index: {}]  }
   0x1   :  { %7718 = sst [smem:[#allocation17_spill]] %s7698_s0 }
   0x2   :  { %7719 = sst [smem:[#allocation18_spill]] %s7699_s1 }
   0x3   :  { %7720 = sst [smem:[#allocation19_spill]] %s7703_s5 }
   0x4   :  { %22 = vsyncpa [#allocation3], 0 }
   0x5   :  { %23 = vsyncpa [#allocation5], 0 }
   0x6   :  { %24 = vsyncpa [#allocation8], 0 }
   0x7   :  { %25 = vsyncpa [#allocation11], 0  ;;  %s6272_s24 = smov [#allocation4]   ;;  %s6110_s28 = scalar_lea.hbm %s7702_s4, 384 }
   0x8   :  { %s49_s25 = sshll.u32 %s6272_s24, 4  ;;  %p6111_p0 = scmp.ne.s32.totalorder %s7702_s4, %s6110_s28  ;;  %s50_s25 = int_to_ptr.vmem [resolvable:$true] %s49_s25 }
   0x9   :  { %p6114_p1 = scmp.lt.u32.totalorder %s6110_s28, %s7702_s4 }
   0xb   :  { %p6116_p2 = pnand %p6114_p1, %p6111_p0 }
   0xd   :  { %6119 = shalt.err (!%p6116_p2)
}
   0xe   :  { %s6120_s19 = scalar_lea.vmem %s50_s25, 384  ;;  %p6125_p4 = scmp.lt.s32.totalorder %s50_s25, %s50_s25 }
   0xf   :  { %p6121_p3 = scmp.ne.s32.totalorder %s50_s25, %s6120_s19  ;;  %p6126_p5 = scmp.lt.s32.totalorder %s6120_s19, %s6120_s19 }
  0x11   :  { %p6127_p6 = por %p6126_p5, %p6125_p4 }
  0x13   :  { %p6128_p7 = pnand %p6127_p6, %p6121_p3 }
  0x15   :  { %6131 = shalt.err (!%p6128_p7)
}
  0x16   :  { %s6273_s1 = smov 64   ;;  %s6274_s20 = smov 4  }
  0x17   :  { %55 = dma.hbm_to_vmem [thread:$0]  %s7702_s4, 384, %s50_s25, [#allocation5], %s6273_s1, %s6273_s1, %s6274_s20  }
  0x18   :  { %s6275_s23 = smov [#allocation7]   ;;  %s6276_s26 = smov [#allocation10]  }
  0x19   :  { %s75_s24 = sshll.u32 %s6275_s23, 4  ;;  %s99_s27 = sshll.u32 %s6276_s26, 4  ;;  %s76_s24 = int_to_ptr.vmem [resolvable:$true] %s75_s24  ;;  %s100_s27 = int_to_ptr.vmem [resolvable:$true] %s99_s27 }
  0x1a   :  { %s6132_s0 = scalar_lea.hbm %s7705_s7, 384 }
  0x1b   :  { %p6133_p8 = scmp.ne.s32.totalorder %s7705_s7, %s6132_s0  ;;  %p6136_p9 = scmp.lt.u32.totalorder %s6132_s0, %s7705_s7 }
  0x1d   :  { %p6138_p10 = pnand %p6136_p9, %p6133_p8 }
  0x1f   :  { %6141 = shalt.err (!%p6138_p10)
}
  0x20   :  { %s6142_s4 = scalar_lea.vmem %s76_s24, 384  ;;  %p6147_p12 = scmp.lt.s32.totalorder %s76_s24, %s76_s24 }
  0x21   :  { %p6143_p11 = scmp.ne.s32.totalorder %s76_s24, %s6142_s4  ;;  %p6148_p13 = scmp.lt.s32.totalorder %s6142_s4, %s6142_s4 }
  0x23   :  { %p6149_p0 = por %p6148_p13, %p6147_p12 }
  0x25   :  { %p6150_p1 = pnand %p6149_p0, %p6143_p11 }
  0x27   :  { %6153 = shalt.err (!%p6150_p1)
}
  0x28   :  { %81 = dma.hbm_to_vmem [thread:$0]  %s7705_s7, 384, %s76_s24, [#allocation8], %s6273_s1, %s6273_s1, %s6274_s20  }
  0x29   :  { %s6154_s23 = scalar_lea.hbm %s7708_s10, 256 }
  0x2a   :  { %p6155_p2 = scmp.ne.s32.totalorder %s7708_s10, %s6154_s23  ;;  %p6158_p3 = scmp.lt.u32.totalorder %s6154_s23, %s7708_s10 }
  0x2c   :  { %p6160_p4 = pnand %p6158_p3, %p6155_p2 }
  0x2e   :  { %6163 = shalt.err (!%p6160_p4)
}
  0x2f   :  { %s6164_s30 = scalar_lea.vmem %s100_s27, 256  ;;  %p6169_p6 = scmp.lt.s32.totalorder %s100_s27, %s100_s27 }
  0x30   :  { %p6165_p5 = scmp.ne.s32.totalorder %s100_s27, %s6164_s30  ;;  %p6170_p7 = scmp.lt.s32.totalorder %s6164_s30, %s6164_s30 }
  0x32   :  { %p6171_p8 = por %p6170_p7, %p6169_p6 }
  0x34   :  { %p6172_p9 = pnand %p6171_p8, %p6165_p5 }
  0x36   :  { %6175 = shalt.err (!%p6172_p9)
}
  0x37   :  { %105 = dma.hbm_to_vmem [thread:$0]  %s7708_s10, 256, %s100_s27, [#allocation11], %s6273_s1, %s6273_s1, %s6274_s20  }
  0x38   :  { %s6277_s18 = smov [#allocation2]   ;;  %s6176_s21 = scalar_lea.hbm %s7701_s3, 96 }
  0x39   :  { %s37_s19 = sshll.u32 %s6277_s18, 4  ;;  %p6177_p10 = scmp.ne.s32.totalorder %s7701_s3, %s6176_s21  ;;  %s38_s19 = int_to_ptr.vmem [resolvable:$true] %s37_s19 }
  0x3a   :  { %p6180_p11 = scmp.lt.u32.totalorder %s6176_s21, %s7701_s3 }
  0x3c   :  { %p6182_p12 = pnand %p6180_p11, %p6177_p10 }
  0x3e   :  { %6185 = shalt.err (!%p6182_p12)
}
  0x3f   :  { %s6186_s28 = scalar_lea.vmem %s38_s19, 96  ;;  %p6191_p0 = scmp.lt.s32.totalorder %s38_s19, %s38_s19 }
  0x40   :  { %p6187_p13 = scmp.ne.s32.totalorder %s38_s19, %s6186_s28  ;;  %p6192_p1 = scmp.lt.s32.totalorder %s6186_s28, %s6186_s28 }
  0x42   :  { %p6193_p2 = por %p6192_p1, %p6191_p0 }
  0x44   :  { %p6194_p3 = pnand %p6193_p2, %p6187_p13 }
  0x46   :  { %6197 = shalt.err (!%p6194_p3)
}
  0x47   :  { %s6278_s10 = smov 32   ;;  %s6279_s27 = smov 2  }
  0x48   :  { %43 = dma.hbm_to_vmem [thread:$0]  %s7701_s3, 96, %s38_s19, [#allocation3], %s6278_s10, %s6278_s10, %s6279_s27  }
  0x49   :  { %s6280_s30 = smov [#allocation6]   ;;  %s6281_s24 = smov [#allocation9]  }
  0x4a   :  { %s63_s7 = sshll.u32 %s6280_s30, 4  ;;  %s90_s18 = sshll.u32 %s6281_s24, 4  ;;  %s64_s7 = int_to_ptr.vmem [resolvable:$true] %s63_s7  ;;  %s91_s18 = int_to_ptr.vmem [resolvable:$true] %s90_s18 }
  0x4b   :  { %s6198_s21 = scalar_lea.hbm %s7704_s6, 384 }
  0x4c   :  { %p6199_p4 = scmp.ne.s32.totalorder %s7704_s6, %s6198_s21  ;;  %p6202_p5 = scmp.lt.u32.totalorder %s6198_s21, %s7704_s6 }
  0x4e   :  { %p6204_p6 = pnand %p6202_p5, %p6199_p4 }
  0x50   :  { %6207 = shalt.err (!%p6204_p6)
}
  0x51   :  { %s6208_s3 = scalar_lea.vmem %s64_s7, 384  ;;  %p6213_p8 = scmp.lt.s32.totalorder %s64_s7, %s64_s7 }
  0x52   :  { %p6209_p7 = scmp.ne.s32.totalorder %s64_s7, %s6208_s3  ;;  %p6214_p9 = scmp.lt.s32.totalorder %s6208_s3, %s6208_s3 }
  0x54   :  { %p6215_p10 = por %p6214_p9, %p6213_p8 }
  0x56   :  { %p6216_p11 = pnand %p6215_p10, %p6209_p7 }
  0x58   :  { %6219 = shalt.err (!%p6216_p11)
}
  0x59   :  { %69 = dma.hbm_to_vmem [thread:$0]  %s7704_s6, 384, %s64_s7, [#allocation5], %s6273_s1, %s6273_s1, %s6274_s20  }
  0x5a   :  { %s6220_s29 = scalar_lea.hbm %s7707_s9, 32 }
  0x5b   :  { %p6221_p12 = scmp.ne.s32.totalorder %s7707_s9, %s6220_s29  ;;  %p6224_p13 = scmp.lt.u32.totalorder %s6220_s29, %s7707_s9 }
  0x5d   :  { %p6226_p0 = pnand %p6224_p13, %p6221_p12 }
  0x5f   :  { %6229 = shalt.err (!%p6226_p0)
}
  0x60   :  { %s6230_s25 = scalar_lea.vmem %s91_s18, 32  ;;  %p6235_p2 = scmp.lt.s32.totalorder %s91_s18, %s91_s18 }
  0x61   :  { %p6231_p1 = scmp.ne.s32.totalorder %s91_s18, %s6230_s25  ;;  %p6236_p3 = scmp.lt.s32.totalorder %s6230_s25, %s6230_s25 }
  0x63   :  { %p6237_p4 = por %p6236_p3, %p6235_p2 }
  0x65   :  { %p6238_p5 = pnand %p6237_p4, %p6231_p1 }
  0x67   :  { %6241 = shalt.err (!%p6238_p5)
}
  0x68   :  { %93 = dma.hbm_to_vmem [thread:$0]  %s7707_s9, 32, %s91_s18, [#allocation8]  }
  0x69   :  { %s6282_s20 = smov [#allocation12]   ;;  %s6242_s5 = scalar_lea.hbm %s7709_s11, 32 }
  0x6a   :  { %s112_s7 = sshll.u32 %s6282_s20, 4  ;;  %p6243_p6 = scmp.ne.s32.totalorder %s7709_s11, %s6242_s5  ;;  %s113_s7 = int_to_ptr.vmem [resolvable:$true] %s112_s7 }
  0x6b   :  { %p6246_p7 = scmp.lt.u32.totalorder %s6242_s5, %s7709_s11 }
  0x6d   :  { %p6248_p8 = pnand %p6246_p7, %p6243_p6 }
  0x6f   :  { %6251 = shalt.err (!%p6248_p8)
}
  0x70   :  { %s6252_s28 = scalar_lea.vmem %s113_s7, 32  ;;  %p6257_p10 = scmp.lt.s32.totalorder %s113_s7, %s113_s7 }
  0x71   :  { %p6253_p9 = scmp.ne.s32.totalorder %s113_s7, %s6252_s28  ;;  %p6258_p11 = scmp.lt.s32.totalorder %s6252_s28, %s6252_s28 }
  0x73   :  { %p6259_p12 = por %p6258_p11, %p6257_p10 }
  0x75   :  { %p6260_p13 = pnand %p6259_p12, %p6253_p9 }
  0x77   :  { %6263 = shalt.err (!%p6260_p13)
}
  0x78   :  { %115 = dma.hbm_to_vmem [thread:$0]  %s7709_s11, 32, %s113_s7, [#allocation11]  }
  0x79   :  { %6264 = dma.done.wait [#allocation3], 96  }
  0x7a   :  { %6265 = vsyncadd [#allocation3], 4294967200 }
  0x7b   :  { %6266 = dma.done.wait [#allocation5], 768  }
  0x7c   :  { %6267 = vsyncadd [#allocation5], 4294966528 }
  0x7d   :  { %6268 = dma.done.wait [#allocation8], 416  }
  0x7e   :  { %6269 = vsyncadd [#allocation8], 4294966880 }
  0x7f   :  { %6270 = dma.done.wait [#allocation11], 288  }
  0x80   :  { %6271 = vsyncadd [#allocation11], 4294967008  ;;  %s7721_s29 = sld [smem:[#allocation17_spill]]  ;;  %v6531_v11 = vld [vmem:[%s7700_s2] sm:$0xff]   ;;  %vm490_vm0 = vcmask 1040384   ;;  %vm491_vm1 = vcmask 1041408  }
  0x81   :  { %5278 = vmatprep.mubr.bf16.mxu0 %v6531_v11  ;;  %v6283_v18 = vmov 65535   ;;  %v456_v27 = vld [vmem:[#allocation2 + $0x2] sm:$0x3]  ;;  %v6612_v29 = vld [vmem:[%s7700_s2 + $0x8] sm:$0xff]   ;;  %v6618_v31 = vld [vmem:[%s7700_s2 + $0x10] sm:$0xff]   ;;  %vm465_vm2 = vcmask 23552  }
  0x82   :  { %v492_v19 = vsel %vm490_vm0, 4294967295, %v6283_v18  ;;  %v5998_v32 = vld [vmem:[%s7700_s2 + $0x18] sm:$0xff]   ;;  %v5999_v33 = vld [vmem:[%s7700_s2 + $0x20] sm:$0xff]   ;;  %v6000_v34 = vld [vmem:[%s7700_s2 + $0x28] sm:$0xff]   ;;  %vm1152_vm3 = vcmask 523264   ;;  %vm1243_vm4 = vcmask 130048  }
  0x83   :  { %v6599_v26 = vsel %vm491_vm1, %v492_v19, 0  ;;  %v6001_v35 = vld [vmem:[%s7700_s2 + $0x30] sm:$0xff]   ;;  %v6002_v36 = vld [vmem:[%s7700_s2 + $0x38] sm:$0xff]   ;;  %v301_v61 = vld [vmem:[#allocation2] sm:$0x3]  ;;  %vm1751_vm5 = vcmask 261120  }
  0x84   :  { %v495_v30 = vand.u32 %v6599_v26, %v456_v27  ;;  %v619_v62 = vand.u32 %v6599_v26, %v301_v61  ;;  %v848_v63 = vld [vmem:[#allocation2 + $0x4] sm:$0x3]  ;;  %vm6286_vm6 = vmmov 0   ;;  %s7722_s4 = sld [smem:[#allocation18_spill]]  ;;  %vm2029_vm7 = vcmask 31744   ;;  %s7725_s24 = sld [smem:[#allocation19_spill]] }
  0x85   :  { %vm2345_vm11 = vcmask 1043456   ;;  %vm2338_vm12 = vcmask 64512  }
  0x86   :  { %v6476_v0 = vld [vmem:[%s7721_s29] sm:$0xff]  ;;  %v6481_v1 = vld [vmem:[%s7721_s29 + $0x8] sm:$0xff]  ;;  %v6486_v2 = vld [vmem:[%s7721_s29 + $0x10] sm:$0xff]  ;;  %5312 = vmatprep.subr.bf16.mxu1 %v619_v62 }
  0x87   :  { %v6490_v3 = vpack.c.bf16 %v6481_v1, %v6476_v0  ;;  %v6495_v4 = vld [vmem:[%s7721_s29 + $0x18] sm:$0xff]  ;;  %v6504_v6 = vld [vmem:[%s7721_s29 + $0x20] sm:$0xff]  ;;  %v6509_v7 = vld [vmem:[%s7721_s29 + $0x28] sm:$0xff]  ;;  %5313 = vmatpush3.bf16.msra.mxu1 %v619_v62 }
  0x88   :  { %v6499_v5 = vpack.c.bf16 %v6495_v4, %v6486_v2  ;;  %v6516_v8 = vld [vmem:[%s7721_s29 + $0x30] sm:$0xff]  ;;  %v6521_v9 = vpack.c.bf16 %v6509_v7, %v6504_v6  ;;  %v6526_v10 = vld [vmem:[%s7721_s29 + $0x38] sm:$0xff]  ;;  %v6543_v13 = vld [vmem:[%s7721_s29 + $0x40] sm:$0xff] }
  0x89   :  { %5262 = vmatprep.subr.bf16.mxu0 %v6490_v3  ;;  %v6538_v12 = vpack.c.bf16 %v6526_v10, %v6516_v8  ;;  %v6548_v14 = vld [vmem:[%s7721_s29 + $0x48] sm:$0xff]  ;;  %v6559_v16 = vld [vmem:[%s7721_s29 + $0x50] sm:$0xff]  ;;  %v6564_v17 = vld [vmem:[%s7721_s29 + $0x58] sm:$0xff]  ;;  %5314 = vmatprep.mubr.msk.bf16.mxu1 %vm465_vm2, %v6490_v3 }
  0x8a   :  { %5263 = vmatpush3.bf16.msra.mxu0 %v6490_v3  ;;  %v6554_v15 = vpack.c.bf16 %v6548_v14, %v6543_v13  ;;  %v6570_v20 = vld [vmem:[%s7721_s29 + $0x60] sm:$0xff]  ;;  %v6575_v21 = vld [vmem:[%s7721_s29 + $0x68] sm:$0xff]  ;;  %v6580_v22 = vpack.c.bf16 %v6564_v17, %v6559_v16  ;;  %v6586_v23 = vld [vmem:[%s7721_s29 + $0x70] sm:$0xff]  ;;  %5315 = vmatmul.mubr.msk.bf16.vlgmr.msra.gmra.mrb[0].mxu1 %vm465_vm2, %v6499_v5  ;;  %v882_v3 = vand.u32 %v848_v63, %v6599_v26 }
  0x8b   :  { %5264 = vmatprep.subr.bf16.mxu0 %v6499_v5  ;;  %v6591_v24 = vld [vmem:[%s7721_s29 + $0x78] sm:$0xff]  ;;  %v6596_v25 = vpack.c.bf16 %v6575_v21, %v6570_v20  ;;  %5318 = vmatprep.mubr.msk.bf16.mxu1 %vm465_vm2, %v6521_v9 }
  0x8c   :  { %v6605_v28 = vpack.c.bf16 %v6591_v24, %v6586_v23  ;;  %5362 = vmatprep.subr.bf16.mxu1 %v882_v3 }
  0x8d   :  { %5363 = vmatpush3.bf16.msra.mxu1 %v882_v3 }
  0x8e   :  { %5265 = vmatpush3.bf16.msra.mxu0 %v6499_v5 }
  0x8f   :  { %5266 = vmatprep.subr.bf16.mxu0 %v6521_v9 }
  0x92   :  { %5267 = vmatpush3.bf16.msra.mxu0 %v6521_v9  ;;  %5319 = vmatmul.mubr.msk.bf16.gmra.mrb[4].mxu1 %vm465_vm2, %v6538_v12 }
  0x93   :  { %5268 = vmatprep.subr.bf16.mxu0 %v6538_v12  ;;  %5322 = vmatprep.mubr.msk.bf16.mxu1 %vm465_vm2, %v6554_v15 }
  0x96   :  { %5269 = vmatpush3.bf16.msra.mxu0 %v6538_v12 }
  0x97   :  { %5270 = vmatprep.subr.bf16.mxu0 %v6554_v15 }
  0x9a   :  { %5271 = vmatpush3.bf16.msra.mxu0 %v6554_v15  ;;  %5323 = vmatmul.mubr.msk.bf16.gmra.mrb[8].mxu1 %vm465_vm2, %v6580_v22 }
  0x9b   :  { %5272 = vmatprep.subr.bf16.mxu0 %v6580_v22  ;;  %5326 = vmatprep.mubr.msk.bf16.mxu1 %vm465_vm2, %v6596_v25 }
  0x9e   :  { %5273 = vmatpush3.bf16.msra.mxu0 %v6580_v22 }
  0x9f   :  { %5274 = vmatprep.subr.bf16.mxu0 %v6596_v25 }
  0xa2   :  { %5275 = vmatpush3.bf16.msra.mxu0 %v6596_v25  ;;  %5327 = vmatmul.mubr.msk.bf16.gmra.mrb[12].mxu1 %vm465_vm2, %v6605_v28 }
  0xa3   :  { %5276 = vmatprep.subr.bf16.mxu0 %v6605_v28 }
  0xa6   :  { %5277 = vmatpush3.bf16.msra.mxu0 %v6605_v28 }
  0xa7   :  { %5294 = vmatprep.subr.bf16.mxu0 %v495_v30 }
  0xa9   :  { %5279 = vmatmul.mubr.bf16.vlgmr.msra.gmra.mrb[0].mxu0 %v6612_v29 }
  0xaa   :  { %5282 = vmatprep.mubr.bf16.mxu0 %v6618_v31  ;;  %5295 = vmatpush3.bf16.msra.mxu0 %v495_v30 }
  0xb1   :  { %5283 = vmatmul.mubr.bf16.gmra.mrb[4].mxu0 %v5998_v32 }
  0xb2   :  { %5286 = vmatprep.mubr.bf16.mxu0 %v5999_v33 }
  0xb9   :  { %5287 = vmatmul.mubr.bf16.gmra.mrb[8].mxu0 %v6000_v34 }
  0xba   :  { %5290 = vmatprep.mubr.bf16.mxu0 %v6001_v35 }
  0xc1   :  { %5291 = vmatmul.mubr.bf16.gmra.mrb[12].mxu0 %v6002_v36 }
 0x17c   :  { %v5280_v37 = vpop.f32.mrb[0].mxu0 }
 0x17d   :  { %v392_v38 = vpop.f32.mrb[1].mxu0 }
 0x17e   :  { %v5281_v39 = vpop.f32.mrb[2].mxu0 }
 0x17f   :  { %v458_v40 = vpack.c.bf16 %v5281_v39, %v5280_v37  ;;  %v395_v41 = vpop.f32.mrb[3].mxu0 }
 0x180   :  { %v457_v42 = vpack.c.bf16 %v395_v41, %v392_v38 }
 0x182   :  { %5296 = vmatprep.mubr.msk.bf16.mxu0 %vm465_vm2, %v457_v42  ;;  %5330 = vmatprep.subr.bf16.mxu0 %v457_v42 }
 0x183   :  { %5297 = vmatmul.mubr.msk.bf16.vlgmr.msra.gmra.mrb[16].mxu0 %vm465_vm2, %v458_v40 }
 0x184   :  { %5331 = vmatpush3.bf16.msra.mxu0 %v457_v42  ;;  %v5284_v43 = vpop.f32.mrb[4].mxu0 }
 0x185   :  { %5332 = vmatprep.subr.bf16.mxu0 %v458_v40  ;;  %v408_v44 = vpop.f32.mrb[5].mxu0 }
 0x186   :  { %v5285_v45 = vpop.f32.mrb[6].mxu0 }
 0x187   :  { %v460_v46 = vpack.c.bf16 %v5285_v45, %v5284_v43  ;;  %v411_v47 = vpop.f32.mrb[7].mxu0 }
 0x188   :  { %v459_v48 = vpack.c.bf16 %v411_v47, %v408_v44  ;;  %5333 = vmatpush3.bf16.msra.mxu0 %v458_v40 }
 0x18a   :  { %5300 = vmatprep.mubr.msk.bf16.mxu0 %vm465_vm2, %v459_v48  ;;  %5334 = vmatprep.subr.bf16.mxu0 %v459_v48 }
 0x18b   :  { %5301 = vmatmul.mubr.msk.bf16.gmra.mrb[20].mxu0 %vm465_vm2, %v460_v46 }
 0x18c   :  { %5335 = vmatpush3.bf16.msra.mxu0 %v459_v48  ;;  %v5288_v49 = vpop.f32.mrb[8].mxu0 }
 0x18d   :  { %5336 = vmatprep.subr.bf16.mxu0 %v460_v46  ;;  %v424_v50 = vpop.f32.mrb[9].mxu0 }
 0x18e   :  { %v5289_v51 = vpop.f32.mrb[10].mxu0 }
 0x18f   :  { %v462_v52 = vpack.c.bf16 %v5289_v51, %v5288_v49  ;;  %v427_v53 = vpop.f32.mrb[11].mxu0 }
 0x190   :  { %v461_v54 = vpack.c.bf16 %v427_v53, %v424_v50  ;;  %5337 = vmatpush3.bf16.msra.mxu0 %v460_v46 }
 0x192   :  { %5304 = vmatprep.mubr.msk.bf16.mxu0 %vm465_vm2, %v461_v54  ;;  %5338 = vmatprep.subr.bf16.mxu0 %v461_v54 }
 0x193   :  { %5305 = vmatmul.mubr.msk.bf16.gmra.mrb[24].mxu0 %vm465_vm2, %v462_v52 }
 0x194   :  { %5339 = vmatpush3.bf16.msra.mxu0 %v461_v54  ;;  %v5292_v55 = vpop.f32.mrb[12].mxu0 }
 0x195   :  { %5340 = vmatprep.subr.bf16.mxu0 %v462_v52  ;;  %v440_v56 = vpop.f32.mrb[13].mxu0 }
 0x196   :  { %v5293_v57 = vpop.f32.mrb[14].mxu0 }
 0x197   :  { %v464_v58 = vpack.c.bf16 %v5293_v57, %v5292_v55  ;;  %v443_v59 = vpop.f32.mrb[15].mxu0 }
 0x198   :  { %v463_v60 = vpack.c.bf16 %v443_v59, %v440_v56  ;;  %5341 = vmatpush3.bf16.msra.mxu0 %v462_v52 }
 0x19a   :  { %5308 = vmatprep.mubr.msk.bf16.mxu0 %vm465_vm2, %v463_v60  ;;  %5342 = vmatprep.subr.bf16.mxu0 %v463_v60 }
 0x19b   :  { %5309 = vmatmul.mubr.msk.bf16.gmra.mrb[28].mxu0 %vm465_vm2, %v464_v58 }
 0x19c   :  { %5343 = vmatpush3.bf16.msra.mxu0 %v463_v60  ;;  %5346 = vmatprep.mubr.bf16.mxu0 %v6531_v11 }
 0x19d   :  { %5344 = vmatprep.subr.bf16.mxu0 %v464_v58 }
 0x1a0   :  { %5345 = vmatpush3.bf16.msra.mxu0 %v464_v58 }
 0x1a3   :  { %5347 = vmatmul.mubr.bf16.vlgmr.msra.gmra.mrb[32].mxu0 %v6612_v29 }
 0x1a4   :  { %5350 = vmatprep.mubr.bf16.mxu0 %v6618_v31 }
 0x1ab   :  { %5351 = vmatmul.mubr.bf16.gmra.mrb[36].mxu0 %v5998_v32 }
 0x1ac   :  { %5354 = vmatprep.mubr.bf16.mxu0 %v5999_v33 }
 0x1b3   :  { %5355 = vmatmul.mubr.bf16.gmra.mrb[40].mxu0 %v6000_v34 }
 0x1b4   :  { %5358 = vmatprep.mubr.bf16.mxu0 %v6001_v35 }
 0x1bb   :  { %5359 = vmatmul.mubr.bf16.gmra.mrb[44].mxu0 %v6002_v36 }
 0x256   :  { %v6667_v5 = vpop.f32.mrb[16].mxu0 }
 0x257   :  { %v6669_v9 = vpop.f32.mrb[17].mxu0 }
 0x258   :  { %v6671_v11 = vpop.f32.mrb[18].mxu0 }
 0x259   :  { %v6673_v12 = vpop.f32.mrb[19].mxu0 }
 0x25e   :  { %v6675_v15 = vpop.f32.mrb[20].mxu0 }
 0x25f   :  { %v6677_v18 = vpop.f32.mrb[21].mxu0 }
 0x260   :  { %v6679_v19 = vpop.f32.mrb[22].mxu0 }
 0x261   :  { %v6681_v22 = vpop.f32.mrb[23].mxu0 }
 0x266   :  { %v6683_v25 = vpop.f32.mrb[24].mxu0 }
 0x267   :  { %v6685_v26 = vpop.f32.mrb[25].mxu0 }
 0x268   :  { %v6687_v27 = vpop.f32.mrb[26].mxu0 }
 0x269   :  { %v6689_v28 = vpop.f32.mrb[27].mxu0 }
 0x26e   :  { %v6691_v29 = vpop.f32.mrb[28].mxu0 }
 0x26f   :  { %v6693_v30 = vpop.f32.mrb[29].mxu0 }
 0x270   :  { %v6695_v31 = vpop.f32.mrb[30].mxu0 }
 0x271   :  { %v6697_v32 = vpop.f32.mrb[31].mxu0 }
 0x276   :  { %v5348_v33 = vpop.f32.mrb[32].mxu0 }
 0x277   :  { %v817_v34 = vmul.f32 2.0, %v5348_v33  ;;  %v752_v35 = vpop.f32.mrb[33].mxu0 }
 0x278   :  { %v815_v36 = vmul.f32 2.0, %v752_v35  ;;  %v5349_v37 = vpop.f32.mrb[34].mxu0 }
 0x279   :  { %v818_v38 = vmul.f32 2.0, %v5349_v37  ;;  %v755_v39 = vpop.f32.mrb[35].mxu0  ;;  %v833_v41 = vsub.f32 %v817_v34, %v6486_v2 }
 0x27a   :  { %v816_v40 = vmul.f32 2.0, %v755_v39  ;;  %v831_v43 = vsub.f32 %v815_v36, %v6476_v0 }
 0x27b   :  { %v834_v42 = vsub.f32 %v818_v38, %v6495_v4 }
 0x27c   :  { %v832_v44 = vsub.f32 %v816_v40, %v6481_v1 }
 0x27d   :  { %v850_v45 = vpack.c.bf16 %v834_v42, %v833_v41 }
 0x27e   :  { %v849_v46 = vpack.c.bf16 %v832_v44, %v831_v43  ;;  %v5352_v47 = vpop.f32.mrb[36].mxu0 }
 0x27f   :  { %v821_v48 = vmul.f32 2.0, %v5352_v47  ;;  %v768_v49 = vpop.f32.mrb[37].mxu0 }
 0x280   :  { %v819_v50 = vmul.f32 2.0, %v768_v49  ;;  %v5353_v51 = vpop.f32.mrb[38].mxu0  ;;  %5364 = vmatprep.mubr.msk.bf16.mxu1 %vm465_vm2, %v849_v46 }
 0x281   :  { %v822_v52 = vmul.f32 2.0, %v5353_v51  ;;  %v771_v53 = vpop.f32.mrb[39].mxu0  ;;  %5365 = vmatmul.mubr.msk.bf16.vlgmr.msra.gmra.mrb[0].mxu1 %vm465_vm2, %v850_v45  ;;  %v837_v4 = vsub.f32 %v821_v48, %v6516_v8  ;;  %v6003_v45 = vld [vmem:[%s7700_s2 + $0x80] sm:$0xff]  }
 0x282   :  { %v820_v2 = vmul.f32 2.0, %v771_v53  ;;  %v835_v1 = vsub.f32 %v819_v50, %v6504_v6  ;;  %5396 = vmatprep.mubr.bf16.mxu0 %v6003_v45 }
 0x283   :  { %v838_v0 = vsub.f32 %v822_v52, %v6526_v10 }
 0x284   :  { %v836_v54 = vsub.f32 %v820_v2, %v6509_v7 }
 0x285   :  { %v852_v55 = vpack.c.bf16 %v838_v0, %v837_v4 }
 0x286   :  { %v851_v56 = vpack.c.bf16 %v836_v54, %v835_v1  ;;  %v5356_v57 = vpop.f32.mrb[40].mxu0 }
 0x287   :  { %v825_v58 = vmul.f32 2.0, %v5356_v57  ;;  %v784_v59 = vpop.f32.mrb[41].mxu0 }
 0x288   :  { %v823_v60 = vmul.f32 2.0, %v784_v59  ;;  %v5357_v61 = vpop.f32.mrb[42].mxu0  ;;  %5368 = vmatprep.mubr.msk.bf16.mxu1 %vm465_vm2, %v851_v56 }
 0x289   :  { %v826_v62 = vmul.f32 2.0, %v5357_v61  ;;  %v787_v63 = vpop.f32.mrb[43].mxu0  ;;  %5369 = vmatmul.mubr.msk.bf16.gmra.mrb[4].mxu1 %vm465_vm2, %v852_v55  ;;  %v841_v10 = vsub.f32 %v825_v58, %v6559_v16 }
 0x28a   :  { %v824_v8 = vmul.f32 2.0, %v787_v63  ;;  %v839_v7 = vsub.f32 %v823_v60, %v6543_v13 }
 0x28b   :  { %v842_v6 = vsub.f32 %v826_v62, %v6564_v17 }
 0x28c   :  { %v840_v3 = vsub.f32 %v824_v8, %v6548_v14 }
 0x28d   :  { %v854_v33 = vpack.c.bf16 %v842_v6, %v841_v10 }
 0x28e   :  { %v853_v34 = vpack.c.bf16 %v840_v3, %v839_v7  ;;  %v5360_v35 = vpop.f32.mrb[44].mxu0 }
 0x28f   :  { %v829_v36 = vmul.f32 2.0, %v5360_v35  ;;  %v800_v37 = vpop.f32.mrb[45].mxu0 }
 0x290   :  { %v827_v38 = vmul.f32 2.0, %v800_v37  ;;  %v5361_v39 = vpop.f32.mrb[46].mxu0  ;;  %5372 = vmatprep.mubr.msk.bf16.mxu1 %vm465_vm2, %v853_v34 }
 0x291   :  { %v830_v40 = vmul.f32 2.0, %v5361_v39  ;;  %v803_v41 = vpop.f32.mrb[47].mxu0  ;;  %5373 = vmatmul.mubr.msk.bf16.gmra.mrb[8].mxu1 %vm465_vm2, %v854_v33  ;;  %v845_v17 = vsub.f32 %v829_v36, %v6586_v23  ;;  %v6729_v23 = vld [vmem:[%s7712_s14] ss:$0 sm:$0xff] }
 0x292   :  { %v828_v16 = vmul.f32 2.0, %v803_v41  ;;  %v843_v14 = vsub.f32 %v827_v38, %v6570_v20 }
 0x293   :  { %v846_v13 = vsub.f32 %v830_v40, %v6591_v24 }
 0x294   :  { %v844_v42 = vsub.f32 %v828_v16, %v6575_v21 }
 0x295   :  { %v856_v43 = vpack.c.bf16 %v846_v13, %v845_v17 }
 0x296   :  { %v855_v44 = vpack.c.bf16 %v844_v42, %v843_v14 }
 0x298   :  { %5376 = vmatprep.mubr.msk.bf16.mxu1 %vm465_vm2, %v855_v44 }
 0x299   :  { %5377 = vmatmul.mubr.msk.bf16.gmra.mrb[12].mxu1 %vm465_vm2, %v856_v43 }
 0x354   :  { %v5366_v24 = vpop.f32.mrb[0].mxu1 }
 0x355   :  { %v5852_v20 = vadd.f32 %v5366_v24, %v6667_v5  ;;  %v918_v21 = vpop.f32.mrb[1].mxu1 }
 0x356   :  { %v5853_v46 = vadd.f32 %v918_v21, %v6669_v9  ;;  %v5367_v47 = vpop.f32.mrb[2].mxu1 }
 0x357   :  { %v999_v48 = vadd.f32 %v5852_v20, %v6729_v23  ;;  %v5854_v49 = vadd.f32 %v5367_v47, %v6671_v11  ;;  %v921_v50 = vpop.f32.mrb[3].mxu1 }
 0x358   :  { %v997_v51 = vadd.f32 %v5853_v46, %v6729_v23  ;;  %v5855_v52 = vadd.f32 %v921_v50, %v6673_v12 }
 0x359   :  { %v1000_v53 = vadd.f32 %v5854_v49, %v6729_v23  ;;  %v1015_v4 = vmax.f32 %v999_v48, 0.0 }
 0x35a   :  { %v998_v2 = vadd.f32 %v5855_v52, %v6729_v23  ;;  %v1013_v5 = vmax.f32 %v997_v51, 0.0 }
 0x35b   :  { %v1016_v0 = vmax.f32 %v1000_v53, 0.0 }
 0x35c   :  { %v1014_v1 = vmax.f32 %v998_v2, 0.0  ;;  %v5370_v54 = vpop.f32.mrb[4].mxu1  ;;  %v6775_v2 = vld [vmem:[%s7700_s2 + $0xe0] sm:$0xff]  }
 0x35d   :  { %v5856_v9 = vadd.f32 %v5370_v54, %v6675_v15  ;;  %v934_v55 = vpop.f32.mrb[5].mxu1  ;;  %v1030_v56 = vpack.c.bf16 %v1016_v0, %v1015_v4  ;;  %5412 = vmatprep.mubr.msk.bf16.mxu1 %vm1152_vm3, %v6775_v2 }
 0x35e   :  { %v5857_v11 = vadd.f32 %v934_v55, %v6677_v18  ;;  %v5371_v57 = vpop.f32.mrb[6].mxu1  ;;  %v1029_v58 = vpack.c.bf16 %v1014_v1, %v1013_v5 }
 0x35f   :  { %v1003_v59 = vadd.f32 %v5856_v9, %v6729_v23  ;;  %v5858_v12 = vadd.f32 %v5371_v57, %v6679_v19  ;;  %v937_v60 = vpop.f32.mrb[7].mxu1 }
 0x360   :  { %v1001_v61 = vadd.f32 %v5857_v11, %v6729_v23  ;;  %v5859_v62 = vadd.f32 %v937_v60, %v6681_v22  ;;  %5380 = vmatprep.subr.bf16.mxu0 %v1029_v58  ;;  %v6811_v60 = vld [vmem:[%s7700_s2 + $0xf0] sm:$0xff]  }
 0x361   :  { %v1004_v63 = vadd.f32 %v5858_v12, %v6729_v23  ;;  %5381 = vmatpush3.bf16.msra.mxu0 %v1029_v58  ;;  %v1019_v8 = vmax.f32 %v1003_v59, 0.0  ;;  %v6806_v12 = vld [vmem:[%s7700_s2 + $0xe8] sm:$0xff]  }
 0x362   :  { %v1002_v15 = vadd.f32 %v5859_v62, %v6729_v23  ;;  %5382 = vmatprep.subr.bf16.mxu0 %v1030_v56  ;;  %v1017_v10 = vmax.f32 %v1001_v61, 0.0  ;;  %v6820_v61 = vld [vmem:[%s7700_s2 + $0xf8] sm:$0xff]   ;;  %v6011_v62 = vld [vmem:[#allocation4 + $0x8] sm:$0xff]  }
 0x363   :  { %v1020_v18 = vmax.f32 %v1004_v63, 0.0  ;;  %v6012_v63 = vld [vmem:[#allocation4] sm:$0xff]  }
 0x364   :  { %v1018_v6 = vmax.f32 %v1002_v15, 0.0  ;;  %v5374_v7 = vpop.f32.mrb[8].mxu1 }
 0x365   :  { %v5860_v3 = vadd.f32 %v5374_v7, %v6683_v25  ;;  %v950_v19 = vpop.f32.mrb[9].mxu1  ;;  %5383 = vmatpush3.bf16.msra.mxu0 %v1030_v56  ;;  %v1032_v33 = vpack.c.bf16 %v1020_v18, %v1019_v8 }
 0x366   :  { %v5861_v34 = vadd.f32 %v950_v19, %v6685_v26  ;;  %v5375_v22 = vpop.f32.mrb[10].mxu1  ;;  %v1031_v35 = vpack.c.bf16 %v1018_v6, %v1017_v10 }
 0x367   :  { %v1007_v36 = vadd.f32 %v5860_v3, %v6729_v23  ;;  %v5862_v37 = vadd.f32 %v5375_v22, %v6687_v27  ;;  %v953_v38 = vpop.f32.mrb[11].mxu1 }
 0x368   :  { %v1005_v39 = vadd.f32 %v5861_v34, %v6729_v23  ;;  %v5863_v40 = vadd.f32 %v953_v38, %v6689_v28  ;;  %5384 = vmatprep.subr.bf16.mxu0 %v1031_v35 }
 0x369   :  { %v1008_v41 = vadd.f32 %v5862_v37, %v6729_v23  ;;  %5385 = vmatpush3.bf16.msra.mxu0 %v1031_v35  ;;  %v1023_v16 = vmax.f32 %v1007_v36, 0.0  ;;  %v6013_v36 = vld [vmem:[#allocation4 + $0x10] sm:$0xff]  }
 0x36a   :  { %v1006_v25 = vadd.f32 %v5863_v40, %v6729_v23  ;;  %5386 = vmatprep.subr.bf16.mxu0 %v1032_v33  ;;  %v1021_v17 = vmax.f32 %v1005_v39, 0.0 }
 0x36b   :  { %v1024_v26 = vmax.f32 %v1008_v41, 0.0 }
 0x36c   :  { %v1022_v13 = vmax.f32 %v1006_v25, 0.0  ;;  %v5378_v14 = vpop.f32.mrb[12].mxu1 }
 0x36d   :  { %v5864_v42 = vadd.f32 %v5378_v14, %v6691_v29  ;;  %v966_v27 = vpop.f32.mrb[13].mxu1  ;;  %5387 = vmatpush3.bf16.msra.mxu0 %v1032_v33  ;;  %v1034_v43 = vpack.c.bf16 %v1024_v26, %v1023_v16 }
 0x36e   :  { %v5865_v44 = vadd.f32 %v966_v27, %v6693_v30  ;;  %v5379_v28 = vpop.f32.mrb[14].mxu1  ;;  %v1033_v45 = vpack.c.bf16 %v1022_v13, %v1021_v17 }
 0x36f   :  { %v1011_v24 = vadd.f32 %v5864_v42, %v6729_v23  ;;  %v5866_v20 = vadd.f32 %v5379_v28, %v6695_v31  ;;  %v969_v21 = vpop.f32.mrb[15].mxu1  ;;  %v6004_v31 = vld [vmem:[%s7700_s2 + $0x88] sm:$0xff]  }
 0x370   :  { %v1009_v46 = vadd.f32 %v5865_v44, %v6729_v23  ;;  %v5867_v47 = vadd.f32 %v969_v21, %v6697_v32  ;;  %5388 = vmatprep.subr.bf16.mxu0 %v1033_v45  ;;  %v6005_v32 = vld [vmem:[%s7700_s2 + $0x90] sm:$0xff]  }
 0x371   :  { %v1012_v48 = vadd.f32 %v5866_v20, %v6729_v23  ;;  %5389 = vmatpush3.bf16.msra.mxu0 %v1033_v45  ;;  %v1027_v49 = vmax.f32 %v1011_v24, 0.0 }
 0x372   :  { %v1010_v29 = vadd.f32 %v5867_v47, %v6729_v23  ;;  %5390 = vmatprep.subr.bf16.mxu0 %v1034_v43  ;;  %v1025_v50 = vmax.f32 %v1009_v46, 0.0  ;;  %v6006_v23 = vld [vmem:[%s7700_s2 + $0x98] sm:$0xff]  }
 0x373   :  { %v1028_v30 = vmax.f32 %v1012_v48, 0.0 }
 0x374   :  { %v1026_v51 = vmax.f32 %v1010_v29, 0.0 }
 0x375   :  { %5391 = vmatpush3.bf16.msra.mxu0 %v1034_v43  ;;  %v1036_v52 = vpack.c.bf16 %v1028_v30, %v1027_v49 }
 0x376   :  { %v1035_v53 = vpack.c.bf16 %v1026_v51, %v1025_v50 }
 0x378   :  { %5392 = vmatprep.subr.bf16.mxu0 %v1035_v53 }
 0x379   :  { %5393 = vmatpush3.bf16.msra.mxu0 %v1035_v53  ;;  %v293_v53 = vld [vmem:[%s7712_s14 + $0x10] ss:$0 sm:$0xff] }
 0x37a   :  { %5394 = vmatprep.subr.bf16.mxu0 %v1036_v52 }
 0x37d   :  { %5395 = vmatpush3.bf16.msra.mxu0 %v1036_v52  ;;  %v6014_v52 = vld [vmem:[%s7700_s2 + $0x100] sm:$0xff]  }
 0x37e   :  { %5420 = vmatprep.subr.bf16.mxu0 %v6011_v62 }
 0x380   :  { %5397 = vmatmul.mubr.bf16.vlgmr.msra.gmra.mrb[48].mxu0 %v6004_v31 }
 0x381   :  { %5400 = vmatprep.mubr.bf16.mxu0 %v6005_v32  ;;  %5421 = vmatpush3.bf16.msra.mxu0 %v6011_v62 }
 0x382   :  { %5430 = vmatprep.subr.bf16.mxu0 %v6012_v63 }
 0x388   :  { %5401 = vmatmul.mubr.bf16.gmra.mrb[52].mxu0 %v6006_v23 }
 0x453   :  { %v6779_v4 = vpop.f32.mrb[48].mxu0 }
 0x454   :  { %v6781_v0 = vpop.f32.mrb[49].mxu0 }
 0x455   :  { %v6783_v5 = vpop.f32.mrb[50].mxu0 }
 0x456   :  { %v1129_v1 = vpack.c.bf16 %v6783_v5, %v6779_v4  ;;  %v6787_v54 = vpop.f32.mrb[51].mxu0 }
 0x457   :  { %v1128_v9 = vpack.c.bf16 %v6787_v54, %v6781_v0 }
 0x459   :  { %5404 = vmatprep.subr.bf16.mxu1 %v1128_v9 }
 0x45a   :  { %5405 = vmatpush3.bf16.msra.mxu1 %v1128_v9 }
 0x45b   :  { %v6791_v55 = vpop.f32.mrb[52].mxu0  ;;  %5406 = vmatprep.subr.bf16.mxu1 %v1129_v1 }
 0x45c   :  { %v6793_v56 = vpop.f32.mrb[53].mxu0 }
 0x45d   :  { %v6795_v11 = vpop.f32.mrb[54].mxu0 }
 0x45e   :  { %v1131_v57 = vpack.c.bf16 %v6795_v11, %v6791_v55  ;;  %v6799_v58 = vpop.f32.mrb[55].mxu0  ;;  %5407 = vmatpush3.bf16.msra.mxu1 %v1129_v1 }
 0x45f   :  { %v1130_v59 = vpack.c.bf16 %v6799_v58, %v6793_v56 }
 0x461   :  { %5408 = vmatprep.subr.bf16.mxu1 %v1130_v59 }
 0x462   :  { %5409 = vmatpush3.bf16.msra.mxu1 %v1130_v59 }
 0x463   :  { %5410 = vmatprep.subr.bf16.mxu1 %v1131_v57 }
 0x466   :  { %5411 = vmatpush3.bf16.msra.mxu1 %v1131_v57 }
 0x469   :  { %5413 = vmatmul.mubr.msk.bf16.vlgmr.msra.gmra.mrb[16].mxu1 %vm1152_vm3, %v6806_v12 }
 0x46a   :  { %5416 = vmatprep.mubr.msk.bf16.mxu1 %vm1152_vm3, %v6811_v60 }
 0x471   :  { %5417 = vmatmul.mubr.msk.bf16.gmra.mrb[20].mxu1 %vm1152_vm3, %v6820_v61 }
 0x472   :  { %5448 = vmatprep.mubr.msk.bf16.mxu1 %vm1152_vm3, %v6775_v2 }
 0x53c   :  { %v5414_v15 = vpop.f32.mrb[16].mxu1 }
 0x53d   :  { %v1199_v8 = vpop.f32.mrb[17].mxu1 }
 0x53e   :  { %v5415_v18 = vpop.f32.mrb[18].mxu1 }
 0x53f   :  { %v1234_v10 = vpack.c.bf16 %v5415_v18, %v5414_v15  ;;  %v1202_v6 = vpop.f32.mrb[19].mxu1 }
 0x540   :  { %v1233_v7 = vpack.c.bf16 %v1202_v6, %v1199_v8 }
 0x542   :  { %5422 = vmatprep.mubr.msk.bf16.mxu0 %vm1243_vm4, %v1233_v7  ;;  %5440 = vmatprep.subr.bf16.mxu1 %v1233_v7 }
 0x543   :  { %5423 = vmatmul.mubr.msk.bf16.vlgmr.msra.gmra.mrb[56].mxu0 %vm1243_vm4, %v1234_v10  ;;  %5441 = vmatpush3.bf16.msra.mxu1 %v1233_v7 }
 0x544   :  { %v5418_v3 = vpop.f32.mrb[20].mxu1  ;;  %5442 = vmatprep.subr.bf16.mxu1 %v1234_v10  ;;  %5431 = vmatpush3.bf16.msra.mxu0 %v6012_v63 }
 0x545   :  { %v1215_v19 = vpop.f32.mrb[21].mxu1  ;;  %5456 = vmatprep.subr.bf16.mxu0 %v6013_v36 }
 0x546   :  { %v5419_v33 = vpop.f32.mrb[22].mxu1 }
 0x547   :  { %v1236_v34 = vpack.c.bf16 %v5419_v33, %v5418_v3  ;;  %v1218_v22 = vpop.f32.mrb[23].mxu1  ;;  %5443 = vmatpush3.bf16.msra.mxu1 %v1234_v10 }
 0x548   :  { %v1235_v35 = vpack.c.bf16 %v1218_v22, %v1215_v19 }
 0x54a   :  { %5426 = vmatprep.mubr.msk.bf16.mxu0 %vm1243_vm4, %v1235_v35  ;;  %5444 = vmatprep.subr.bf16.mxu1 %v1235_v35 }
 0x54b   :  { %5427 = vmatmul.mubr.msk.bf16.gmra.mrb[60].mxu0 %vm1243_vm4, %v1236_v34  ;;  %5445 = vmatpush3.bf16.msra.mxu1 %v1235_v35  ;;  %v6015_v35 = vld [vmem:[%s7700_s2 + $0x108] sm:$0xff]  }
 0x54c   :  { %5432 = vmatprep.mubr.msk.bf16.mxu0 %vm1243_vm4, %v1128_v9  ;;  %5446 = vmatprep.subr.bf16.mxu1 %v1236_v34 }
 0x54f   :  { %5447 = vmatpush3.bf16.msra.mxu1 %v1236_v34 }
 0x552   :  { %5449 = vmatmul.mubr.msk.bf16.vlgmr.msra.gmra.mrb[24].mxu1 %vm1152_vm3, %v6806_v12 }
 0x553   :  { %5433 = vmatmul.mubr.msk.bf16.vlgmr.msra.gmra.mrb[56].mxu0 %vm1243_vm4, %v1129_v1  ;;  %5452 = vmatprep.mubr.msk.bf16.mxu1 %vm1152_vm3, %v6811_v60 }
 0x554   :  { %5436 = vmatprep.mubr.msk.bf16.mxu0 %vm1243_vm4, %v1130_v59  ;;  %5457 = vmatpush3.bf16.msra.mxu0 %v6013_v36  ;;  %v6018_v36 = vld [vmem:[%s7713_s15 + $0x4] ss:$8 sps:$4 sm:$0xff]  }
 0x55a   :  { %5453 = vmatmul.mubr.msk.bf16.gmra.mrb[28].mxu1 %vm1152_vm3, %v6820_v61 }
 0x55b   :  { %5437 = vmatmul.mubr.msk.bf16.gmra.mrb[60].mxu0 %vm1243_vm4, %v1131_v57  ;;  %5474 = vmatprep.mubr.msk.bf16.mxu1 %vm1152_vm3, %v6014_v52 }
 0x625   :  { %v5450_v37 = vpop.f32.mrb[24].mxu1 }
 0x626   :  { %v1471_v38 = vmul.f32 2.0, %v5450_v37  ;;  %v1438_v39 = vpop.f32.mrb[25].mxu1  ;;  %v6016_v37 = vld [vmem:[%s7713_s15] ss:$8 sps:$4 sm:$0xff]  }
 0x627   :  { %v1469_v40 = vmul.f32 2.0, %v1438_v39  ;;  %v5451_v41 = vpop.f32.mrb[26].mxu1 }
 0x628   :  { %v1479_v25 = vsub.f32 %v1471_v38, %v6779_v4  ;;  %v1472_v16 = vmul.f32 2.0, %v5451_v41  ;;  %v1441_v26 = vpop.f32.mrb[27].mxu1  ;;  %v6284_v38 = vmov 0  }
 0x629   :  { %v1477_v17 = vsub.f32 %v1469_v40, %v6781_v0  ;;  %v1470_v13 = vmul.f32 2.0, %v1441_v26 }
 0x62a   :  { %v1480_v14 = vsub.f32 %v1472_v16, %v6783_v5 }
 0x62b   :  { %v1478_v42 = vsub.f32 %v1470_v13, %v6787_v54  ;;  %v6020_v13 = vld [vmem:[%s7706_s8] sm:$0xff]  }
 0x62c   :  { %v1489_v27 = vpack.c.bf16 %v1480_v14, %v1479_v25  ;;  %v6021_v14 = vld [vmem:[%s7706_s8 + $0x48] sm:$0xff]  }
 0x62d   :  { %v1488_v43 = vpack.c.bf16 %v1478_v42, %v1477_v17  ;;  %v5454_v44 = vpop.f32.mrb[28].mxu1  ;;  %v6019_v17 = vld [vmem:[%s7706_s8 + $0x40] sm:$0xff]   ;;  %v6022_v42 = vld [vmem:[%s7706_s8 + $0x8] sm:$0xff]  }
 0x62e   :  { %v1475_v28 = vmul.f32 2.0, %v5454_v44  ;;  %v1454_v45 = vpop.f32.mrb[29].mxu1  ;;  %5029 = vmatprep.subr.bf16.mxu0 %v6019_v17  ;;  %v6025_v44 = vld [vmem:[%s7706_s8 + $0x58] sm:$0xff]   ;;  %v296_v17 = vld [vmem:[%s7712_s14 + $0x40] ss:$0 sm:$0xff] }
 0x62f   :  { %v1473_v24 = vmul.f32 2.0, %v1454_v45  ;;  %v5455_v20 = vpop.f32.mrb[30].mxu1  ;;  %5458 = vmatprep.mubr.msk.bf16.mxu0 %vm1243_vm4, %v1488_v43  ;;  %v6024_v43 = vld [vmem:[%s7706_s8 + $0x10] sm:$0xff]   ;;  %v6027_v45 = vld [vmem:[%s7706_s8 + $0x60] sm:$0xff]  }
 0x630   :  { %v1483_v21 = vsub.f32 %v1475_v28, %v6791_v55  ;;  %v1476_v46 = vmul.f32 2.0, %v5455_v20  ;;  %v1457_v47 = vpop.f32.mrb[31].mxu1  ;;  %5459 = vmatmul.mubr.msk.bf16.vlgmr.msra.gmra.mrb[56].mxu0 %vm1243_vm4, %v1489_v27  ;;  %v6023_v27 = vld [vmem:[%s7706_s8 + $0x50] sm:$0xff]   ;;  %v6026_v28 = vld [vmem:[%s7706_s8 + $0x18] sm:$0xff]   ;;  %v6029_v20 = vld [vmem:[%s7706_s8 + $0x68] sm:$0xff]  }
 0x631   :  { %v1481_v48 = vsub.f32 %v1473_v24, %v6793_v56  ;;  %v1474_v29 = vmul.f32 2.0, %v1457_v47  ;;  %5030 = vmatpush3.bf16.msra.mxu0 %v6020_v13  ;;  %v6028_v24 = vld [vmem:[%s7706_s8 + $0x20] sm:$0xff]   ;;  %v6032_v47 = vld [vmem:[%s7706_s8 + $0x30] sm:$0xff]  }
 0x632   :  { %v1484_v49 = vsub.f32 %v1476_v46, %v6795_v11  ;;  %5031 = vmatprep.subr.bf16.mxu0 %v6021_v14  ;;  %v6031_v46 = vld [vmem:[%s7706_s8 + $0x70] sm:$0xff]  }
 0x633   :  { %v1482_v30 = vsub.f32 %v1474_v29, %v6799_v58  ;;  %v6924_v29 = vld [vmem:[%s7713_s15 + $0x18] sm:$0xff] }
 0x634   :  { %v1491_v50 = vpack.c.bf16 %v1484_v49, %v1483_v21  ;;  %v6030_v21 = vld [vmem:[%s7706_s8 + $0x28] sm:$0xff]   ;;  %v250_v52 = vunpack.c.h.bf16 %v6924_v29 }
 0x635   :  { %v1490_v51 = vpack.c.bf16 %v1482_v30, %v1481_v48  ;;  %5032 = vmatpush3.bf16.msra.mxu0 %v6022_v42  ;;  %v6919_v48 = vld [vmem:[%s7713_s15 + $0x10] sm:$0xff]  ;;  %v249_v30 = vunpack.c.l.bf16 %v6924_v29 }
 0x636   :  { %5033 = vmatprep.subr.bf16.mxu0 %v6023_v27  ;;  %v247_v49 = vunpack.c.l.bf16 %v6919_v48 }
 0x637   :  { %5462 = vmatprep.mubr.msk.bf16.mxu0 %vm1243_vm4, %v1490_v51  ;;  %v248_v51 = vunpack.c.h.bf16 %v6919_v48 }
 0x638   :  { %5463 = vmatmul.mubr.msk.bf16.gmra.mrb[60].mxu0 %vm1243_vm4, %v1491_v50 }
 0x639   :  { %5034 = vmatpush3.bf16.msra.mxu0 %v6024_v43 }
 0x63a   :  { %5035 = vmatprep.subr.bf16.mxu0 %v6025_v44  ;;  %v1967_v44 = vld [vmem:[#allocation9] sm:$0x3] }
 0x63d   :  { %5036 = vmatpush3.bf16.msra.mxu0 %v6026_v28 }
 0x63e   :  { %5037 = vmatprep.subr.bf16.mxu0 %v6027_v45 }
 0x641   :  { %5038 = vmatpush3.bf16.msra.mxu0 %v6028_v24  ;;  %v2034_v24 = vsel %vm491_vm1, %v1967_v44, 0 }
 0x642   :  { %5039 = vmatprep.subr.bf16.mxu0 %v6029_v20  ;;  %v164_v20 = vld [vmem:[%s7722_s4] sm:$0xff] }
 0x645   :  { %5040 = vmatpush3.bf16.msra.mxu0 %v6030_v21  ;;  %v1968_v21 = vpack.c.bf16 %v164_v20, %v164_v20 }
 0x646   :  { %5041 = vmatprep.subr.bf16.mxu0 %v6031_v46  ;;  %v6037_v46 = vld [vmem:[%s7710_s12] sm:$0xff]  }
 0x649   :  { %5042 = vmatpush3.bf16.msra.mxu0 %v6032_v47  ;;  %v6038_v47 = vld [vmem:[%s7710_s12 + $0x8] sm:$0xff]  }
 0x703   :  { %v5460_v31 = vpop.f32.mrb[56].mxu0 }
 0x704   :  { %v1585_v32 = vadd.f32 %v5460_v31, %v293_v53  ;;  %v1544_v23 = vpop.f32.mrb[57].mxu0 }
 0x705   :  { %v1583_v4 = vadd.f32 %v1544_v23, %v293_v53  ;;  %v5461_v0 = vpop.f32.mrb[58].mxu0 }
 0x706   :  { %v1586_v5 = vadd.f32 %v5461_v0, %v293_v53  ;;  %v1547_v1 = vpop.f32.mrb[59].mxu0  ;;  %v1593_v9 = vmax.f32 %v1585_v32, 0.0 }
 0x707   :  { %v1584_v54 = vadd.f32 %v1547_v1, %v293_v53  ;;  %v1591_v56 = vmax.f32 %v1583_v4, 0.0  ;;  %v6941_v1 = vld [vmem:[%s7713_s15 + $0x20] sm:$0xff] }
 0x708   :  { %v1594_v55 = vmax.f32 %v1586_v5, 0.0 }
 0x709   :  { %v1592_v11 = vmax.f32 %v1584_v54, 0.0  ;;  %v6946_v54 = vld [vmem:[%s7713_s15 + $0x28] sm:$0xff] }
 0x70a   :  { %v1600_v57 = vpack.c.bf16 %v1594_v55, %v1593_v9 }
 0x70b   :  { %v1599_v58 = vpack.c.bf16 %v1592_v11, %v1591_v56  ;;  %v5464_v59 = vpop.f32.mrb[60].mxu0  ;;  %v251_v56 = vunpack.c.l.bf16 %v6941_v1  ;;  %v253_v11 = vunpack.c.l.bf16 %v6946_v54 }
 0x70c   :  { %v1589_v62 = vadd.f32 %v5464_v59, %v293_v53  ;;  %v1560_v63 = vpop.f32.mrb[61].mxu0  ;;  %v254_v59 = vunpack.c.h.bf16 %v6946_v54 }
 0x70d   :  { %v1587_v15 = vadd.f32 %v1560_v63, %v293_v53  ;;  %v5465_v8 = vpop.f32.mrb[62].mxu0  ;;  %5466 = vmatprep.subr.bf16.mxu1 %v1599_v58 }
 0x70e   :  { %v1590_v18 = vadd.f32 %v5465_v8, %v293_v53  ;;  %v1563_v10 = vpop.f32.mrb[63].mxu0  ;;  %5467 = vmatpush3.bf16.msra.mxu1 %v1599_v58  ;;  %v1597_v7 = vmax.f32 %v1589_v62, 0.0  ;;  %v252_v58 = vunpack.c.h.bf16 %v6941_v1 }
 0x70f   :  { %v1588_v6 = vadd.f32 %v1563_v10, %v293_v53  ;;  %5468 = vmatprep.subr.bf16.mxu1 %v1600_v57  ;;  %v1595_v19 = vmax.f32 %v1587_v15, 0.0 }
 0x710   :  { %v1598_v3 = vmax.f32 %v1590_v18, 0.0 }
 0x711   :  { %v1596_v33 = vmax.f32 %v1588_v6, 0.0 }
 0x712   :  { %v1602_v34 = vpack.c.bf16 %v1598_v3, %v1597_v7  ;;  %5469 = vmatpush3.bf16.msra.mxu1 %v1600_v57 }
 0x713   :  { %v1601_v22 = vpack.c.bf16 %v1596_v33, %v1595_v19  ;;  %v255_v19 = vld [vmem:[%s7713_s15 + $0x30] sm:$0xf]  ;;  %v6033_v33 = vld [vmem:[%s7706_s8 + $0x78] sm:$0xff]  }
 0x714   :  { %5043 = vmatprep.subr.bf16.mxu0 %v6033_v33 }
 0x715   :  { %5470 = vmatprep.subr.bf16.mxu1 %v1601_v22 }
 0x716   :  { %5471 = vmatpush3.bf16.msra.mxu1 %v1601_v22 }
 0x717   :  { %5472 = vmatprep.subr.bf16.mxu1 %v1602_v34 }
 0x71a   :  { %5473 = vmatpush3.bf16.msra.mxu1 %v1602_v34  ;;  %v6034_v34 = vld [vmem:[%s7706_s8 + $0x38] sm:$0xff]  }
 0x71b   :  { %1686 = vmatprep.subr.bf16.mxu1 %v6018_v36  ;;  %5044 = vmatpush3.bf16.msra.mxu0 %v6034_v34 }
 0x71d   :  { %5475 = vmatmul.mubr.msk.bf16.vlgmr.msra.gmra.mrb[32].mxu1 %vm1152_vm3, %v6015_v35 }
 0x71e   :  { %1687 = vmatpush1.bf16.msra.mxu1 %v6016_v37  ;;  %1718 = vmatprep.mubr.bf16.mxu1 %v6284_v38 }
 0x7f0   :  { %v5476_v39 = vpop.f32.mrb[32].mxu1 }
 0x7f1   :  { %v1653_v40 = vpop.f32.mrb[33].mxu1 }
 0x7f2   :  { %v5477_v41 = vpop.f32.mrb[34].mxu1 }
 0x7f3   :  { %v1669_v25 = vpack.c.bf16 %v5477_v41, %v5476_v39  ;;  %v1656_v16 = vpop.f32.mrb[35].mxu1  ;;  %v6035_v41 = vld [vmem:[#allocation10] sm:$0xff]  }
 0x7f4   :  { %v1668_v26 = vpack.c.bf16 %v1656_v16, %v1653_v40  ;;  %v6036_v16 = vld [vmem:[#allocation10 + $0x8] sm:$0xff]  }
 0x7f6   :  { %4750 = vmatmul.mubr.msk.bf16.vlgmr.msra.gmra.mrb[36].mxu1 %vm1243_vm4, %v1668_v26 }
 0x7f7   :  { %1728 = vmatprep.mubr.bf16.mxu1 %v6284_v38 }
 0x7fe   :  { %4751 = vmatmul.mubr.msk.bf16.gmra.mrb[40].mxu1 %vm1243_vm4, %v1669_v25  ;;  %v6285_v25 = vmov 0.0  }
 0x7ff   :  { %1787 = vmatprep.mubr.bf16.mxu1 %v6284_v38  ;;  %5512 = vmatprep.subr.bf16.mxu0 %v6285_v25 }
 0x8c9   :  { %v1720_v50 = vpop.f32.mrb[36].mxu1 }
 0x8ca   :  { %v1722_v53 = vpop.f32.mrb[37].mxu1  ;;  %v1739_v32 = vmul.f32 %v1720_v50, %v247_v49  ;;  %v6039_v50 = vld [vmem:[%s7710_s12 + $0x10] sm:$0xff]  }
 0x8cb   :  { %v1724_v31 = vpop.f32.mrb[38].mxu1  ;;  %v1740_v0 = vmul.f32 %v1722_v53, %v248_v51  ;;  %v6040_v53 = vld [vmem:[%s7710_s12 + $0x18] sm:$0xff]  }
 0x8cc   :  { %v1741_v23 = vmul.f32 %v1724_v31, %v249_v30  ;;  %v1726_v4 = vpop.f32.mrb[39].mxu1  ;;  %v6041_v31 = vld [vmem:[%s7710_s12 + $0x20] sm:$0xff]  }
 0x8cd   :  { %v1742_v5 = vmul.f32 %v1726_v4, %v250_v52  ;;  %v2093_v4 = vld [vmem:[#allocation12] sm:$0x3] }
 0x8ce   :  { %v1747_v9 = vpack.c.bf16 %v1741_v23, %v1739_v32  ;;  %v6042_v32 = vld [vmem:[%s7710_s12 + $0x28] sm:$0xff]   ;;  %v6043_v23 = vld [vmem:[%s7710_s12 + $0x30] sm:$0xff]  }
 0x8cf   :  { %v1748_v55 = vpack.c.bf16 %v1742_v5, %v1740_v0  ;;  %v2200_v0 = vsel %vm491_vm1, %v2093_v4, 0  ;;  %v6044_v5 = vld [vmem:[%s7710_s12 + $0x38] sm:$0xff]  }
 0x8d1   :  { %v1730_v57 = vpop.f32.mrb[40].mxu1  ;;  %1755 = vmatprep.subr.bf16.mxu1 %v1748_v55 }
 0x8d2   :  { %v1732_v62 = vpop.f32.mrb[41].mxu1  ;;  %1756 = vmatpush1.bf16.msra.mxu1 %v1747_v9  ;;  %v1743_v15 = vmul.f32 %v1730_v57, %v251_v56  ;;  %v2077_v9 = vlaneseq }
 0x8d3   :  { %v1734_v63 = vpop.f32.mrb[42].mxu1  ;;  %v1744_v10 = vmul.f32 %v1732_v62, %v252_v58 }
 0x8d4   :  { %v1745_v8 = vmul.f32 %v1734_v63, %v253_v11  ;;  %v1736_v18 = vpop.f32.mrb[43].mxu1 }
 0x8d5   :  { %v1746_v6 = vmul.f32 %v1736_v18, %v254_v59 }
 0x8d6   :  { %v1749_v7 = vpack.c.bf16 %v1745_v8, %v1743_v15  ;;  %v2078_v15 = vand.u32 127, %v2077_v9  ;;  %v298_v8 = vld [vmem:[%s7712_s14 + $0x60] ss:$0 sm:$0xff] }
 0x8d7   :  { %v1750_v3 = vpack.c.bf16 %v1746_v6, %v1744_v10 }
 0x8d8   :  { %vm2079_vm8 = vcmp.ge.s32.totalorder %v2078_v15, 16  ;;  %vm2080_vm9 = vcmp.lt.s32.totalorder %v2078_v15, 20 }
 0x8d9   :  { %1757 = vmatprep.subr.bf16.mxu1 %v1750_v3  ;;  %vm7013_vm10 = vmand %vm2079_vm8, %vm2080_vm9 }
 0x8da   :  { %1758 = vmatpush1.bf16.msra.mxu1 %v1749_v7 }
 0x8db   :  { %5478 = vmatprep.subr.bf16.mxu1 %v6285_v25 }
 0x8dd   :  { %4752 = vmatmul.mubr.msk.bf16.vlgmr.msra.gmra.mrb[44].mxu1 %vm1751_vm5, %v255_v19 }
 0x8de   :  { %5479 = vmatpush3.bf16.msra.mxu1 %v6035_v41  ;;  %5482 = vmatprep.mubr.msk.bf16.mxu1 %vm6286_vm6, %v6285_v25 }
 0x8df   :  { %5480 = vmatprep.subr.bf16.mxu1 %v6285_v25 }
 0x8e2   :  { %5481 = vmatpush3.bf16.msra.mxu1 %v6036_v16  ;;  %v6048_v16 = vld [vmem:[%s7711_s13 + $0x10] ss:$8 sps:$4 sm:$0xff]  }
 0x8e3   :  { %5486 = vmatprep.subr.bf16.mxu1 %v6285_v25 }
 0x9b0   :  { %v1789_v22 = vpop.f32.mrb[44].mxu1 }
 0x9b1   :  { %v1791_v35 = vpop.f32.mrb[45].mxu1  ;;  %v1828_v39 = vpack.c.bf16 %v1789_v22, %v1789_v22 }
 0x9b2   :  { %v1829_v36 = vpack.c.bf16 %v1791_v35, %v1791_v35  ;;  %v1793_v37 = vpop.f32.mrb[46].mxu1 }
 0x9b3   :  { %v1794_v40 = vpop.f32.mrb[47].mxu1  ;;  %v6047_v37 = vld [vmem:[%s7711_s13 + $0x4] ss:$8 sps:$4 sm:$0xff]  }
 0x9b4   :  { %1958 = vmatprep.mubr.bf16.mxu0 %v1829_v36  ;;  %v6045_v40 = vld [vmem:[%s7711_s13] ss:$8 sps:$4 sm:$0xff]  }
 0x9b5   :  { %1959 = vmatmul.mubr.bf16.vlgmr.msra.gmra.mrb[64].mxu0 %v1828_v39 }
 0x9b6   :  { %5514 = vmatprep.mubr.msk.bf16.mxu0 %vm6286_vm6, %v6285_v25  ;;  %5513 = vmatpush3.bf16.msra.mxu0 %v2200_v0 }
 0x9b7   :  { %2283 = vmatprep.subr.bf16.mxu0 %v6047_v37  ;;  %v6058_v37 = vld [vmem:[%s7714_s16 + $0x20] sm:$0xff]  }
 0x9bd   :  { %5515 = vmatmul.mubr.msk.bf16.vlgmr.msra.gmra.mrb[68].mxu0 %vm2029_vm7, %v1968_v21 }
 0x9be   :  { %2315 = vmatprep.mubr.bf16.mxu0 %v6284_v38  ;;  %2284 = vmatpush1.bf16.msra.mxu0 %v6045_v40  ;;  %v6061_v40 = vld [vmem:[%s7714_s16 + $0x70] sm:$0xff]  }
 0xa88   :  { %v5045_v26 = vpop.f32.mrb[64].mxu0 }
 0xa89   :  { %v5046_v13 = vpop.f32.mrb[65].mxu0 }
 0xa8a   :  { %v5047_v14 = vadd.f32 %v5046_v13, %v5045_v26  ;;  %v5048_v42 = vpop.f32.mrb[66].mxu0 }
 0xa8b   :  { %v5049_v27 = vpop.f32.mrb[67].mxu0 }
 0xa8c   :  { %v1961_v43 = vadd.f32 %v5047_v14, %v296_v17  ;;  %v297_v27 = vld [vmem:[%s7712_s14 + $0x50] ss:$0 sm:$0xff] }
 0xa8e   :  { %v1966_v28 = vmax.f32 %v1961_v43, 0.0 }
 0xa90   :  { %v1973_v45 = vpack.c.bf16 %v1966_v28, %v1966_v28  ;;  %v2236_v35 = vpop.f32.mrb[68].mxu0 }
 0xa91   :  { %v5516_v36 = vpop.f32.mrb[69].mxu0 }
 0xa92   :  { %5483 = vmatmul.mubr.msk.bf16.vlgmr.msra.gmra.mrb[48].mxu1 %vm1751_vm5, %v1973_v45  ;;  %v2239_v39 = vpop.f32.mrb[70].mxu0  ;;  %v6052_v36 = vld [vmem:[%s7714_s16 + $0x8] sm:$0xff]  }
 0xa93   :  { %5487 = vmatpush3.bf16.msra.mxu1 %v2034_v24  ;;  %5488 = vmatprep.mubr.msk.bf16.mxu1 %vm6286_vm6, %v6285_v25  ;;  %v5517_v41 = vpop.f32.mrb[71].mxu0  ;;  %v6060_v39 = vld [vmem:[%s7714_s16 + $0x28] sm:$0xff]  }
 0xa94   :  { %5492 = vmatprep.subr.bf16.mxu1 %v6285_v25  ;;  %v6062_v41 = vld [vmem:[%s7714_s16 + $0x30] sm:$0xff]  }
 0xa9a   :  { %5489 = vmatmul.mubr.msk.bf16.vlgmr.msra.gmra.mrb[52].mxu1 %vm2029_vm7, %v1968_v21 }
 0xa9b   :  { %5493 = vmatpush3.bf16.msra.mxu1 %v6037_v46  ;;  %5508 = vmatprep.mubr.msk.bf16.mxu1 %vm6286_vm6, %v6285_v25 }
 0xa9c   :  { %5494 = vmatprep.subr.bf16.mxu1 %v6285_v25 }
 0xa9f   :  { %5495 = vmatpush3.bf16.msra.mxu1 %v6038_v47 }
 0xaa0   :  { %5496 = vmatprep.subr.bf16.mxu1 %v6285_v25 }
 0xaa3   :  { %5497 = vmatpush3.bf16.msra.mxu1 %v6039_v50 }
 0xaa4   :  { %5498 = vmatprep.subr.bf16.mxu1 %v6285_v25 }
 0xaa7   :  { %5499 = vmatpush3.bf16.msra.mxu1 %v6040_v53 }
 0xaa8   :  { %5500 = vmatprep.subr.bf16.mxu1 %v6285_v25 }
 0xaab   :  { %5501 = vmatpush3.bf16.msra.mxu1 %v6041_v31  ;;  %v2251_v31 = vshrl.u32 %v2077_v9, 7  ;;  %v6053_v9 = vld [vmem:[%s7714_s16 + $0x50] sm:$0xff]  }
 0xaac   :  { %5502 = vmatprep.subr.bf16.mxu1 %v6285_v25 }
 0xaad   :  { %v2256_v4 = vsub.s32 1, %v2251_v31 }
 0xaaf   :  { %5503 = vmatpush3.bf16.msra.mxu1 %v6042_v32  ;;  %v2252_v32 = vsub.s32 0, %v2251_v31 }
 0xab0   :  { %5504 = vmatprep.subr.bf16.mxu1 %v6285_v25 }
 0xab3   :  { %5505 = vmatpush3.bf16.msra.mxu1 %v6043_v23  ;;  %v4680_v23 = vld [vmem:[%s7712_s14 + $0x70] ss:$8 sm:$0x3] }
 0xab4   :  { %5506 = vmatprep.subr.bf16.mxu1 %v6285_v25  ;;  %v6050_v25 = vld [vmem:[%s7711_s13 + $0x14] ss:$8 sps:$4 sm:$0xff]   ;;  %v2253_v0 = vrot.slane %v4680_v23, %v2252_v32 }
 0xab5   :  { %2285 = vmatprep.subr.bf16.mxu0 %v6050_v25  ;;  %v6063_v25 = vld [vmem:[%s7714_s16 + $0x78] sm:$0xff]  }
 0xab6   :  { %2286 = vmatpush1.bf16.msra.mxu0 %v6048_v16  ;;  %v6064_v16 = vld [vmem:[%s7714_s16 + $0x38] sm:$0xff]  }
 0xab7   :  { %5507 = vmatpush3.bf16.msra.mxu1 %v6044_v5  ;;  %v2257_v5 = vrot.slane %v4680_v23, %v2256_v4 }
 0xb65   :  { %v2023_v55 = vpop.f32.mrb[48].mxu1 }
 0xb66   :  { %v5484_v57 = vpop.f32.mrb[49].mxu1 }
 0xb67   :  { %v2026_v62 = vpop.f32.mrb[50].mxu1 }
 0xb68   :  { %v5485_v63 = vpop.f32.mrb[51].mxu1 }
 0xb6d   :  { %v2070_v18 = vpop.f32.mrb[52].mxu1 }
 0xb6e   :  { %v2071_v10 = vadd.f32 %v2070_v18, %v2023_v55  ;;  %v5490_v6 = vpop.f32.mrb[53].mxu1 }
 0xb6f   :  { %v2073_v3 = vpop.f32.mrb[54].mxu1 }
 0xb70   :  { %v2076_v19 = vadd.f32 %v2071_v10, %v298_v8  ;;  %v5491_v33 = vpop.f32.mrb[55].mxu1 }
 0xb71   :  { %v6054_v33 = vld [vmem:[%s7714_s16 + $0x10] sm:$0xff]  }
 0xb72   :  { %v2110_v34 = vpack.c.bf16 %v2076_v19, %v2076_v19  ;;  %v2082_v22 = vsel %vm7013_vm10, %v2076_v19, -1e+30 }
 0xb73   :  { %2083 = vmax.xlane.f32.xlu0 %v2082_v22 }
 0xb74   :  { %5509 = vmatmul.mubr.bf16.vlgmr.msra.gmra.mrb[56].mxu1 %v2110_v34  ;;  %v6055_v34 = vld [vmem:[%s7714_s16 + $0x58] sm:$0xff]  }
 0xc00   :  { %v2084_v26 = vpop.xlane.xlu0 %2083 }
 0xc01   :  { %v2085_v17 = vsub.f32 %v2082_v22, %v2084_v26  ;;  %v6056_v22 = vld [vmem:[%s7714_s16 + $0x18] sm:$0xff]   ;;  %v6065_v26 = vld [vmem:[%s7714_s16 + $0x80] sm:$0xff]  }
 0xc03   :  { %v2086_v13 = vmul.f32 1.442695, %v2085_v17  ;;  %v6066_v17 = vld [vmem:[%s7714_s16 + $0x40] sm:$0xff]  }
 0xc05   :  { %6098 = vpow2.f32 %v2086_v13  ;;  %v6067_v13 = vld [vmem:[%s7714_s16 + $0x88] sm:$0xff]  }
 0xc0f   :  { %v6099_v14 = vpop.eup %6098 }
 0xc10   :  { %2088 = vadd.xlane.f32.xlu0 %v6099_v14 }
 0xc47   :  { %v2193_v42 = vpop.f32.mrb[56].mxu1 }
 0xc48   :  { %v2237_v43 = vadd.f32 %v2236_v35, %v2193_v42  ;;  %v5510_v44 = vpop.f32.mrb[57].mxu1  ;;  %v6057_v35 = vld [vmem:[%s7714_s16 + $0x60] sm:$0xff]  }
 0xc49   :  { %v2196_v28 = vpop.f32.mrb[58].mxu1 }
 0xc4a   :  { %v2242_v45 = vadd.f32 %v2237_v43, %v297_v27  ;;  %v5511_v24 = vpop.f32.mrb[59].mxu1 }
 0xc4c   :  { %v2243_v20 = vmax.f32 %v2242_v45, 0.0 }
 0xc4e   :  { %v2248_v21 = vpack.c.bf16 %v2243_v20, %v2243_v20 }
 0xc50   :  { %4786 = vmatmul.mubr.msk.bf16.vlgmr.msra.gmra.mrb[72].mxu0 %vm1751_vm5, %v2248_v21 }
 0xc51   :  { %2384 = vmatprep.mubr.bf16.mxu0 %v6284_v38 }
 0xc9d   :  { %v2089_v46 = vpop.xlane.xlu0 %2088 }
 0xc9e   :  { %6100 = vrcp.f32 %v2089_v46 }
 0xca8   :  { %v6101_v47 = vpop.eup %6100 }
 0xca9   :  { %v2091_v50 = vmul.f32 %v6101_v47, %v6099_v14  ;;  %v6068_v14 = vld [vmem:[%s7714_s16 + $0x48] sm:$0xff]  }
 0xcab   :  { %v2092_v53 = vsel %vm7013_vm10, %v2091_v50, %v2076_v19  ;;  %v6051_v19 = vld [vmem:[%s7714_s16] sm:$0xff]  }
 0xcac   :  { %4671 = vst [vmem:[%s7715_s17 + $0x80] sm:$0xff] %v2092_v53 }
 0xd23   :  { %v2317_v55 = vpop.f32.mrb[72].mxu0 }
 0xd24   :  { %v2318_v57 = vadd.f32 %v2317_v55, %v2253_v0  ;;  %v2319_v62 = vpop.f32.mrb[73].mxu0 }
 0xd25   :  { %v2320_v63 = vadd.f32 %v2319_v62, %v2257_v5  ;;  %v2321_v15 = vpop.f32.mrb[74].mxu0 }
 0xd26   :  { %v2324_v8 = vmax.f32 %v2318_v57, 0.0  ;;  %v2322_v18 = vpop.f32.mrb[75].mxu0  ;;  %v6070_v15 = vld [vmem:[%s7700_s2 + $0x118] sm:$0xff]  }
 0xd27   :  { %v2325_v10 = vmax.f32 %v2320_v63, 0.0  ;;  %v6072_v18 = vld [vmem:[%s7700_s2 + $0x128] sm:$0xff]  }
 0xd28   :  { %v2326_v6 = vpack.c.bf16 %v2324_v8, %v2324_v8  ;;  %v6071_v8 = vld [vmem:[%s7700_s2 + $0x120] sm:$0xff]  }
 0xd29   :  { %v2327_v7 = vpack.c.bf16 %v2325_v10, %v2325_v10 }
 0xd2a   :  { %v2347_v3 = vsel %vm2345_vm11, %v2326_v6, 0 }
 0xd2b   :  { %4789 = vmatprep.subr.msk.bf16.mxu0 %vm2345_vm11, %v2327_v7 }
 0xd2c   :  { %2353 = vmatpush1.bf16.msra.mxu0 %v2347_v3 }
 0xd2d   :  { %5067 = vmatprep.subr.bf16.mxu0 %v6053_v9 }
 0xd2f   :  { %4790 = vmatmul.mubr.msk.bf16.vlgmr.msra.gmra.mrb[76].mxu0 %vm2338_vm12, %v6051_v19 }
 0xd30   :  { %2394 = vmatprep.mubr.bf16.mxu0 %v6284_v38  ;;  %5068 = vmatpush3.bf16.msra.mxu0 %v6054_v33  ;;  %v6059_v38 = vld [vmem:[%s7714_s16 + $0x68] sm:$0xff]  }
 0xd31   :  { %5069 = vmatprep.subr.bf16.mxu0 %v6055_v34 }
 0xd34   :  { %5070 = vmatpush3.bf16.msra.mxu0 %v6056_v22 }
 0xd35   :  { %5071 = vmatprep.subr.bf16.mxu0 %v6057_v35 }
 0xd37   :  { %4791 = vmatmul.mubr.msk.bf16.gmra.mrb[80].mxu0 %vm2338_vm12, %v6052_v36 }
 0xd38   :  { %5072 = vmatpush3.bf16.msra.mxu0 %v6058_v37  ;;  %v6073_v37 = vld [vmem:[%s7725_s24 + $0x8] sm:$0xff]  }
 0xd39   :  { %5073 = vmatprep.subr.bf16.mxu0 %v6059_v38  ;;  %v6074_v38 = vld [vmem:[%s7725_s24] sm:$0xff]  }
 0xd3c   :  { %5074 = vmatpush3.bf16.msra.mxu0 %v6060_v39 }
 0xd3d   :  { %5075 = vmatprep.subr.bf16.mxu0 %v6061_v40 }
 0xd40   :  { %5076 = vmatpush3.bf16.msra.mxu0 %v6062_v41 }
 0xd41   :  { %5077 = vmatprep.subr.bf16.mxu0 %v6063_v25 }
 0xd44   :  { %5078 = vmatpush3.bf16.msra.mxu0 %v6064_v16 }
 0xd45   :  { %5079 = vmatprep.subr.bf16.mxu0 %v6065_v26 }
 0xd48   :  { %5080 = vmatpush3.bf16.msra.mxu0 %v6066_v17 }
 0xd49   :  { %5081 = vmatprep.subr.bf16.mxu0 %v6067_v13 }
 0xd4c   :  { %5082 = vmatpush3.bf16.msra.mxu0 %v6068_v14 }
 0xe02   :  { %v2386_v42 = vpop.f32.mrb[76].mxu0 }
 0xe03   :  { %v2388_v27 = vpop.f32.mrb[77].mxu0  ;;  %v2405_v44 = vmul.f32 %v2386_v42, %v247_v49 }
 0xe04   :  { %v2390_v43 = vpop.f32.mrb[78].mxu0  ;;  %v2406_v24 = vmul.f32 %v2388_v27, %v248_v51 }
 0xe05   :  { %v2407_v28 = vmul.f32 %v2390_v43, %v249_v30  ;;  %v2392_v45 = vpop.f32.mrb[79].mxu0 }
 0xe06   :  { %v2408_v20 = vmul.f32 %v2392_v45, %v250_v52 }
 0xe07   :  { %v2413_v21 = vpack.c.bf16 %v2407_v28, %v2405_v44  ;;  %v6075_v44 = vld [vmem:[%s7725_s24 + $0x10] sm:$0xff]  }
 0xe08   :  { %v2414_v46 = vpack.c.bf16 %v2408_v20, %v2406_v24 }
 0xe0a   :  { %v2396_v47 = vpop.f32.mrb[80].mxu0  ;;  %2545 = vmatprep.mubr.bf16.mxu0 %v2414_v46 }
 0xe0b   :  { %v2398_v50 = vpop.f32.mrb[81].mxu0  ;;  %2546 = vmatmul.mubr.bf16.vlgmr.msra.gmra.mrb[84].mxu0 %v2413_v21  ;;  %v2409_v49 = vmul.f32 %v2396_v47, %v251_v56  ;;  %v6069_v56 = vld [vmem:[%s7700_s2 + $0x110] sm:$0xff]  }
 0xe0c   :  { %v2400_v53 = vpop.f32.mrb[82].mxu0  ;;  %v2410_v48 = vmul.f32 %v2398_v50, %v252_v58  ;;  %5522 = vmatprep.mubr.msk.bf16.mxu1 %vm1751_vm5, %v6069_v56 }
 0xe0d   :  { %v2411_v30 = vmul.f32 %v2400_v53, %v253_v11  ;;  %v2402_v31 = vpop.f32.mrb[83].mxu0 }
 0xe0e   :  { %v2412_v29 = vmul.f32 %v2402_v31, %v254_v59 }
 0xe0f   :  { %v2415_v51 = vpack.c.bf16 %v2411_v30, %v2409_v49 }
 0xe10   :  { %v2416_v52 = vpack.c.bf16 %v2412_v29, %v2410_v48 }
 0xe12   :  { %2553 = vmatprep.mubr.bf16.mxu0 %v2416_v52 }
 0xe13   :  { %2554 = vmatmul.mubr.bf16.gmra.mrb[88].mxu0 %v2415_v51 }
 0xe14   :  { %5574 = vmatprep.mubr.msk.bf16.mxu0 %vm1152_vm3, %v6775_v2 }
 0xede   :  { %v5083_v11 = vpop.f32.mrb[84].mxu0 }
 0xedf   :  { %v5084_v32 = vpop.f32.mrb[85].mxu0 }
 0xee0   :  { %v5085_v1 = vadd.f32 %v5084_v32, %v5083_v11  ;;  %v5086_v58 = vpop.f32.mrb[86].mxu0 }
 0xee1   :  { %v5087_v23 = vpop.f32.mrb[87].mxu0 }
 0xee2   :  { %v5088_v54 = vadd.f32 %v5087_v23, %v5086_v58 }
 0xee4   :  { %v2562_v59 = vpack.c.bf16 %v5088_v54, %v5085_v1 }
 0xee6   :  { %v5089_v4 = vpop.f32.mrb[88].mxu0  ;;  %5518 = vmatprep.subr.bf16.mxu1 %v2562_v59 }
 0xee7   :  { %v5090_v0 = vpop.f32.mrb[89].mxu0  ;;  %5519 = vmatpush3.bf16.msra.mxu1 %v2562_v59 }
 0xee8   :  { %v5091_v5 = vadd.f32 %v5090_v0, %v5089_v4  ;;  %v5092_v55 = vpop.f32.mrb[90].mxu0  ;;  %v6076_v0 = vld [vmem:[%s7700_s2 + $0xa0] sm:$0xff]  }
 0xee9   :  { %v5093_v57 = vpop.f32.mrb[91].mxu0 }
 0xeea   :  { %v5094_v62 = vadd.f32 %v5093_v57, %v5092_v55 }
 0xeec   :  { %v2563_v63 = vpack.c.bf16 %v5094_v62, %v5091_v5  ;;  %v294_v5 = vld [vmem:[%s7712_s14 + $0x20] ss:$0 sm:$0xff] }
 0xeee   :  { %5520 = vmatprep.subr.bf16.mxu1 %v2563_v63 }
 0xeef   :  { %5521 = vmatpush3.bf16.msra.mxu1 %v2563_v63 }
 0xef2   :  { %5523 = vmatmul.mubr.msk.bf16.vlgmr.msra.gmra.mrb[60].mxu1 %vm1751_vm5, %v6070_v15 }
 0xef3   :  { %5526 = vmatprep.mubr.msk.bf16.mxu1 %vm1751_vm5, %v6071_v8 }
 0xefa   :  { %5527 = vmatmul.mubr.msk.bf16.gmra.mrb[64].mxu1 %vm1751_vm5, %v6072_v18 }
 0xefb   :  { %5538 = vmatprep.mubr.msk.bf16.mxu1 %vm1152_vm3, %v6775_v2 }
 0xfc5   :  { %v7135_v10 = vpop.f32.mrb[60].mxu1 }
 0xfc6   :  { %v7137_v6 = vpop.f32.mrb[61].mxu1 }
 0xfc7   :  { %v7139_v7 = vpop.f32.mrb[62].mxu1 }
 0xfc8   :  { %v2664_v9 = vpack.c.bf16 %v7139_v7, %v7135_v10  ;;  %v7143_v3 = vpop.f32.mrb[63].mxu1 }
 0xfc9   :  { %v2663_v19 = vpack.c.bf16 %v7143_v3, %v7137_v6 }
 0xfcb   :  { %5530 = vmatprep.subr.bf16.mxu1 %v2663_v19 }
 0xfcc   :  { %5531 = vmatpush3.bf16.msra.mxu1 %v2663_v19 }
 0xfcd   :  { %v7147_v33 = vpop.f32.mrb[64].mxu1  ;;  %5532 = vmatprep.subr.bf16.mxu1 %v2664_v9 }
 0xfce   :  { %v7149_v2 = vpop.f32.mrb[65].mxu1 }
 0xfcf   :  { %v7151_v34 = vpop.f32.mrb[66].mxu1 }
 0xfd0   :  { %v2666_v22 = vpack.c.bf16 %v7151_v34, %v7147_v33  ;;  %v7155_v35 = vpop.f32.mrb[67].mxu1  ;;  %5533 = vmatpush3.bf16.msra.mxu1 %v2664_v9 }
 0xfd1   :  { %v2665_v36 = vpack.c.bf16 %v7155_v35, %v7149_v2 }
 0xfd3   :  { %5534 = vmatprep.subr.bf16.mxu1 %v2665_v36 }
 0xfd4   :  { %5535 = vmatpush3.bf16.msra.mxu1 %v2665_v36 }
 0xfd5   :  { %5536 = vmatprep.subr.bf16.mxu1 %v2666_v22 }
 0xfd8   :  { %5537 = vmatpush3.bf16.msra.mxu1 %v2666_v22 }
 0xfd9   :  { %5546 = vmatprep.subr.bf16.mxu1 %v6073_v37 }
 0xfdb   :  { %5539 = vmatmul.mubr.msk.bf16.vlgmr.msra.gmra.mrb[68].mxu1 %vm1152_vm3, %v6806_v12 }
 0xfdc   :  { %5542 = vmatprep.mubr.msk.bf16.mxu1 %vm1152_vm3, %v6811_v60  ;;  %5547 = vmatpush3.bf16.msra.mxu1 %v6073_v37 }
 0xfdd   :  { %5556 = vmatprep.subr.bf16.mxu1 %v6074_v38 }
 0xfe3   :  { %5543 = vmatmul.mubr.msk.bf16.gmra.mrb[72].mxu1 %vm1152_vm3, %v6820_v61 }
0x10ae   :  { %v5540_v39 = vpop.f32.mrb[68].mxu1 }
0x10af   :  { %v2701_v40 = vpop.f32.mrb[69].mxu1 }
0x10b0   :  { %v5541_v41 = vpop.f32.mrb[70].mxu1 }
0x10b1   :  { %v2736_v25 = vpack.c.bf16 %v5541_v41, %v5540_v39  ;;  %v2704_v16 = vpop.f32.mrb[71].mxu1 }
0x10b2   :  { %v2735_v26 = vpack.c.bf16 %v2704_v16, %v2701_v40 }
0x10b4   :  { %5548 = vmatprep.mubr.msk.bf16.mxu1 %vm1243_vm4, %v2735_v26  ;;  %5566 = vmatprep.subr.bf16.mxu0 %v2735_v26 }
0x10b5   :  { %5549 = vmatmul.mubr.msk.bf16.vlgmr.msra.gmra.mrb[76].mxu1 %vm1243_vm4, %v2736_v25  ;;  %5567 = vmatpush3.bf16.msra.mxu0 %v2735_v26 }
0x10b6   :  { %v5544_v17 = vpop.f32.mrb[72].mxu1  ;;  %5568 = vmatprep.subr.bf16.mxu0 %v2736_v25  ;;  %5557 = vmatpush3.bf16.msra.mxu1 %v6074_v38 }
0x10b7   :  { %v2717_v13 = vpop.f32.mrb[73].mxu1  ;;  %5582 = vmatprep.subr.bf16.mxu1 %v6075_v44 }
0x10b8   :  { %v5545_v14 = vpop.f32.mrb[74].mxu1 }
0x10b9   :  { %v2738_v42 = vpack.c.bf16 %v5545_v14, %v5544_v17  ;;  %v2720_v27 = vpop.f32.mrb[75].mxu1  ;;  %5569 = vmatpush3.bf16.msra.mxu0 %v2736_v25  ;;  %v6078_v14 = vld [vmem:[%s7700_s2 + $0xb0] sm:$0xff]  }
0x10ba   :  { %v2737_v43 = vpack.c.bf16 %v2720_v27, %v2717_v13  ;;  %v6077_v13 = vld [vmem:[%s7700_s2 + $0xa8] sm:$0xff]   ;;  %v6080_v27 = vld [vmem:[%s7700_s2 + $0xc0] sm:$0xff]  }
0x10bc   :  { %5552 = vmatprep.mubr.msk.bf16.mxu1 %vm1243_vm4, %v2737_v43  ;;  %5570 = vmatprep.subr.bf16.mxu0 %v2737_v43 }
0x10bd   :  { %5553 = vmatmul.mubr.msk.bf16.gmra.mrb[80].mxu1 %vm1243_vm4, %v2738_v42  ;;  %5571 = vmatpush3.bf16.msra.mxu0 %v2737_v43  ;;  %v6081_v43 = vld [vmem:[%s7700_s2 + $0xc8] sm:$0xff]  }
0x10be   :  { %5558 = vmatprep.mubr.msk.bf16.mxu1 %vm1243_vm4, %v2663_v19  ;;  %5572 = vmatprep.subr.bf16.mxu0 %v2738_v42 }
0x10c1   :  { %5573 = vmatpush3.bf16.msra.mxu0 %v2738_v42  ;;  %v6079_v42 = vld [vmem:[%s7700_s2 + $0xb8] sm:$0xff]  }
0x10c4   :  { %5575 = vmatmul.mubr.msk.bf16.vlgmr.msra.gmra.mrb[92].mxu0 %vm1152_vm3, %v6806_v12 }
0x10c5   :  { %5559 = vmatmul.mubr.msk.bf16.vlgmr.msra.gmra.mrb[76].mxu1 %vm1243_vm4, %v2664_v9  ;;  %5578 = vmatprep.mubr.msk.bf16.mxu0 %vm1152_vm3, %v6811_v60 }
0x10c6   :  { %5562 = vmatprep.mubr.msk.bf16.mxu1 %vm1243_vm4, %v2665_v36  ;;  %5583 = vmatpush3.bf16.msra.mxu1 %v6075_v44  ;;  %v6082_v44 = vld [vmem:[%s7700_s2 + $0xd0] sm:$0xff]  }
0x10cc   :  { %5579 = vmatmul.mubr.msk.bf16.gmra.mrb[96].mxu0 %vm1152_vm3, %v6820_v61 }
0x10cd   :  { %5563 = vmatmul.mubr.msk.bf16.gmra.mrb[80].mxu1 %vm1243_vm4, %v2666_v22  ;;  %5600 = vmatprep.mubr.msk.bf16.mxu0 %vm1152_vm3, %v6076_v0  ;;  %v7333_v0 = vld [vmem:[%s7700_s2 + $0x18] sm:$0xff]  }
0x1197   :  { %v5576_v28 = vpop.f32.mrb[92].mxu0 }
0x1198   :  { %v2972_v12 = vmul.f32 2.0, %v5576_v28  ;;  %v2939_v45 = vpop.f32.mrb[93].mxu0  ;;  %v6083_v28 = vld [vmem:[%s7700_s2 + $0xd8] sm:$0xff]  }
0x1199   :  { %v2970_v24 = vmul.f32 2.0, %v2939_v45  ;;  %v5577_v20 = vpop.f32.mrb[94].mxu0 }
0x119a   :  { %v2980_v60 = vsub.f32 %v2972_v12, %v7135_v10  ;;  %v2973_v21 = vmul.f32 2.0, %v5577_v20  ;;  %v2942_v46 = vpop.f32.mrb[95].mxu0  ;;  %v6102_v12 = vld [vmem:[%s7700_s2] sm:$0xff]  }
0x119b   :  { %v2978_v47 = vsub.f32 %v2970_v24, %v7137_v6  ;;  %v2971_v61 = vmul.f32 2.0, %v2942_v46 }
0x119c   :  { %v2981_v50 = vsub.f32 %v2973_v21, %v7139_v7 }
0x119d   :  { %v2979_v53 = vsub.f32 %v2971_v61, %v7143_v3 }
0x119e   :  { %v2990_v49 = vpack.c.bf16 %v2981_v50, %v2980_v60 }
0x119f   :  { %v2989_v30 = vpack.c.bf16 %v2979_v53, %v2978_v47  ;;  %v5580_v31 = vpop.f32.mrb[96].mxu0 }
0x11a0   :  { %v2976_v48 = vmul.f32 2.0, %v5580_v31  ;;  %v2955_v29 = vpop.f32.mrb[97].mxu0 }
0x11a1   :  { %v2974_v51 = vmul.f32 2.0, %v2955_v29  ;;  %v5581_v52 = vpop.f32.mrb[98].mxu0  ;;  %5584 = vmatprep.mubr.msk.bf16.mxu1 %vm1243_vm4, %v2989_v30 }
0x11a2   :  { %v2984_v56 = vsub.f32 %v2976_v48, %v7147_v33  ;;  %v2977_v11 = vmul.f32 2.0, %v5581_v52  ;;  %v2958_v32 = vpop.f32.mrb[99].mxu0  ;;  %5585 = vmatmul.mubr.msk.bf16.vlgmr.msra.gmra.mrb[76].mxu1 %vm1243_vm4, %v2990_v49 }
0x11a3   :  { %v2982_v1 = vsub.f32 %v2974_v51, %v7149_v2  ;;  %v2975_v58 = vmul.f32 2.0, %v2958_v32 }
0x11a4   :  { %v2985_v23 = vsub.f32 %v2977_v11, %v7151_v34 }
0x11a5   :  { %v2983_v54 = vsub.f32 %v2975_v58, %v7155_v35 }
0x11a6   :  { %v2992_v59 = vpack.c.bf16 %v2985_v23, %v2984_v56 }
0x11a7   :  { %v2991_v4 = vpack.c.bf16 %v2983_v54, %v2982_v1 }
0x11a9   :  { %5588 = vmatprep.mubr.msk.bf16.mxu1 %vm1243_vm4, %v2991_v4  ;;  %v7327_v4 = vld [vmem:[%s7700_s2 + $0x10] sm:$0xff]  }
0x11aa   :  { %5589 = vmatmul.mubr.msk.bf16.gmra.mrb[80].mxu1 %vm1243_vm4, %v2992_v59  ;;  %v7321_v59 = vld [vmem:[%s7700_s2 + $0x8] sm:$0xff]  }
0x1275   :  { %v5586_v55 = vpop.f32.mrb[76].mxu1 }
0x1276   :  { %v3086_v57 = vadd.f32 %v5586_v55, %v294_v5  ;;  %v3045_v62 = vpop.f32.mrb[77].mxu1  ;;  %v7345_v55 = vld [vmem:[%s7700_s2 + $0x28] sm:$0xff]  }
0x1277   :  { %v3084_v63 = vadd.f32 %v3045_v62, %v294_v5  ;;  %v5587_v15 = vpop.f32.mrb[78].mxu1  ;;  %v7357_v62 = vld [vmem:[%s7700_s2 + $0x38] sm:$0xff]  }
0x1278   :  { %v3087_v8 = vadd.f32 %v5587_v15, %v294_v5  ;;  %v3048_v18 = vpop.f32.mrb[79].mxu1  ;;  %v3094_v6 = vmax.f32 %v3086_v57, 0.0  ;;  %v7351_v57 = vld [vmem:[%s7700_s2 + $0x30] sm:$0xff]   ;;  %v6085_v15 = vld [vmem:[#allocation6] sm:$0xff]  }
0x1279   :  { %v3085_v10 = vadd.f32 %v3048_v18, %v294_v5  ;;  %v3092_v9 = vmax.f32 %v3084_v63, 0.0  ;;  %v6084_v63 = vld [vmem:[#allocation6 + $0x8] sm:$0xff]  }
0x127a   :  { %v3095_v7 = vmax.f32 %v3087_v8, 0.0  ;;  %5648 = vmatprep.subr.bf16.mxu1 %v6084_v63 }
0x127b   :  { %v3093_v3 = vmax.f32 %v3085_v10, 0.0  ;;  %5649 = vmatpush3.bf16.msra.mxu1 %v6084_v63 }
0x127c   :  { %v3101_v19 = vpack.c.bf16 %v3095_v7, %v3094_v6  ;;  %5666 = vmatprep.subr.bf16.mxu1 %v6085_v15 }
0x127d   :  { %v3100_v33 = vpack.c.bf16 %v3093_v3, %v3092_v9  ;;  %v5590_v2 = vpop.f32.mrb[80].mxu1  ;;  %v6086_v3 = vld [vmem:[#allocation6 + $0x10] sm:$0xff]  }
0x127e   :  { %v3090_v34 = vadd.f32 %v5590_v2, %v294_v5  ;;  %v3061_v22 = vpop.f32.mrb[81].mxu1 }
0x127f   :  { %v3088_v35 = vadd.f32 %v3061_v22, %v294_v5  ;;  %v5591_v36 = vpop.f32.mrb[82].mxu1  ;;  %5592 = vmatprep.subr.bf16.mxu0 %v3100_v33 }
0x1280   :  { %v3091_v37 = vadd.f32 %v5591_v36, %v294_v5  ;;  %v3064_v38 = vpop.f32.mrb[83].mxu1  ;;  %5593 = vmatpush3.bf16.msra.mxu0 %v3100_v33  ;;  %v3098_v40 = vmax.f32 %v3090_v34, 0.0 }
0x1281   :  { %v3089_v39 = vadd.f32 %v3064_v38, %v294_v5  ;;  %5594 = vmatprep.subr.bf16.mxu0 %v3101_v19  ;;  %v3096_v25 = vmax.f32 %v3088_v35, 0.0  ;;  %v7339_v5 = vld [vmem:[%s7700_s2 + $0x20] sm:$0xff]  }
0x1282   :  { %v3099_v41 = vmax.f32 %v3091_v37, 0.0 }
0x1283   :  { %v3097_v16 = vmax.f32 %v3089_v39, 0.0 }
0x1284   :  { %v3103_v26 = vpack.c.bf16 %v3099_v41, %v3098_v40  ;;  %5595 = vmatpush3.bf16.msra.mxu0 %v3101_v19 }
0x1285   :  { %v3102_v17 = vpack.c.bf16 %v3097_v16, %v3096_v25 }
0x1287   :  { %5596 = vmatprep.subr.bf16.mxu0 %v3102_v17 }
0x1288   :  { %5597 = vmatpush3.bf16.msra.mxu0 %v3102_v17 }
0x1289   :  { %5598 = vmatprep.subr.bf16.mxu0 %v3103_v26 }
0x128c   :  { %5599 = vmatpush3.bf16.msra.mxu0 %v3103_v26 }
0x128f   :  { %5601 = vmatmul.mubr.msk.bf16.vlgmr.msra.gmra.mrb[100].mxu0 %vm1152_vm3, %v6077_v13 }
0x1290   :  { %5604 = vmatprep.mubr.msk.bf16.mxu0 %vm1152_vm3, %v6078_v14 }
0x1297   :  { %5605 = vmatmul.mubr.msk.bf16.gmra.mrb[104].mxu0 %vm1152_vm3, %v6079_v42 }
0x1298   :  { %5608 = vmatprep.mubr.msk.bf16.mxu0 %vm1152_vm3, %v6080_v27 }
0x129f   :  { %5609 = vmatmul.mubr.msk.bf16.gmra.mrb[108].mxu0 %vm1152_vm3, %v6081_v43 }
0x12a0   :  { %5612 = vmatprep.mubr.msk.bf16.mxu0 %vm1152_vm3, %v6082_v44 }
0x12a7   :  { %5613 = vmatmul.mubr.msk.bf16.gmra.mrb[112].mxu0 %vm1152_vm3, %v6083_v28 }
0x12a8   :  { %5632 = vmatprep.mubr.bf16.mxu0 %v6102_v12 }
0x1362   :  { %v7238_v45 = vpop.f32.mrb[100].mxu0 }
0x1363   :  { %v7240_v24 = vpop.f32.mrb[101].mxu0 }
0x1364   :  { %v7242_v20 = vpop.f32.mrb[102].mxu0 }
0x1365   :  { %v7246_v60 = vpack.c.bf16 %v7242_v20, %v7238_v45  ;;  %v7248_v21 = vpop.f32.mrb[103].mxu0 }
0x1366   :  { %v7252_v46 = vpack.c.bf16 %v7248_v21, %v7240_v24 }
0x1368   :  { %5616 = vmatprep.subr.bf16.mxu0 %v7252_v46 }
0x1369   :  { %5617 = vmatpush3.bf16.msra.mxu0 %v7252_v46 }
0x136a   :  { %v7256_v47 = vpop.f32.mrb[104].mxu0  ;;  %5618 = vmatprep.subr.bf16.mxu0 %v7246_v60 }
0x136b   :  { %v7259_v61 = vpop.f32.mrb[105].mxu0 }
0x136c   :  { %v7261_v50 = vpop.f32.mrb[106].mxu0 }
0x136d   :  { %v7265_v53 = vpack.c.bf16 %v7261_v50, %v7256_v47  ;;  %v7267_v49 = vpop.f32.mrb[107].mxu0  ;;  %5619 = vmatpush3.bf16.msra.mxu0 %v7246_v60 }
0x136e   :  { %v7272_v30 = vpack.c.bf16 %v7267_v49, %v7259_v61 }
0x1370   :  { %5620 = vmatprep.subr.bf16.mxu0 %v7272_v30 }
0x1371   :  { %5621 = vmatpush3.bf16.msra.mxu0 %v7272_v30 }
0x1372   :  { %v7276_v31 = vpop.f32.mrb[108].mxu0  ;;  %5622 = vmatprep.subr.bf16.mxu0 %v7265_v53 }
0x1373   :  { %v7279_v48 = vpop.f32.mrb[109].mxu0 }
0x1374   :  { %v7281_v29 = vpop.f32.mrb[110].mxu0 }
0x1375   :  { %v7285_v51 = vpack.c.bf16 %v7281_v29, %v7276_v31  ;;  %v7287_v52 = vpop.f32.mrb[111].mxu0  ;;  %5623 = vmatpush3.bf16.msra.mxu0 %v7265_v53 }
0x1376   :  { %v7292_v56 = vpack.c.bf16 %v7287_v52, %v7279_v48 }
0x1378   :  { %5624 = vmatprep.subr.bf16.mxu0 %v7292_v56 }
0x1379   :  { %5625 = vmatpush3.bf16.msra.mxu0 %v7292_v56 }
0x137a   :  { %v7296_v11 = vpop.f32.mrb[112].mxu0  ;;  %5626 = vmatprep.subr.bf16.mxu0 %v7285_v51 }
0x137b   :  { %v7299_v32 = vpop.f32.mrb[113].mxu0 }
0x137c   :  { %v7301_v1 = vpop.f32.mrb[114].mxu0 }
0x137d   :  { %v7305_v58 = vpack.c.bf16 %v7301_v1, %v7296_v11  ;;  %v7307_v23 = vpop.f32.mrb[115].mxu0  ;;  %5627 = vmatpush3.bf16.msra.mxu0 %v7285_v51 }
0x137e   :  { %v7312_v54 = vpack.c.bf16 %v7307_v23, %v7299_v32 }
0x1380   :  { %5628 = vmatprep.subr.bf16.mxu0 %v7312_v54 }
0x1381   :  { %5629 = vmatpush3.bf16.msra.mxu0 %v7312_v54 }
0x1382   :  { %5630 = vmatprep.subr.bf16.mxu0 %v7305_v58 }
0x1385   :  { %5631 = vmatpush3.bf16.msra.mxu0 %v7305_v58 }
0x1388   :  { %5633 = vmatmul.mubr.bf16.vlgmr.msra.gmra.mrb[116].mxu0 %v7321_v59 }
0x1389   :  { %5636 = vmatprep.mubr.bf16.mxu0 %v7327_v4 }
0x1390   :  { %5637 = vmatmul.mubr.bf16.gmra.mrb[120].mxu0 %v7333_v0 }
0x1391   :  { %5640 = vmatprep.mubr.bf16.mxu0 %v7339_v5 }
0x1398   :  { %5641 = vmatmul.mubr.bf16.gmra.mrb[124].mxu0 %v7345_v55 }
0x1399   :  { %5644 = vmatprep.mubr.bf16.mxu0 %v7351_v57 }
0x13a0   :  { %5645 = vmatmul.mubr.bf16.gmra.mrb[128].mxu0 %v7357_v62 }
0x13a1   :  { %5700 = vmatprep.mubr.bf16.mxu0 %v6102_v12 }
0x145b   :  { %v5634_v8 = vpop.f32.mrb[116].mxu0 }
0x145c   :  { %v3309_v18 = vpop.f32.mrb[117].mxu0 }
0x145d   :  { %v5635_v10 = vpop.f32.mrb[118].mxu0 }
0x145e   :  { %v3376_v6 = vpack.c.bf16 %v5635_v10, %v5634_v8  ;;  %v3312_v7 = vpop.f32.mrb[119].mxu0 }
0x145f   :  { %v3375_v9 = vpack.c.bf16 %v3312_v7, %v3309_v18 }
0x1461   :  { %5650 = vmatprep.mubr.msk.bf16.mxu1 %vm1243_vm4, %v3375_v9  ;;  %5684 = vmatprep.subr.bf16.mxu0 %v3375_v9 }
0x1462   :  { %5651 = vmatmul.mubr.msk.bf16.vlgmr.msra.gmra.mrb[84].mxu1 %vm1243_vm4, %v3376_v6  ;;  %5685 = vmatpush3.bf16.msra.mxu0 %v3375_v9 }
0x1463   :  { %v5638_v19 = vpop.f32.mrb[120].mxu0  ;;  %5686 = vmatprep.subr.bf16.mxu0 %v3376_v6  ;;  %5667 = vmatpush3.bf16.msra.mxu1 %v6085_v15 }
0x1464   :  { %v3325_v33 = vpop.f32.mrb[121].mxu0  ;;  %5716 = vmatprep.subr.bf16.mxu1 %v6086_v3 }
0x1465   :  { %v5639_v2 = vpop.f32.mrb[122].mxu0 }
0x1466   :  { %v3378_v34 = vpack.c.bf16 %v5639_v2, %v5638_v19  ;;  %v3328_v22 = vpop.f32.mrb[123].mxu0  ;;  %5687 = vmatpush3.bf16.msra.mxu0 %v3376_v6 }
0x1467   :  { %v3377_v35 = vpack.c.bf16 %v3328_v22, %v3325_v33 }
0x1469   :  { %5654 = vmatprep.mubr.msk.bf16.mxu1 %vm1243_vm4, %v3377_v35  ;;  %5688 = vmatprep.subr.bf16.mxu0 %v3377_v35 }
0x146a   :  { %5655 = vmatmul.mubr.msk.bf16.gmra.mrb[88].mxu1 %vm1243_vm4, %v3378_v34  ;;  %5689 = vmatpush3.bf16.msra.mxu0 %v3377_v35 }
0x146b   :  { %v5642_v36 = vpop.f32.mrb[124].mxu0  ;;  %5690 = vmatprep.subr.bf16.mxu0 %v3378_v34 }
0x146c   :  { %v3341_v37 = vpop.f32.mrb[125].mxu0 }
0x146d   :  { %v5643_v38 = vpop.f32.mrb[126].mxu0 }
0x146e   :  { %v3380_v39 = vpack.c.bf16 %v5643_v38, %v5642_v36  ;;  %v3344_v40 = vpop.f32.mrb[127].mxu0  ;;  %5691 = vmatpush3.bf16.msra.mxu0 %v3378_v34 }
0x146f   :  { %v3379_v41 = vpack.c.bf16 %v3344_v40, %v3341_v37 }
0x1471   :  { %5658 = vmatprep.mubr.msk.bf16.mxu1 %vm1243_vm4, %v3379_v41  ;;  %5692 = vmatprep.subr.bf16.mxu0 %v3379_v41 }
0x1472   :  { %5659 = vmatmul.mubr.msk.bf16.gmra.mrb[92].mxu1 %vm1243_vm4, %v3380_v39  ;;  %5693 = vmatpush3.bf16.msra.mxu0 %v3379_v41 }
0x1473   :  { %v5646_v25 = vpop.f32.mrb[128].mxu0  ;;  %5694 = vmatprep.subr.bf16.mxu0 %v3380_v39 }
0x1474   :  { %v3357_v16 = vpop.f32.mrb[129].mxu0 }
0x1475   :  { %v5647_v26 = vpop.f32.mrb[130].mxu0 }
0x1476   :  { %v3382_v17 = vpack.c.bf16 %v5647_v26, %v5646_v25  ;;  %v3360_v13 = vpop.f32.mrb[131].mxu0  ;;  %5695 = vmatpush3.bf16.msra.mxu0 %v3380_v39 }
0x1477   :  { %v3381_v14 = vpack.c.bf16 %v3360_v13, %v3357_v16 }
0x1479   :  { %5662 = vmatprep.mubr.msk.bf16.mxu1 %vm1243_vm4, %v3381_v14  ;;  %5696 = vmatprep.subr.bf16.mxu0 %v3381_v14 }
0x147a   :  { %5663 = vmatmul.mubr.msk.bf16.gmra.mrb[96].mxu1 %vm1243_vm4, %v3382_v17  ;;  %5697 = vmatpush3.bf16.msra.mxu0 %v3381_v14 }
0x147b   :  { %5668 = vmatprep.mubr.msk.bf16.mxu1 %vm1243_vm4, %v7252_v46  ;;  %5698 = vmatprep.subr.bf16.mxu0 %v3382_v17 }
0x147e   :  { %5699 = vmatpush3.bf16.msra.mxu0 %v3382_v17 }
0x1481   :  { %5701 = vmatmul.mubr.bf16.vlgmr.msra.gmra.mrb[132].mxu0 %v7321_v59 }
0x1482   :  { %5669 = vmatmul.mubr.msk.bf16.vlgmr.msra.gmra.mrb[84].mxu1 %vm1243_vm4, %v7246_v60  ;;  %5704 = vmatprep.mubr.bf16.mxu0 %v7327_v4 }
0x1483   :  { %5672 = vmatprep.mubr.msk.bf16.mxu1 %vm1243_vm4, %v7272_v30  ;;  %5717 = vmatpush3.bf16.msra.mxu1 %v6086_v3 }
0x1489   :  { %5705 = vmatmul.mubr.bf16.gmra.mrb[136].mxu0 %v7333_v0 }
0x148a   :  { %5673 = vmatmul.mubr.msk.bf16.gmra.mrb[88].mxu1 %vm1243_vm4, %v7265_v53  ;;  %5708 = vmatprep.mubr.bf16.mxu0 %v7339_v5 }
0x148b   :  { %5676 = vmatprep.mubr.msk.bf16.mxu1 %vm1243_vm4, %v7292_v56 }
0x1491   :  { %5709 = vmatmul.mubr.bf16.gmra.mrb[140].mxu0 %v7345_v55 }
0x1492   :  { %5677 = vmatmul.mubr.msk.bf16.gmra.mrb[92].mxu1 %vm1243_vm4, %v7285_v51  ;;  %5712 = vmatprep.mubr.bf16.mxu0 %v7351_v57 }
0x1493   :  { %5680 = vmatprep.mubr.msk.bf16.mxu1 %vm1243_vm4, %v7312_v54 }
0x1499   :  { %5713 = vmatmul.mubr.bf16.gmra.mrb[144].mxu0 %v7357_v62 }
0x149a   :  { %5681 = vmatmul.mubr.msk.bf16.gmra.mrb[96].mxu1 %vm1243_vm4, %v7305_v58 }
0x1554   :  { %v5702_v42 = vpop.f32.mrb[132].mxu0 }
0x1555   :  { %v3736_v27 = vmul.f32 2.0, %v5702_v42  ;;  %v3671_v43 = vpop.f32.mrb[133].mxu0 }
0x1556   :  { %v3734_v44 = vmul.f32 2.0, %v3671_v43  ;;  %v5703_v28 = vpop.f32.mrb[134].mxu0 }
0x1557   :  { %v3752_v12 = vsub.f32 %v3736_v27, %v7238_v45  ;;  %v3737_v60 = vmul.f32 2.0, %v5703_v28  ;;  %v3674_v46 = vpop.f32.mrb[135].mxu0 }
0x1558   :  { %v3750_v53 = vsub.f32 %v3734_v44, %v7240_v24  ;;  %v3735_v30 = vmul.f32 2.0, %v3674_v46 }
0x1559   :  { %v3753_v51 = vsub.f32 %v3737_v60, %v7242_v20 }
0x155a   :  { %v3751_v56 = vsub.f32 %v3735_v30, %v7248_v21 }
0x155b   :  { %v3770_v54 = vpack.c.bf16 %v3753_v51, %v3752_v12 }
0x155c   :  { %v3769_v59 = vpack.c.bf16 %v3751_v56, %v3750_v53  ;;  %v5706_v4 = vpop.f32.mrb[136].mxu0 }
0x155d   :  { %v3740_v58 = vmul.f32 2.0, %v5706_v4  ;;  %v3687_v0 = vpop.f32.mrb[137].mxu0 }
0x155e   :  { %v3738_v5 = vmul.f32 2.0, %v3687_v0  ;;  %v5707_v55 = vpop.f32.mrb[138].mxu0  ;;  %5718 = vmatprep.mubr.msk.bf16.mxu1 %vm1243_vm4, %v3769_v59 }
0x155f   :  { %v3756_v45 = vsub.f32 %v3740_v58, %v7256_v47  ;;  %v3741_v57 = vmul.f32 2.0, %v5707_v55  ;;  %v3690_v62 = vpop.f32.mrb[139].mxu0  ;;  %5719 = vmatmul.mubr.msk.bf16.vlgmr.msra.gmra.mrb[84].mxu1 %vm1243_vm4, %v3770_v54 }
0x1560   :  { %v3754_v24 = vsub.f32 %v3738_v5, %v7259_v61  ;;  %v3739_v20 = vmul.f32 2.0, %v3690_v62 }
0x1561   :  { %v3757_v21 = vsub.f32 %v3741_v57, %v7261_v50 }
0x1562   :  { %v3755_v63 = vsub.f32 %v3739_v20, %v7267_v49 }
0x1563   :  { %v3772_v15 = vpack.c.bf16 %v3757_v21, %v3756_v45 }
0x1564   :  { %v3771_v8 = vpack.c.bf16 %v3755_v63, %v3754_v24  ;;  %v5710_v18 = vpop.f32.mrb[140].mxu0 }
0x1565   :  { %v3744_v10 = vmul.f32 2.0, %v5710_v18  ;;  %v3703_v6 = vpop.f32.mrb[141].mxu0 }
0x1566   :  { %v3742_v7 = vmul.f32 2.0, %v3703_v6  ;;  %v5711_v9 = vpop.f32.mrb[142].mxu0  ;;  %5722 = vmatprep.mubr.msk.bf16.mxu1 %vm1243_vm4, %v3771_v8 }
0x1567   :  { %v3760_v47 = vsub.f32 %v3744_v10, %v7276_v31  ;;  %v3745_v3 = vmul.f32 2.0, %v5711_v9  ;;  %v3706_v19 = vpop.f32.mrb[143].mxu0  ;;  %5723 = vmatmul.mubr.msk.bf16.gmra.mrb[88].mxu1 %vm1243_vm4, %v3772_v15 }
0x1568   :  { %v3758_v61 = vsub.f32 %v3742_v7, %v7279_v48  ;;  %v3743_v50 = vmul.f32 2.0, %v3706_v19 }
0x1569   :  { %v3761_v49 = vsub.f32 %v3745_v3, %v7281_v29 }
0x156a   :  { %v3759_v33 = vsub.f32 %v3743_v50, %v7287_v52 }
0x156b   :  { %v3774_v2 = vpack.c.bf16 %v3761_v49, %v3760_v47 }
0x156c   :  { %v3773_v34 = vpack.c.bf16 %v3759_v33, %v3758_v61  ;;  %v5714_v22 = vpop.f32.mrb[144].mxu0 }
0x156d   :  { %v3748_v35 = vmul.f32 2.0, %v5714_v22  ;;  %v3719_v36 = vpop.f32.mrb[145].mxu0 }
0x156e   :  { %v3746_v37 = vmul.f32 2.0, %v3719_v36  ;;  %v5715_v38 = vpop.f32.mrb[146].mxu0  ;;  %5726 = vmatprep.mubr.msk.bf16.mxu1 %vm1243_vm4, %v3773_v34 }
0x156f   :  { %v3764_v31 = vsub.f32 %v3748_v35, %v7296_v11  ;;  %v3749_v39 = vmul.f32 2.0, %v5715_v38  ;;  %v3722_v40 = vpop.f32.mrb[147].mxu0  ;;  %5727 = vmatmul.mubr.msk.bf16.gmra.mrb[92].mxu1 %vm1243_vm4, %v3774_v2  ;;  %v7418_v11 = vld [vmem:[%s7700_s2 + $0x40] sm:$0xff]  }
0x1570   :  { %v3762_v48 = vsub.f32 %v3746_v37, %v7299_v32  ;;  %v3747_v29 = vmul.f32 2.0, %v3722_v40  ;;  %5750 = vmatprep.mubr.bf16.mxu0 %v7418_v11  ;;  %v295_v32 = vld [vmem:[%s7712_s14 + $0x30] ss:$0 sm:$0xff] }
0x1571   :  { %v3765_v52 = vsub.f32 %v3749_v39, %v7301_v1 }
0x1572   :  { %v3763_v41 = vsub.f32 %v3747_v29, %v7307_v23  ;;  %v7544_v29 = vld [vmem:[%s7700_s2 + $0x50] sm:$0xff]  }
0x1573   :  { %v3776_v25 = vpack.c.bf16 %v3765_v52, %v3764_v31  ;;  %v7551_v52 = vld [vmem:[%s7700_s2 + $0x58] sm:$0xff]  }
0x1574   :  { %v3775_v16 = vpack.c.bf16 %v3763_v41, %v3762_v48  ;;  %v7538_v48 = vld [vmem:[%s7700_s2 + $0x48] sm:$0xff]   ;;  %v7556_v41 = vld [vmem:[%s7700_s2 + $0x60] sm:$0xff]  }
0x1576   :  { %5730 = vmatprep.mubr.msk.bf16.mxu1 %vm1243_vm4, %v3775_v16  ;;  %v7568_v16 = vld [vmem:[%s7700_s2 + $0x70] sm:$0xff]  }
0x1577   :  { %5731 = vmatmul.mubr.msk.bf16.gmra.mrb[96].mxu1 %vm1243_vm4, %v3776_v25  ;;  %v7563_v25 = vld [vmem:[%s7700_s2 + $0x68] sm:$0xff]  }
0x1632   :  { %v5720_v1 = vpop.f32.mrb[84].mxu1 }
0x1633   :  { %v3841_v26 = vpop.f32.mrb[85].mxu1  ;;  %v7428_v42 = vadd.f32 %v5720_v1, %v295_v32  ;;  %v6095_v1 = vld [vmem:[#allocation7 + $0x8] sm:$0xff]  }
0x1634   :  { %v7424_v23 = vadd.f32 %v3841_v26, %v295_v32  ;;  %v5721_v17 = vpop.f32.mrb[86].mxu1  ;;  %5766 = vmatprep.subr.bf16.mxu1 %v6095_v1  ;;  %v6096_v26 = vld [vmem:[#allocation7] sm:$0xff]  }
0x1635   :  { %v7426_v13 = vadd.f32 %v5721_v17, %v295_v32  ;;  %v3844_v14 = vpop.f32.mrb[87].mxu1  ;;  %v3938_v12 = vmax.f32 %v7428_v42, 0.0  ;;  %5767 = vmatpush3.bf16.msra.mxu1 %v6095_v1 }
0x1636   :  { %v7430_v27 = vadd.f32 %v3844_v14, %v295_v32  ;;  %v3936_v43 = vmax.f32 %v7424_v23, 0.0  ;;  %5784 = vmatprep.subr.bf16.mxu1 %v6096_v26 }
0x1637   :  { %v3939_v44 = vmax.f32 %v7426_v13, 0.0 }
0x1638   :  { %v3937_v28 = vmax.f32 %v7430_v27, 0.0 }
0x1639   :  { %v7446_v30 = vpack.c.bf16 %v3939_v44, %v3938_v12 }
0x163a   :  { %v7440_v60 = vpack.c.bf16 %v3937_v28, %v3936_v43  ;;  %v5724_v46 = vpop.f32.mrb[88].mxu1 }
0x163b   :  { %v3857_v53 = vpop.f32.mrb[89].mxu1  ;;  %v7454_v4 = vadd.f32 %v5724_v46, %v295_v32 }
0x163c   :  { %v7448_v51 = vadd.f32 %v3857_v53, %v295_v32  ;;  %v5725_v56 = vpop.f32.mrb[90].mxu1  ;;  %5734 = vmatprep.subr.bf16.mxu0 %v7440_v60 }
0x163d   :  { %v7451_v54 = vadd.f32 %v5725_v56, %v295_v32  ;;  %v3860_v59 = vpop.f32.mrb[91].mxu1  ;;  %5735 = vmatpush3.bf16.msra.mxu0 %v7440_v60  ;;  %v3942_v45 = vmax.f32 %v7454_v4, 0.0 }
0x163e   :  { %v7456_v58 = vadd.f32 %v3860_v59, %v295_v32  ;;  %5736 = vmatprep.subr.bf16.mxu0 %v7446_v30  ;;  %v3940_v0 = vmax.f32 %v7448_v51, 0.0 }
0x163f   :  { %v3943_v5 = vmax.f32 %v7451_v54, 0.0 }
0x1640   :  { %v3941_v55 = vmax.f32 %v7456_v58, 0.0 }
0x1641   :  { %5737 = vmatpush3.bf16.msra.mxu0 %v7446_v30  ;;  %v7474_v20 = vpack.c.bf16 %v3943_v5, %v3942_v45 }
0x1642   :  { %v7468_v57 = vpack.c.bf16 %v3941_v55, %v3940_v0  ;;  %v5728_v62 = vpop.f32.mrb[92].mxu1 }
0x1643   :  { %v3873_v24 = vpop.f32.mrb[93].mxu1  ;;  %v7482_v18 = vadd.f32 %v5728_v62, %v295_v32  ;;  %v6097_v62 = vld [vmem:[#allocation7 + $0x10] sm:$0xff]  }
0x1644   :  { %v7476_v21 = vadd.f32 %v3873_v24, %v295_v32  ;;  %v5729_v63 = vpop.f32.mrb[94].mxu1  ;;  %5738 = vmatprep.subr.bf16.mxu0 %v7468_v57 }
0x1645   :  { %v7479_v15 = vadd.f32 %v5729_v63, %v295_v32  ;;  %v3876_v8 = vpop.f32.mrb[95].mxu1  ;;  %5739 = vmatpush3.bf16.msra.mxu0 %v7468_v57  ;;  %v3946_v47 = vmax.f32 %v7482_v18, 0.0 }
0x1646   :  { %v7484_v10 = vadd.f32 %v3876_v8, %v295_v32  ;;  %5740 = vmatprep.subr.bf16.mxu0 %v7474_v20  ;;  %v3944_v6 = vmax.f32 %v7476_v21, 0.0 }
0x1647   :  { %v3947_v7 = vmax.f32 %v7479_v15, 0.0 }
0x1648   :  { %v3945_v9 = vmax.f32 %v7484_v10, 0.0 }
0x1649   :  { %5741 = vmatpush3.bf16.msra.mxu0 %v7474_v20  ;;  %v7502_v50 = vpack.c.bf16 %v3947_v7, %v3946_v47 }
0x164a   :  { %v7496_v3 = vpack.c.bf16 %v3945_v9, %v3944_v6  ;;  %v5732_v19 = vpop.f32.mrb[96].mxu1 }
0x164b   :  { %v3889_v61 = vpop.f32.mrb[97].mxu1  ;;  %v7510_v22 = vadd.f32 %v5732_v19, %v295_v32 }
0x164c   :  { %v7504_v49 = vadd.f32 %v3889_v61, %v295_v32  ;;  %v5733_v33 = vpop.f32.mrb[98].mxu1  ;;  %5742 = vmatprep.subr.bf16.mxu0 %v7496_v3 }
0x164d   :  { %v7507_v2 = vadd.f32 %v5733_v33, %v295_v32  ;;  %v3892_v34 = vpop.f32.mrb[99].mxu1  ;;  %5743 = vmatpush3.bf16.msra.mxu0 %v7496_v3  ;;  %v3950_v31 = vmax.f32 %v7510_v22, 0.0 }
0x164e   :  { %v7512_v35 = vadd.f32 %v3892_v34, %v295_v32  ;;  %5744 = vmatprep.subr.bf16.mxu0 %v7502_v50  ;;  %v3948_v36 = vmax.f32 %v7504_v49, 0.0  ;;  %v7575_v32 = vld [vmem:[%s7700_s2 + $0x78] sm:$0xff]  }
0x164f   :  { %v3951_v37 = vmax.f32 %v7507_v2, 0.0 }
0x1650   :  { %v3949_v38 = vmax.f32 %v7512_v35, 0.0 }
0x1651   :  { %5745 = vmatpush3.bf16.msra.mxu0 %v7502_v50  ;;  %v7530_v40 = vpack.c.bf16 %v3951_v37, %v3950_v31 }
0x1652   :  { %v7524_v39 = vpack.c.bf16 %v3949_v38, %v3948_v36 }
0x1654   :  { %5746 = vmatprep.subr.bf16.mxu0 %v7524_v39 }
0x1655   :  { %5747 = vmatpush3.bf16.msra.mxu0 %v7524_v39 }
0x1656   :  { %5748 = vmatprep.subr.bf16.mxu0 %v7530_v40 }
0x1659   :  { %5749 = vmatpush3.bf16.msra.mxu0 %v7530_v40 }
0x165c   :  { %5751 = vmatmul.mubr.bf16.vlgmr.msra.gmra.mrb[148].mxu0 %v7538_v48 }
0x165d   :  { %5754 = vmatprep.mubr.bf16.mxu0 %v7544_v29 }
0x1664   :  { %5755 = vmatmul.mubr.bf16.gmra.mrb[152].mxu0 %v7551_v52 }
0x1665   :  { %5758 = vmatprep.mubr.bf16.mxu0 %v7556_v41 }
0x166c   :  { %5759 = vmatmul.mubr.bf16.gmra.mrb[156].mxu0 %v7563_v25 }
0x166d   :  { %5762 = vmatprep.mubr.bf16.mxu0 %v7568_v16 }
0x1674   :  { %5763 = vmatmul.mubr.bf16.gmra.mrb[160].mxu0 %v7575_v32 }
0x1675   :  { %5818 = vmatprep.mubr.bf16.mxu0 %v7418_v11 }
0x172f   :  { %v5752_v17 = vpop.f32.mrb[148].mxu0 }
0x1730   :  { %v4044_v14 = vpop.f32.mrb[149].mxu0 }
0x1731   :  { %v5753_v46 = vpop.f32.mrb[150].mxu0 }
0x1732   :  { %v4111_v53 = vpack.c.bf16 %v5753_v46, %v5752_v17  ;;  %v4047_v56 = vpop.f32.mrb[151].mxu0 }
0x1733   :  { %v4110_v59 = vpack.c.bf16 %v4047_v56, %v4044_v14 }
0x1735   :  { %5768 = vmatprep.mubr.msk.bf16.mxu1 %vm1243_vm4, %v4110_v59  ;;  %5802 = vmatprep.subr.bf16.mxu0 %v4110_v59 }
0x1736   :  { %5769 = vmatmul.mubr.msk.bf16.vlgmr.msra.gmra.mrb[100].mxu1 %vm1243_vm4, %v4111_v53  ;;  %5803 = vmatpush3.bf16.msra.mxu0 %v4110_v59 }
0x1737   :  { %v5756_v24 = vpop.f32.mrb[152].mxu0  ;;  %5804 = vmatprep.subr.bf16.mxu0 %v4111_v53  ;;  %5785 = vmatpush3.bf16.msra.mxu1 %v6096_v26 }
0x1738   :  { %v4060_v11 = vpop.f32.mrb[153].mxu0  ;;  %5834 = vmatprep.subr.bf16.mxu1 %v6097_v62 }
0x1739   :  { %v5757_v63 = vpop.f32.mrb[154].mxu0 }
0x173a   :  { %v4113_v8 = vpack.c.bf16 %v5757_v63, %v5756_v24  ;;  %v4063_v19 = vpop.f32.mrb[155].mxu0  ;;  %5805 = vmatpush3.bf16.msra.mxu0 %v4111_v53 }
0x173b   :  { %v4112_v61 = vpack.c.bf16 %v4063_v19, %v4060_v11 }
0x173d   :  { %5772 = vmatprep.mubr.msk.bf16.mxu1 %vm1243_vm4, %v4112_v61  ;;  %5806 = vmatprep.subr.bf16.mxu0 %v4112_v61 }
0x173e   :  { %5773 = vmatmul.mubr.msk.bf16.gmra.mrb[104].mxu1 %vm1243_vm4, %v4113_v8  ;;  %5807 = vmatpush3.bf16.msra.mxu0 %v4112_v61 }
0x173f   :  { %v5760_v33 = vpop.f32.mrb[156].mxu0  ;;  %5808 = vmatprep.subr.bf16.mxu0 %v4113_v8 }
0x1740   :  { %v4076_v34 = vpop.f32.mrb[157].mxu0 }
0x1741   :  { %v5761_v1 = vpop.f32.mrb[158].mxu0 }
0x1742   :  { %v4115_v17 = vpack.c.bf16 %v5761_v1, %v5760_v33  ;;  %v4079_v14 = vpop.f32.mrb[159].mxu0  ;;  %5809 = vmatpush3.bf16.msra.mxu0 %v4113_v8 }
0x1743   :  { %v4114_v26 = vpack.c.bf16 %v4079_v14, %v4076_v34 }
0x1745   :  { %5776 = vmatprep.mubr.msk.bf16.mxu1 %vm1243_vm4, %v4114_v26  ;;  %5810 = vmatprep.subr.bf16.mxu0 %v4114_v26 }
0x1746   :  { %5777 = vmatmul.mubr.msk.bf16.gmra.mrb[108].mxu1 %vm1243_vm4, %v4115_v17  ;;  %5811 = vmatpush3.bf16.msra.mxu0 %v4114_v26 }
0x1747   :  { %v5764_v46 = vpop.f32.mrb[160].mxu0  ;;  %5812 = vmatprep.subr.bf16.mxu0 %v4115_v17 }
0x1748   :  { %v4092_v53 = vpop.f32.mrb[161].mxu0 }
0x1749   :  { %v5765_v56 = vpop.f32.mrb[162].mxu0 }
0x174a   :  { %v4117_v59 = vpack.c.bf16 %v5765_v56, %v5764_v46  ;;  %v4095_v24 = vpop.f32.mrb[163].mxu0  ;;  %5813 = vmatpush3.bf16.msra.mxu0 %v4115_v17 }
0x174b   :  { %v4116_v11 = vpack.c.bf16 %v4095_v24, %v4092_v53 }
0x174d   :  { %5780 = vmatprep.mubr.msk.bf16.mxu1 %vm1243_vm4, %v4116_v11  ;;  %5814 = vmatprep.subr.bf16.mxu0 %v4116_v11 }
0x174e   :  { %5781 = vmatmul.mubr.msk.bf16.gmra.mrb[112].mxu1 %vm1243_vm4, %v4117_v59  ;;  %5815 = vmatpush3.bf16.msra.mxu0 %v4116_v11 }
0x174f   :  { %5786 = vmatprep.mubr.msk.bf16.mxu1 %vm1243_vm4, %v7440_v60  ;;  %5816 = vmatprep.subr.bf16.mxu0 %v4117_v59 }
0x1752   :  { %5817 = vmatpush3.bf16.msra.mxu0 %v4117_v59 }
0x1755   :  { %5819 = vmatmul.mubr.bf16.vlgmr.msra.gmra.mrb[164].mxu0 %v7538_v48 }
0x1756   :  { %5787 = vmatmul.mubr.msk.bf16.vlgmr.msra.gmra.mrb[100].mxu1 %vm1243_vm4, %v7446_v30  ;;  %5822 = vmatprep.mubr.bf16.mxu0 %v7544_v29 }
0x1757   :  { %5790 = vmatprep.mubr.msk.bf16.mxu1 %vm1243_vm4, %v7468_v57  ;;  %5835 = vmatpush3.bf16.msra.mxu1 %v6097_v62 }
0x175d   :  { %5823 = vmatmul.mubr.bf16.gmra.mrb[168].mxu0 %v7551_v52 }
0x175e   :  { %5791 = vmatmul.mubr.msk.bf16.gmra.mrb[104].mxu1 %vm1243_vm4, %v7474_v20  ;;  %5826 = vmatprep.mubr.bf16.mxu0 %v7556_v41 }
0x175f   :  { %5794 = vmatprep.mubr.msk.bf16.mxu1 %vm1243_vm4, %v7496_v3 }
0x1765   :  { %5827 = vmatmul.mubr.bf16.gmra.mrb[172].mxu0 %v7563_v25 }
0x1766   :  { %5795 = vmatmul.mubr.msk.bf16.gmra.mrb[108].mxu1 %vm1243_vm4, %v7502_v50  ;;  %5830 = vmatprep.mubr.bf16.mxu0 %v7568_v16 }
0x1767   :  { %5798 = vmatprep.mubr.msk.bf16.mxu1 %vm1243_vm4, %v7524_v39 }
0x176d   :  { %5831 = vmatmul.mubr.bf16.gmra.mrb[176].mxu0 %v7575_v32 }
0x176e   :  { %5799 = vmatmul.mubr.msk.bf16.gmra.mrb[112].mxu1 %vm1243_vm4, %v7530_v40 }
0x1828   :  { %v5820_v60 = vpop.f32.mrb[164].mxu0 }
0x1829   :  { %v4471_v30 = vmul.f32 2.0, %v5820_v60  ;;  %v4406_v57 = vpop.f32.mrb[165].mxu0 }
0x182a   :  { %v4469_v20 = vmul.f32 2.0, %v4406_v57  ;;  %v5821_v3 = vpop.f32.mrb[166].mxu0 }
0x182b   :  { %v4472_v48 = vmul.f32 2.0, %v5821_v3  ;;  %v4409_v29 = vpop.f32.mrb[167].mxu0  ;;  %v4487_v50 = vsub.f32 %v4471_v30, %v3938_v12 }
0x182c   :  { %v4470_v52 = vmul.f32 2.0, %v4409_v29  ;;  %v4485_v39 = vsub.f32 %v4469_v20, %v3936_v43 }
0x182d   :  { %v4488_v41 = vsub.f32 %v4472_v48, %v3939_v44 }
0x182e   :  { %v4486_v40 = vsub.f32 %v4470_v52, %v3937_v28 }
0x182f   :  { %v4505_v25 = vpack.c.bf16 %v4488_v41, %v4487_v50 }
0x1830   :  { %v4504_v16 = vpack.c.bf16 %v4486_v40, %v4485_v39  ;;  %v5824_v32 = vpop.f32.mrb[168].mxu0 }
0x1831   :  { %v4475_v62 = vmul.f32 2.0, %v5824_v32  ;;  %v4422_v63 = vpop.f32.mrb[169].mxu0 }
0x1832   :  { %v4473_v8 = vmul.f32 2.0, %v4422_v63  ;;  %v5825_v19 = vpop.f32.mrb[170].mxu0  ;;  %5836 = vmatprep.mubr.msk.bf16.mxu1 %vm1243_vm4, %v4504_v16 }
0x1833   :  { %v4476_v42 = vmul.f32 2.0, %v5825_v19  ;;  %v4425_v12 = vpop.f32.mrb[171].mxu0  ;;  %5837 = vmatmul.mubr.msk.bf16.vlgmr.msra.gmra.mrb[100].mxu1 %vm1243_vm4, %v4505_v25  ;;  %v4491_v23 = vsub.f32 %v4475_v62, %v3942_v45 }
0x1834   :  { %v4474_v13 = vmul.f32 2.0, %v4425_v12  ;;  %v4489_v43 = vsub.f32 %v4473_v8, %v3940_v0 }
0x1835   :  { %v4492_v27 = vsub.f32 %v4476_v42, %v3943_v5 }
0x1836   :  { %v4490_v44 = vsub.f32 %v4474_v13, %v3941_v55 }
0x1837   :  { %v4507_v28 = vpack.c.bf16 %v4492_v27, %v4491_v23 }
0x1838   :  { %v4506_v61 = vpack.c.bf16 %v4490_v44, %v4489_v43  ;;  %v5828_v33 = vpop.f32.mrb[172].mxu0 }
0x1839   :  { %v4479_v34 = vmul.f32 2.0, %v5828_v33  ;;  %v4438_v1 = vpop.f32.mrb[173].mxu0 }
0x183a   :  { %v4477_v17 = vmul.f32 2.0, %v4438_v1  ;;  %v5829_v14 = vpop.f32.mrb[174].mxu0  ;;  %5840 = vmatprep.mubr.msk.bf16.mxu1 %vm1243_vm4, %v4506_v61 }
0x183b   :  { %v4480_v4 = vmul.f32 2.0, %v5829_v14  ;;  %v4441_v45 = vpop.f32.mrb[175].mxu0  ;;  %5841 = vmatmul.mubr.msk.bf16.gmra.mrb[104].mxu1 %vm1243_vm4, %v4507_v28  ;;  %v4495_v51 = vsub.f32 %v4479_v34, %v3946_v47 }
0x183c   :  { %v4478_v54 = vmul.f32 2.0, %v4441_v45  ;;  %v4493_v0 = vsub.f32 %v4477_v17, %v3944_v6 }
0x183d   :  { %v4496_v58 = vsub.f32 %v4480_v4, %v3947_v7 }
0x183e   :  { %v4494_v5 = vsub.f32 %v4478_v54, %v3945_v9 }
0x183f   :  { %v4509_v55 = vpack.c.bf16 %v4496_v58, %v4495_v51 }
0x1840   :  { %v4508_v26 = vpack.c.bf16 %v4494_v5, %v4493_v0  ;;  %v5832_v46 = vpop.f32.mrb[176].mxu0 }
0x1841   :  { %v4483_v53 = vmul.f32 2.0, %v5832_v46  ;;  %v4454_v56 = vpop.f32.mrb[177].mxu0 }
0x1842   :  { %v4481_v59 = vmul.f32 2.0, %v4454_v56  ;;  %v5833_v24 = vpop.f32.mrb[178].mxu0  ;;  %5844 = vmatprep.mubr.msk.bf16.mxu1 %vm1243_vm4, %v4508_v26 }
0x1843   :  { %v4484_v18 = vmul.f32 2.0, %v5833_v24  ;;  %v4457_v47 = vpop.f32.mrb[179].mxu0  ;;  %5845 = vmatmul.mubr.msk.bf16.gmra.mrb[108].mxu1 %vm1243_vm4, %v4509_v55  ;;  %v4499_v21 = vsub.f32 %v4483_v53, %v3950_v31 }
0x1844   :  { %v4482_v15 = vmul.f32 2.0, %v4457_v47  ;;  %v4497_v6 = vsub.f32 %v4481_v59, %v3948_v36 }
0x1845   :  { %v4500_v10 = vsub.f32 %v4484_v18, %v3951_v37 }
0x1846   :  { %v4498_v7 = vsub.f32 %v4482_v15, %v3949_v38 }
0x1847   :  { %v4511_v9 = vpack.c.bf16 %v4500_v10, %v4499_v21 }
0x1848   :  { %v4510_v11 = vpack.c.bf16 %v4498_v7, %v4497_v6 }
0x184a   :  { %5848 = vmatprep.mubr.msk.bf16.mxu1 %vm1243_vm4, %v4510_v11 }
0x184b   :  { %5849 = vmatmul.mubr.msk.bf16.gmra.mrb[112].mxu1 %vm1243_vm4, %v4511_v9 }
0x1906   :  { %v5838_v60 = vpop.f32.mrb[100].mxu1 }
0x1907   :  { %4657 = vst [vmem:[%s7715_s17 + $0x10] sm:$0xff] %v5838_v60  ;;  %v4576_v22 = vpop.f32.mrb[101].mxu1 }
0x1908   :  { %4655 = vst [vmem:[%s7715_s17] sm:$0xff] %v4576_v22  ;;  %v5839_v49 = vpop.f32.mrb[102].mxu1 }
0x1909   :  { %4658 = vst [vmem:[%s7715_s17 + $0x18] sm:$0xff] %v5839_v49  ;;  %v4579_v2 = vpop.f32.mrb[103].mxu1 }
0x190a   :  { %4656 = vst [vmem:[%s7715_s17 + $0x8] sm:$0xff] %v4579_v2 }
0x190e   :  { %v5842_v35 = vpop.f32.mrb[104].mxu1 }
0x190f   :  { %4661 = vst [vmem:[%s7715_s17 + $0x30] sm:$0xff] %v5842_v35  ;;  %v4592_v36 = vpop.f32.mrb[105].mxu1 }
0x1910   :  { %4659 = vst [vmem:[%s7715_s17 + $0x20] sm:$0xff] %v4592_v36  ;;  %v5843_v37 = vpop.f32.mrb[106].mxu1 }
0x1911   :  { %4662 = vst [vmem:[%s7715_s17 + $0x38] sm:$0xff] %v5843_v37  ;;  %v4595_v38 = vpop.f32.mrb[107].mxu1 }
0x1912   :  { %4660 = vst [vmem:[%s7715_s17 + $0x28] sm:$0xff] %v4595_v38 }
0x1916   :  { %v5846_v31 = vpop.f32.mrb[108].mxu1 }
0x1917   :  { %4665 = vst [vmem:[%s7715_s17 + $0x50] sm:$0xff] %v5846_v31  ;;  %v4608_v30 = vpop.f32.mrb[109].mxu1 }
0x1918   :  { %4663 = vst [vmem:[%s7715_s17 + $0x40] sm:$0xff] %v4608_v30  ;;  %v5847_v57 = vpop.f32.mrb[110].mxu1 }
0x1919   :  { %4666 = vst [vmem:[%s7715_s17 + $0x58] sm:$0xff] %v5847_v57  ;;  %v4611_v20 = vpop.f32.mrb[111].mxu1 }
0x191a   :  { %4664 = vst [vmem:[%s7715_s17 + $0x48] sm:$0xff] %v4611_v20 }
0x191e   :  { %v5850_v3 = vpop.f32.mrb[112].mxu1 }
0x191f   :  { %4669 = vst [vmem:[%s7715_s17 + $0x70] sm:$0xff] %v5850_v3  ;;  %v4624_v48 = vpop.f32.mrb[113].mxu1 }
0x1920   :  { %4667 = vst [vmem:[%s7715_s17 + $0x60] sm:$0xff] %v4624_v48  ;;  %v5851_v29 = vpop.f32.mrb[114].mxu1 }
0x1921   :  { %4670 = vst [vmem:[%s7715_s17 + $0x78] sm:$0xff] %v5851_v29  ;;  %v4627_v52 = vpop.f32.mrb[115].mxu1 }
0x1922   :  { %4668 = vst [vmem:[%s7715_s17 + $0x68] sm:$0xff] %v4627_v52 }
0x1923   :  { %4676 = vsyncpa [#allocation3], 1 }
0x1924   :  { %4677 = vsyncpa [#allocation5], 1 }
0x1925   :  { %4678 = vsyncpa [#allocation8], 1 }
0x1926   :  { %4679 = vsyncpa [#allocation11], 1 }

</bundles_post_ra>
